<compile_context>
chip_gen: v7x
topology: tpu7x:2x2x1
jax: 0.10.0
libtpu: 0.0.40
codegen_flags: <defaults>
</compile_context>

<pallas_src>
import functools

import jax
import jax.numpy as jnp
from jax.experimental import pallas as pl
from jax.experimental.pallas import tpu as pltpu


def _point_mlp_max_kernel(x_ref, w1_ref, s1_ref, b1_ref,
                          w2_ref, s2_ref, b2_ref,
                          w3_ref, s3_ref, b3_ref,
                          o_ref, *, n_points, tn):
    kt = pl.program_id(1)

    x = x_ref[0]                                         # (tn, 256) bf16
    h = jnp.dot(x, w1_ref[...], preferred_element_type=jnp.float32)
    h = jnp.maximum(h * s1_ref[...] + b1_ref[...], 0.0)
    h = jnp.dot(h.astype(jnp.bfloat16), w2_ref[...],
                preferred_element_type=jnp.float32)
    h = jnp.maximum(h * s2_ref[...] + b2_ref[...], 0.0)
    h = jnp.dot(h.astype(jnp.bfloat16), w3_ref[...],
                preferred_element_type=jnp.float32)
    h = jnp.maximum(h * s3_ref[...] + b3_ref[...], 0.0)  # (tn, 1024), >= 0

    if n_points % tn != 0:
        # Tail tile: rows past N hold unspecified data; zero them. Safe for the
        # max because every valid post-relu value is >= 0.
        row = jax.lax.broadcasted_iota(jnp.int32, h.shape, 0) + kt * tn
        h = jnp.where(row < n_points, h, 0.0)

    m = jnp.max(h, axis=0, keepdims=True)                # (1, 1024)

    @pl.when(kt == 0)
    def _():
        o_ref[0] = m

    @pl.when(kt != 0)
    def _():
        o_ref[0] = jnp.maximum(o_ref[0], m)


def _fc_head_kernel(p_ref, w4_ref, s4_ref, b4_ref,
                    w5_ref, s5_ref, b5_ref,
                    w6_ref, b6_ref, o_ref, h_ref):
    j = pl.program_id(0)

    @pl.when(j == 0)
    def _():
        g = jnp.dot(p_ref[...].astype(jnp.bfloat16), w4_ref[...],
                    preferred_element_type=jnp.float32)
        g = jnp.maximum(g * s4_ref[...] + b4_ref[...], 0.0)
        g = jnp.dot(g.astype(jnp.bfloat16), w5_ref[...],
                    preferred_element_type=jnp.float32)
        g = jnp.maximum(g * s5_ref[...] + b5_ref[...], 0.0)
        h_ref[...] = g                                   # (B, 256) f32, persists

    z = jnp.dot(h_ref[...].astype(jnp.bfloat16), w6_ref[...],
                preferred_element_type=jnp.float32)      # (B, tc)
    # b6 already contains fc3 bias + the flattened eye(256) identity.
    o_ref[...] = (z + b6_ref[...]).astype(o_ref.dtype)


def t4_net_forward(x, params, *, tn=1024, tc=8192):
    """x: (B, 256, N) NCW like the torch module. Returns (B, 256, 256)."""
    (w1, s1, b1, w2, s2, b2, w3, s3, b3,
     w4, s4, b4, w5, s5, b5, w6, b6) = params
    B, C, N = x.shape
    E = C
    H1, H2, H3 = w1.shape[1], w2.shape[1], w3.shape[1]
    F1, F2, F3 = w4.shape[1], w5.shape[1], w6.shape[1]

    # Layout plumbing: channels onto lanes, single bf16 cast (halves the
    # dominant HBM stream). No full-array pad copy is made.
    x_rows = jnp.transpose(x, (0, 2, 1)).astype(jnp.bfloat16)    # (B, N, C)

    tn = max(8, min(tn, N))
    if tn < N:
        tn = max(8, (tn // 8) * 8)
    kt = pl.cdiv(N, tn)

    full2 = lambda b, k: (0, 0)
    flops1 = 2 * B * N * (E * H1 + H1 * H2 + H2 * H3)
    bytes1 = (B * N * E) * 2 + (E * H1 + H1 * H2 + H2 * H3) * 2 \
        + (H1 + H2 + H3) * 8 + B * H3 * 4

    pooled = pl.pallas_call(
        functools.partial(_point_mlp_max_kernel, n_points=N, tn=tn),
        out_shape=jax.ShapeDtypeStruct((B, 1, H3), jnp.float32),
        grid_spec=pltpu.PrefetchScalarGridSpec(
            num_scalar_prefetch=0,
            grid=(B, kt),
            in_specs=[
                pl.BlockSpec((1, tn, E), lambda b, k: (b, k, 0)),   # x tile
                pl.BlockSpec((E, H1), full2),                       # conv1 W
                pl.BlockSpec((1, H1), full2), pl.BlockSpec((1, H1), full2),
                pl.BlockSpec((H1, H2), full2),                      # conv2 W
                pl.BlockSpec((1, H2), full2), pl.BlockSpec((1, H2), full2),
                pl.BlockSpec((H2, H3), full2),                      # conv3 W
                pl.BlockSpec((1, H3), full2), pl.BlockSpec((1, H3), full2),
            ],
            out_specs=pl.BlockSpec((1, 1, H3), lambda b, k: (b, 0, 0)),
        ),
        compiler_params=pltpu.CompilerParams(
            dimension_semantics=("parallel", "arbitrary")),
        cost_estimate=pl.CostEstimate(
            flops=flops1, transcendentals=0, bytes_accessed=bytes1),
    )(x_rows, w1, s1, b1, w2, s2, b2, w3, s3, b3)

    pooled2d = pooled.reshape(B, H3)

    tc = min(tc, F3)
    assert F3 % tc == 0 and tc % 128 == 0
    nj = F3 // tc

    full1 = lambda j: (0, 0)
    flops2 = 2 * B * (H3 * F1 + F1 * F2 + F2 * F3)
    bytes2 = B * H3 * 4 + (H3 * F1 + F1 * F2 + F2 * F3) * 2 \
        + (F1 + F2) * 8 + F3 * 4 + B * F3 * 4

    out = pl.pallas_call(
        _fc_head_kernel,
        out_shape=jax.ShapeDtypeStruct((B, F3), jnp.float32),
        grid_spec=pltpu.PrefetchScalarGridSpec(
            num_scalar_prefetch=0,
            grid=(nj,),
            in_specs=[
                pl.BlockSpec((B, H3), full1),                       # pooled feats
                pl.BlockSpec((H3, F1), full1),                      # fc1 W
                pl.BlockSpec((1, F1), full1), pl.BlockSpec((1, F1), full1),
                pl.BlockSpec((F1, F2), full1),                      # fc2 W
                pl.BlockSpec((1, F2), full1), pl.BlockSpec((1, F2), full1),
                pl.BlockSpec((F2, tc), lambda j: (0, j)),           # fc3 W tile
                pl.BlockSpec((1, tc), lambda j: (0, j)),            # bias+iden
            ],
            out_specs=pl.BlockSpec((B, tc), lambda j: (0, j)),
            scratch_shapes=[pltpu.VMEM((B, F2), jnp.float32)],
        ),
        compiler_params=pltpu.CompilerParams(
            dimension_semantics=("arbitrary",)),
        cost_estimate=pl.CostEstimate(
            flops=flops2, transcendentals=0, bytes_accessed=bytes2),
    )(pooled2d, w4, s4, b4, w5, s5, b5, w6, b6)

    return out.reshape(B, 256, 256)


def make_params(key, dtype_w=jnp.bfloat16):
    """Synthetic weights matching T4_Net shapes.
    Conv/Linear weights are stored transposed (in, out) so every layer is x @ W.
    BatchNorm is folded in inference mode; fc biases and the constant eye(256)
    are folded into the per-channel / per-column shifts."""
    eps = 1e-5
    ks = iter(jax.random.split(key, 32))

    def lin_w(ci, co):
        return 0.05 * jax.random.normal(next(ks), (ci, co), jnp.float32)

    def bn_fold(c, bias=None):
        g = 1.0 + 0.1 * jax.random.normal(next(ks), (c,), jnp.float32)
        be = 0.1 * jax.random.normal(next(ks), (c,), jnp.float32)
        mu = 0.1 * jax.random.normal(next(ks), (c,), jnp.float32)
        var = jnp.abs(jax.random.normal(next(ks), (c,), jnp.float32)) + 0.5
        s = g / jnp.sqrt(var + eps)
        sh = be - mu * s
        if bias is not None:
            sh = sh + s * bias
        return s.reshape(1, c), sh.reshape(1, c)

    w1 = lin_w(256, 256);   s1, b1 = bn_fold(256)
    w2 = lin_w(256, 512);   s2, b2 = bn_fold(512)
    w3 = lin_w(512, 1024);  s3, b3 = bn_fold(1024)

    fc1_b = 0.1 * jax.random.normal(next(ks), (512,), jnp.float32)
    w4 = lin_w(1024, 512);  s4, b4 = bn_fold(512, bias=fc1_b)
    fc2_b = 0.1 * jax.random.normal(next(ks), (256,), jnp.float32)
    w5 = lin_w(512, 256);   s5, b5 = bn_fold(256, bias=fc2_b)

    w6 = lin_w(256, 256 * 256)
    fc3_b = 0.1 * jax.random.normal(next(ks), (256 * 256,), jnp.float32)
    b6 = (fc3_b + jnp.eye(256, dtype=jnp.float32).reshape(-1)).reshape(1, -1)

    cast = lambda w: w.astype(dtype_w)
    return (cast(w1), s1, b1, cast(w2), s2, b2, cast(w3), s3, b3,
            cast(w4), s4, b4, cast(w5), s5, b5, cast(w6), b6)


def t4_net_reference(x, params):
    """Pure-JAX reference of the same forward (bf16 matmul operands, f32 acc)."""
    (w1, s1, b1, w2, s2, b2, w3, s3, b3,
     w4, s4, b4, w5, s5, b5, w6, b6) = params
    B, C, N = x.shape
    f32, bf16 = jnp.float32, jnp.bfloat16
    xr = jnp.transpose(x, (0, 2, 1)).astype(bf16).reshape(B * N, C)
    h = jnp.dot(xr, w1, preferred_element_type=f32)
    h = jnp.maximum(h * s1 + b1, 0.0)
    h = jnp.dot(h.astype(bf16), w2, preferred_element_type=f32)
    h = jnp.maximum(h * s2 + b2, 0.0)
    h = jnp.dot(h.astype(bf16), w3, preferred_element_type=f32)
    h = jnp.maximum(h * s3 + b3, 0.0)
    p = jnp.max(h.reshape(B, N, -1), axis=1)             # (B, 1024)
    g = jnp.dot(p.astype(bf16), w4, preferred_element_type=f32)
    g = jnp.maximum(g * s4 + b4, 0.0)
    g = jnp.dot(g.astype(bf16), w5, preferred_element_type=f32)
    g = jnp.maximum(g * s5 + b5, 0.0)
    z = jnp.dot(g.astype(bf16), w6, preferred_element_type=f32) + b6
    return z.reshape(B, 256, 256)


if __name__ == "__main__":
    key = jax.random.PRNGKey(0)
    k_in, k_par = jax.random.split(key)

    B, C, N = 2, 256, 96          # channels fixed at 256 by the module
    x = jax.random.normal(k_in, (B, C, N), jnp.float32)
    params = make_params(k_par)

    # Small tn to exercise the multi-tile max accumulation + tail mask.
    out = t4_net_forward(x, params, tn=64, tc=8192)
    out = jax.block_until_ready(out)

    ref = t4_net_reference(x, params)
    assert out.shape == (B, 256, 256)
    assert not bool(jnp.any(jnp.isnan(out)))
    assert jnp.allclose(out, ref, atol=1e-2, rtol=1e-2), \
        float(jnp.max(jnp.abs(out - ref)))

    print("KERNEL_OK")
</pallas_src>

<mosaic_0001>
module attributes {stable_mosaic.version = 11 : i64} {
  func.func @_point_mlp_max_kernel(%arg0: i32, %arg1: i32, %arg2: memref<1x64x256xbf16, #tpu.memory_space<vmem>>, %arg3: memref<256x256xbf16, #tpu.memory_space<vmem>>, %arg4: memref<1x256xf32, #tpu.memory_space<vmem>>, %arg5: memref<1x256xf32, #tpu.memory_space<vmem>>, %arg6: memref<256x512xbf16, #tpu.memory_space<vmem>>, %arg7: memref<1x512xf32, #tpu.memory_space<vmem>>, %arg8: memref<1x512xf32, #tpu.memory_space<vmem>>, %arg9: memref<512x1024xbf16, #tpu.memory_space<vmem>>, %arg10: memref<1x1024xf32, #tpu.memory_space<vmem>>, %arg11: memref<1x1024xf32, #tpu.memory_space<vmem>>, %arg12: memref<1x1x1024xf32, #tpu.memory_space<vmem>>) attributes {dimension_semantics = [#tpu.dimension_semantics<parallel>, #tpu.dimension_semantics<arbitrary>], iteration_bounds = array<i64: 2, 2>, scalar_prefetch = 0 : i64, scratch_operands = 0 : i64, tpu.core_type = #tpu.core_type<tc>, window_params = [{transform_indices = @transform_0, window_bounds = array<i64: 1, 64, 256>}, {pipeline_mode = #tpu.pipeline_mode<synchronous>, transform_indices = @transform_1, window_bounds = array<i64: 256, 256>}, {pipeline_mode = #tpu.pipeline_mode<synchronous>, transform_indices = @transform_2, window_bounds = array<i64: 1, 256>}, {pipeline_mode = #tpu.pipeline_mode<synchronous>, transform_indices = @transform_3, window_bounds = array<i64: 1, 256>}, {pipeline_mode = #tpu.pipeline_mode<synchronous>, transform_indices = @transform_4, window_bounds = array<i64: 256, 512>}, {pipeline_mode = #tpu.pipeline_mode<synchronous>, transform_indices = @transform_5, window_bounds = array<i64: 1, 512>}, {pipeline_mode = #tpu.pipeline_mode<synchronous>, transform_indices = @transform_6, window_bounds = array<i64: 1, 512>}, {pipeline_mode = #tpu.pipeline_mode<synchronous>, transform_indices = @transform_7, window_bounds = array<i64: 512, 1024>}, {pipeline_mode = #tpu.pipeline_mode<synchronous>, transform_indices = @transform_8, window_bounds = array<i64: 1, 1024>}, {pipeline_mode = #tpu.pipeline_mode<synchronous>, transform_indices = @transform_9, window_bounds = array<i64: 1, 1024>}, {transform_indices = @transform_10, window_bounds = array<i64: 1, 1, 1024>}]} {
    %c0 = arith.constant 0 : index
    %c0_0 = arith.constant 0 : index
    %c0_1 = arith.constant 0 : index
    %0 = vector.load %arg2[%c0, %c0_0, %c0_1] : memref<1x64x256xbf16, #tpu.memory_space<vmem>>, vector<1x64x256xbf16>
    %1 = vector.shape_cast %0 : vector<1x64x256xbf16> to vector<64x256xbf16>
    %c0_2 = arith.constant 0 : index
    %c0_3 = arith.constant 0 : index
    %2 = vector.load %arg3[%c0_2, %c0_3] : memref<256x256xbf16, #tpu.memory_space<vmem>>, vector<256x256xbf16>
    %cst = arith.constant dense<0.000000e+00> : vector<64x256xf32>
    %3 = tpu.matmul %1, %2, %cst {dimension_numbers = #tpu.dot_dimension_numbers<[1], [0], [0], [1], [0, 0, 1, 1], [], []>} : vector<64x256xbf16>, vector<256x256xbf16>, vector<64x256xf32> -> vector<64x256xf32>
    %c0_4 = arith.constant 0 : index
    %c0_5 = arith.constant 0 : index
    %4 = vector.load %arg4[%c0_4, %c0_5] : memref<1x256xf32, #tpu.memory_space<vmem>>, vector<1x256xf32>
    %5 = vector.broadcast %4 : vector<1x256xf32> to vector<64x256xf32>
    %6 = arith.mulf %3, %5 : vector<64x256xf32>
    %c0_6 = arith.constant 0 : index
    %c0_7 = arith.constant 0 : index
    %7 = vector.load %arg5[%c0_6, %c0_7] : memref<1x256xf32, #tpu.memory_space<vmem>>, vector<1x256xf32>
    %8 = vector.broadcast %7 : vector<1x256xf32> to vector<64x256xf32>
    %9 = arith.addf %6, %8 : vector<64x256xf32>
    %cst_8 = arith.constant 0.000000e+00 : f32
    %10 = vector.broadcast %cst_8 : f32 to vector<64x256xf32>
    %11 = arith.maximumf %9, %10 : vector<64x256xf32>
    %12 = arith.truncf %11 : vector<64x256xf32> to vector<64x256xbf16>
    %c0_9 = arith.constant 0 : index
    %c0_10 = arith.constant 0 : index
    %13 = vector.load %arg6[%c0_9, %c0_10] : memref<256x512xbf16, #tpu.memory_space<vmem>>, vector<256x512xbf16>
    %cst_11 = arith.constant dense<0.000000e+00> : vector<64x512xf32>
    %14 = tpu.matmul %12, %13, %cst_11 {dimension_numbers = #tpu.dot_dimension_numbers<[1], [0], [0], [1], [0, 0, 1, 1], [], []>} : vector<64x256xbf16>, vector<256x512xbf16>, vector<64x512xf32> -> vector<64x512xf32>
    %c0_12 = arith.constant 0 : index
    %c0_13 = arith.constant 0 : index
    %15 = vector.load %arg7[%c0_12, %c0_13] : memref<1x512xf32, #tpu.memory_space<vmem>>, vector<1x512xf32>
    %16 = vector.broadcast %15 : vector<1x512xf32> to vector<64x512xf32>
    %17 = arith.mulf %14, %16 : vector<64x512xf32>
    %c0_14 = arith.constant 0 : index
    %c0_15 = arith.constant 0 : index
    %18 = vector.load %arg8[%c0_14, %c0_15] : memref<1x512xf32, #tpu.memory_space<vmem>>, vector<1x512xf32>
    %19 = vector.broadcast %18 : vector<1x512xf32> to vector<64x512xf32>
    %20 = arith.addf %17, %19 : vector<64x512xf32>
    %cst_16 = arith.constant 0.000000e+00 : f32
    %21 = vector.broadcast %cst_16 : f32 to vector<64x512xf32>
    %22 = arith.maximumf %20, %21 : vector<64x512xf32>
    %23 = arith.truncf %22 : vector<64x512xf32> to vector<64x512xbf16>
    %c0_17 = arith.constant 0 : index
    %c0_18 = arith.constant 0 : index
    %24 = vector.load %arg9[%c0_17, %c0_18] : memref<512x1024xbf16, #tpu.memory_space<vmem>>, vector<512x1024xbf16>
    %cst_19 = arith.constant dense<0.000000e+00> : vector<64x1024xf32>
    %25 = tpu.matmul %23, %24, %cst_19 {dimension_numbers = #tpu.dot_dimension_numbers<[1], [0], [0], [1], [0, 0, 1, 1], [], []>} : vector<64x512xbf16>, vector<512x1024xbf16>, vector<64x1024xf32> -> vector<64x1024xf32>
    %c0_20 = arith.constant 0 : index
    %c0_21 = arith.constant 0 : index
    %26 = vector.load %arg10[%c0_20, %c0_21] : memref<1x1024xf32, #tpu.memory_space<vmem>>, vector<1x1024xf32>
    %27 = vector.broadcast %26 : vector<1x1024xf32> to vector<64x1024xf32>
    %28 = arith.mulf %25, %27 : vector<64x1024xf32>
    %c0_22 = arith.constant 0 : index
    %c0_23 = arith.constant 0 : index
    %29 = vector.load %arg11[%c0_22, %c0_23] : memref<1x1024xf32, #tpu.memory_space<vmem>>, vector<1x1024xf32>
    %30 = vector.broadcast %29 : vector<1x1024xf32> to vector<64x1024xf32>
    %31 = arith.addf %28, %30 : vector<64x1024xf32>
    %cst_24 = arith.constant 0.000000e+00 : f32
    %32 = vector.broadcast %cst_24 : f32 to vector<64x1024xf32>
    %33 = arith.maximumf %31, %32 : vector<64x1024xf32>
    %34 = tpu.iota {dimensions = array<i32: 0>} : vector<64x1024xi32>
    %c64_i32 = arith.constant 64 : i32
    %35 = arith.muli %arg1, %c64_i32 : i32
    %36 = vector.broadcast %35 : i32 to vector<64x1024xi32>
    %37 = arith.addi %34, %36 : vector<64x1024xi32>
    %c96_i32 = arith.constant 96 : i32
    %38 = vector.broadcast %c96_i32 : i32 to vector<64x1024xi32>
    %39 = arith.cmpi slt, %37, %38 : vector<64x1024xi32>
    %cst_25 = arith.constant 0.000000e+00 : f32
    %40 = vector.broadcast %cst_25 : f32 to vector<64x1024xf32>
    %41 = arith.select %39, %33, %40 : vector<64x1024xi1>, vector<64x1024xf32>
    %cst_26 = arith.constant dense<0xFF800000> : vector<1024xf32>
    %42 = vector.multi_reduction <maximumf>, %41, %cst_26 [0] : vector<64x1024xf32> to vector<1024xf32>
    %43 = vector.shape_cast %42 : vector<1024xf32> to vector<1x1024xf32>
    %c0_i32 = arith.constant 0 : i32
    %44 = arith.cmpi eq, %arg1, %c0_i32 : i32
    %45 = arith.extui %44 : i1 to i32
    %c0_i32_27 = arith.constant 0 : i32
    %46 = arith.cmpi ne, %45, %c0_i32_27 : i32
    scf.if %46 {
      %c0_30 = arith.constant 0 : index
      %c0_31 = arith.constant 0 : index
      %c0_32 = arith.constant 0 : index
      %50 = vector.load %arg12[%c0_30, %c0_31, %c0_32] : memref<1x1x1024xf32, #tpu.memory_space<vmem>>, vector<1x1x1024xf32>
      %51 = vector.shape_cast %50 : vector<1x1x1024xf32> to vector<1x1024xf32>
      %52 = vector.shape_cast %43 : vector<1x1024xf32> to vector<1x1x1024xf32>
      tpu.vector_store %arg12[%c0_30, %c0_31, %c0_32], %52 {strides = array<i32>} : memref<1x1x1024xf32, #tpu.memory_space<vmem>>, vector<1x1x1024xf32>,
    } else {
    }
    %c0_i32_28 = arith.constant 0 : i32
    %47 = arith.cmpi ne, %arg1, %c0_i32_28 : i32
    %48 = arith.extui %47 : i1 to i32
    %c0_i32_29 = arith.constant 0 : i32
    %49 = arith.cmpi ne, %48, %c0_i32_29 : i32
    scf.if %49 {
      %c0_30 = arith.constant 0 : index
      %c0_31 = arith.constant 0 : index
      %c0_32 = arith.constant 0 : index
      %50 = vector.load %arg12[%c0_30, %c0_31, %c0_32] : memref<1x1x1024xf32, #tpu.memory_space<vmem>>, vector<1x1x1024xf32>
      %51 = vector.shape_cast %50 : vector<1x1x1024xf32> to vector<1x1024xf32>
      %52 = arith.maximumf %51, %43 : vector<1x1024xf32>
      %c0_33 = arith.constant 0 : index
      %c0_34 = arith.constant 0 : index
      %c0_35 = arith.constant 0 : index
      %53 = vector.load %arg12[%c0_33, %c0_34, %c0_35] : memref<1x1x1024xf32, #tpu.memory_space<vmem>>, vector<1x1x1024xf32>
      %54 = vector.shape_cast %53 : vector<1x1x1024xf32> to vector<1x1024xf32>
      %55 = vector.shape_cast %52 : vector<1x1024xf32> to vector<1x1x1024xf32>
      tpu.vector_store %arg12[%c0_33, %c0_34, %c0_35], %55 {strides = array<i32>} : memref<1x1x1024xf32, #tpu.memory_space<vmem>>, vector<1x1x1024xf32>,
    } else {
    }
    return
  }
  func.func @transform_0(%arg0: i32, %arg1: i32) -> (i32, i32, i32) {
    %c0_i32 = arith.constant 0 : i32
    %c0_i32_0 = arith.constant 0 : i32
    return %arg0, %arg1, %c0_i32 : i32, i32, i32
  }
  func.func @transform_1(%arg0: i32, %arg1: i32) -> (i32, i32) {
    %c0_i32 = arith.constant 0 : i32
    %c0_i32_0 = arith.constant 0 : i32
    %c0_i32_1 = arith.constant 0 : i32
    return %c0_i32, %c0_i32_0 : i32, i32
  }
  func.func @transform_2(%arg0: i32, %arg1: i32) -> (i32, i32) {
    %c0_i32 = arith.constant 0 : i32
    %c0_i32_0 = arith.constant 0 : i32
    %c0_i32_1 = arith.constant 0 : i32
    return %c0_i32, %c0_i32_0 : i32, i32
  }
  func.func @transform_3(%arg0: i32, %arg1: i32) -> (i32, i32) {
    %c0_i32 = arith.constant 0 : i32
    %c0_i32_0 = arith.constant 0 : i32
    %c0_i32_1 = arith.constant 0 : i32
    return %c0_i32, %c0_i32_0 : i32, i32
  }
  func.func @transform_4(%arg0: i32, %arg1: i32) -> (i32, i32) {
    %c0_i32 = arith.constant 0 : i32
    %c0_i32_0 = arith.constant 0 : i32
    %c0_i32_1 = arith.constant 0 : i32
    return %c0_i32, %c0_i32_0 : i32, i32
  }
  func.func @transform_5(%arg0: i32, %arg1: i32) -> (i32, i32) {
    %c0_i32 = arith.constant 0 : i32
    %c0_i32_0 = arith.constant 0 : i32
    %c0_i32_1 = arith.constant 0 : i32
    return %c0_i32, %c0_i32_0 : i32, i32
  }
  func.func @transform_6(%arg0: i32, %arg1: i32) -> (i32, i32) {
    %c0_i32 = arith.constant 0 : i32
    %c0_i32_0 = arith.constant 0 : i32
    %c0_i32_1 = arith.constant 0 : i32
    return %c0_i32, %c0_i32_0 : i32, i32
  }
  func.func @transform_7(%arg0: i32, %arg1: i32) -> (i32, i32) {
    %c0_i32 = arith.constant 0 : i32
    %c0_i32_0 = arith.constant 0 : i32
    %c0_i32_1 = arith.constant 0 : i32
    return %c0_i32, %c0_i32_0 : i32, i32
  }
  func.func @transform_8(%arg0: i32, %arg1: i32) -> (i32, i32) {
    %c0_i32 = arith.constant 0 : i32
    %c0_i32_0 = arith.constant 0 : i32
    %c0_i32_1 = arith.constant 0 : i32
    return %c0_i32, %c0_i32_0 : i32, i32
  }
  func.func @transform_9(%arg0: i32, %arg1: i32) -> (i32, i32) {
    %c0_i32 = arith.constant 0 : i32
    %c0_i32_0 = arith.constant 0 : i32
    %c0_i32_1 = arith.constant 0 : i32
    return %c0_i32, %c0_i32_0 : i32, i32
  }
  func.func @transform_10(%arg0: i32, %arg1: i32) -> (i32, i32, i32) {
    %c0_i32 = arith.constant 0 : i32
    %c0_i32_0 = arith.constant 0 : i32
    %c0_i32_1 = arith.constant 0 : i32
    return %arg0, %c0_i32, %c0_i32_0 : i32, i32, i32
  }
}

</mosaic_0001>

<bundles_post_ra>
// kernel: tpu_custom_call.1
= control target key start
LH: loop header
LB: loop body
LE: loop exit
PB: predicated region body
PF: predicated region fallthrough
CT: control target
= control target key end

     0   :  { %s6932_s0 = inlined_call_operand.hbm [shape: bf16[2,96,256], index: 0, kind: input, shape index: {}]   ;;  %s6933_s1 = inlined_call_operand.hbm [shape: bf16[256,256], index: 1, kind: input, shape index: {}]   ;;  %s6934_s2 = inlined_call_operand.vmem [shape: f32[1,256], index: 2, kind: input, shape index: {}]   ;;  %s6935_s3 = inlined_call_operand.hbm [shape: f32[1,256], index: 3, kind: input, shape index: {}]   ;;  %s6936_s4 = inlined_call_operand.hbm [shape: bf16[256,512], index: 4, kind: input, shape index: {}]   ;;  %s6937_s5 = inlined_call_operand.hbm [shape: f32[1,512], index: 5, kind: input, shape index: {}]   ;;  %s6938_s6 = inlined_call_operand.vmem [shape: f32[1,512], index: 6, kind: input, shape index: {}]   ;;  %s6939_s7 = inlined_call_operand.hbm [shape: bf16[512,1024], index: 7, kind: input, shape index: {}]   ;;  %s6940_s8 = inlined_call_operand.vmem [shape: f32[1,1024], index: 8, kind: input, shape index: {}]   ;;  %s6941_s9 = inlined_call_operand.vmem [shape: f32[1,1024], index: 9, kind: input, shape index: {}]   ;;  %s6942_s10 = inlined_call_operand.hbm [shape: f32[2,1,1024], index: 10, kind: output, shape index: {}]  }
   0x1   :  { %6957 = sst [smem:[#allocation29_spill]] %s6933_s1 }
   0x2   :  { %6958 = sst [smem:[#allocation30_spill]] %s6934_s2 }
   0x3   :  { %6959 = sst [smem:[#allocation31_spill]] %s6938_s6 }
   0x4   :  { %6960 = sst [smem:[#allocation32_spill]] %s6940_s8 }
   0x5   :  { %6961 = sst [smem:[#allocation33_spill]] %s6941_s9 }
   0x6   :  { %6962 = sst [smem:[#allocation34_spill]] %s6942_s10 }
   0x7   :  { %15 = vsyncpa [#allocation3], 0 }
   0x8   :  { %17 = vsyncpa [#allocation3 + $0x1], 0 }
   0x9   :  { %18 = vsyncpa [#allocation6], 0 }
   0xa   :  { %19 = vsyncpa [#allocation9], 0 }
   0xb   :  { %20 = vsyncpa [#allocation12], 0 }
   0xc   :  { %21 = vsyncpa [#allocation4], 0 }
   0xd   :  { %23 = vsyncpa [#allocation4 + $0x1], 0  ;;  %s5605_s13 = smov 0   ;;  %s5607_s14 = smov 0  }
   0xe   :  { %s5609_s15 = smov 0   ;;  %s5611_s16 = smov 0  }
   0xf   :  { %s5613_s17 = smov 0   ;;  %s5615_s18 = smov 0  }
  0x10   :  { %s5617_s19 = smov 0   ;;  %s5619_s20 = smov 0  }
  0x11   :  { %s5621_s21 = smov 0   ;;  %s5623_s22 = smov 0  }
  0x12   :  { %s5625_s23 = smov 0  }
  0x13 LB: > { %6963 = sst [smem:[#allocation19_spill]] %s5491_s13  ;;  %s4422_s24 = sadd.s32 4294967295, %s5531_s23   ;;  %s5531_s23 = sphi %s5625_s23, %s29_s23   ;;  %s5527_s22 = sphi %s5623_s22, %s7015_s22   ;;  %s5523_s21 = sphi %s5621_s21, %s7014_s21   ;;  %s5519_s20 = sphi %s5619_s20, %s7013_s20   ;;  %s5515_s19 = sphi %s5617_s19, %s7012_s19   ;;  %s5511_s18 = sphi %s5615_s18, %s7011_s18   ;;  %s5507_s17 = sphi %s5613_s17, %s7010_s17   ;;  %s5503_s16 = sphi %s5611_s16, %s7009_s16   ;;  %s5499_s15 = sphi %s5609_s15, %s7003_s15   ;;  %s5495_s14 = sphi %s5607_s14, %s7008_s14   ;;  %s5491_s13 = sphi %s5605_s13, %s7007_s13  }
  0x14   : > { %6964 = sst [smem:[#allocation20_spill]] %s5499_s15  ;;  %s4423_s25 = sadd.s32 4294967294, %s5531_s23  }
  0x15   : > { %6965 = sst [smem:[#allocation21_spill]] %s5515_s19  ;;  %s38_s26 = sadd.s32 1, %s5523_s21 }
  0x16   : > { %6966 = sst [smem:[#allocation22_spill]] %s5519_s20  ;;  %s41_s27 = sadd.s32 1, %s5527_s22 }
  0x17   : > { %p39_p0 = scmp.ge.s32.totalorder %s38_s26, 2  ;;  %s50_s28 = sadd.s32 1, %s5511_s18 }
  0x18   : > { %p57_p1 = scmp.ne.s32.totalorder %s5511_s18, %s5507_s17  ;;  %p58_p2 = scmp.eq.s32.totalorder %s5531_s23, 0 }
  0x19   : > { %s7017_s26 = smov (%p39_p0, %s38_s26), 0  ;;  %s7019_s27 = smov (!%p39_p0, %s41_s27), %s5527_s22 }
  0x1a   : > { %6967 = sst [smem:[#allocation23_spill]] %s7017_s26  ;;  %s46_s29 = ssub.s32 %s5523_s21, %s7017_s26 }
  0x1b   : > { %p5671_p3 = por %p58_p2, %p57_p1  ;;  %p43_p4 = scmp.ge.s32.totalorder %s7019_s27, 2 }
  0x1c   : > { %p63_p5 = scmp.ne.s32.totalorder %s5507_s17, %s5503_s16  ;;  %p5676_p6 = scmp.eq.s32.totalorder %s4422_s24, 0 }
  0x1d   : > { %s6968_s30 = scalar_select %p5671_p3, 1, 0 }
  0x1e   : > { %s6969_s11 = scalar_select %p5676_p6, 1, 0 }
  0x1f   : > { %s265_s12 = sadd.s32 1, %s5499_s15  ;;  %s7021_s27 = smov (%p43_p4, %s7019_s27), 0 }
  0x20   : > { %6970 = sst [smem:[#allocation24_spill]] %s7021_s27  ;;  %p5685_p7 = por %p5676_p6, %p63_p5 }
  0x21   : > { %p275_p8 = scmp.ne.s32.totalorder %s5499_s15, %s5495_s14  ;;  %s45_s10 = ssub.s32 %s5527_s22, %s7021_s27 }
  0x22   : > { %s6971_s26 = scalar_select %p5685_p7, 1, 0 }
  0x23   : > { %p276_p9 = scmp.eq.s32.totalorder %s4422_s24, 3  ;;  %s47_s16 = sor.u32 %s46_s29, %s45_s10 }
  0x24   : > { %p263_p10 = scmp.eq.s32.totalorder %s45_s10, 0  ;;  %p48_p11 = scmp.eq.s32.totalorder %s47_s16, 0 }
  0x25   : > { %p5693_p12 = por %p276_p9, %p275_p8  ;;  %p281_p13 = scmp.ne.s32.totalorder %s5495_s14, %s5491_s13 }
  0x26   : > { %s5698_s9 = scalar_select %p263_p10, %s5499_s15, %s265_s12  }
  0x27   : > { %s6972_s20 = scalar_select %p5693_p12, 1, 0 }
  0x28   : > { %6974 = sst [smem:[#allocation26_spill]] %s5698_s9  ;;  %p282_p0 = scmp.eq.s32.totalorder %s4423_s25, 3 }
  0x29   : > { %6973 = sst [smem:[#allocation25_spill]] %s6972_s20  ;;  %p4424_p1 = scmp.ge.s32.totalorder %s5531_s23, 1 }
  0x2a   : > { %s5701_s8 = scalar_select %p48_p11, %s5511_s18, %s50_s28  }
  0x2b   : > { %p289_p2 = scmp.lt.s32.totalorder %s5531_s23, 5  ;;  %p5707_p4 = por %p282_p0, %p281_p13 }
  0x2c   : > { %6975 = sst [smem:[#allocation27_spill]] %s5701_s8  ;;  %s5533_s10 = smov [#allocation5]  }
  0x2d   : > { %s6976_s19 = scalar_select %p5707_p4, 1, 0 }
  0x2e   : > { %p5711_p5 = pnand %p4424_p1, %p289_p2  ;;  %s301_s29 = sshll.u32 %s5533_s10, 4  ;;  %s302_s29 = int_to_ptr.vmem [resolvable:$true] %s301_s29 }
  0x2f   : > { %6977 = sst [smem:[#allocation28_spill]] %s6976_s19  ;;  %s5534_s25 = smov [#allocation8]  }
  0x30   : > { %s6978_s24 = scalar_select %p5711_p5, 1, 0 }
  0x31   : > { %p4939_p8 = pneg %p5711_p5  ;;  %s328_s12 = sshll.u32 %s5534_s25, 4  ;;  %s5723_s12 = int_to_ptr.vmem [resolvable:$true] %s328_s12 }
  0x32   : > { %s6980_s1 = sld [smem:[#allocation29_spill]] }
  0x33   : > { %p5719_p9 = pnand %p4939_p8, %p5676_p6 }
  0x35   : > { %p5733_p11 = pneg %p5719_p9 }
  0x38   : > { %s5229_s8 = scalar_lea.hbm %s6980_s1, 4096 }
  0x39   : > { %p5230_p10 = scmp.ne.s32.totalorder %s6980_s1, %s5229_s8  ;;  %p5236_p1 = scmp.lt.u32.totalorder %s5229_s8, %s6980_s1 }
  0x3b   : > { %p5232_p13 = pnand %p5733_p11, %p5230_p10 }
  0x3d   : > { %p5233_p0 = pneg %p5232_p13 }
  0x3f   : > { %p5238_p2 = pnand %p5236_p1, %p5233_p0 }
  0x41   : > { %5241 = shalt.err (!%p5238_p2)
}
  0x42   : > { %s5242_s27 = scalar_lea.vmem %s302_s29, 4096  ;;  %p5250_p6 = scmp.lt.s32.totalorder %s302_s29, %s302_s29 }
  0x43   : > { %p5243_p8 = scmp.ne.s32.totalorder %s302_s29, %s5242_s27  ;;  %p5251_p7 = scmp.lt.s32.totalorder %s5242_s27, %s5242_s27 }
  0x45   : > { %p5245_p4 = pnand %p5243_p8, %p5733_p11  ;;  %p5252_p5 = por %p5251_p7, %p5250_p6 }
  0x47   : > { %p5246_p12 = pneg %p5245_p4 }
  0x49   : > { %p5253_p3 = pnand %p5252_p5, %p5246_p12 }
  0x4b   : > { %5256 = shalt.err (!%p5253_p3)
}
  0x4c   : > { %s5535_s9 = smov 128   ;;  %s5536_s15 = smov 8  }
  0x4d   : > { %4942 = dma.hbm_to_vmem [thread:$0]  (!%p5719_p9), %s6980_s1, 4096, %s302_s29, [#allocation6], %s5535_s9, %s5535_s9, %s5536_s15  }
  0x4e   : > { %s5257_s13 = scalar_lea.hbm %s6936_s4, 8192 }
  0x4f   : > { %p5258_p4 = scmp.ne.s32.totalorder %s6936_s4, %s5257_s13  ;;  %p5264_p7 = scmp.lt.u32.totalorder %s5257_s13, %s6936_s4 }
  0x51   : > { %p5260_p6 = pnand %p5258_p4, %p5733_p11 }
  0x53   : > { %p5261_p3 = pneg %p5260_p6 }
  0x55   : > { %p5266_p12 = pnand %p5264_p7, %p5261_p3 }
  0x57   : > { %5269 = shalt.err (!%p5266_p12)
}
  0x58   : > { %s5270_s29 = scalar_lea.vmem %s5723_s12, 8192  ;;  %p5278_p0 = scmp.lt.s32.totalorder %s5723_s12, %s5723_s12 }
  0x59   : > { %p5271_p5 = scmp.ne.s32.totalorder %s5723_s12, %s5270_s29  ;;  %p5279_p1 = scmp.lt.s32.totalorder %s5270_s29, %s5270_s29 }
  0x5b   : > { %p5273_p10 = pnand %p5271_p5, %p5733_p11  ;;  %p5280_p2 = por %p5279_p1, %p5278_p0 }
  0x5d   : > { %p5274_p13 = pneg %p5273_p10 }
  0x5f   : > { %p5281_p8 = pnand %p5280_p2, %p5274_p13 }
  0x61   : > { %5284 = shalt.err (!%p5281_p8)
}
  0x62   : > { %s5537_s6 = smov 256   ;;  %s5538_s2 = smov 16  }
  0x63   : > { %4948 = dma.hbm_to_vmem [thread:$0]  (!%p5719_p9), %s6936_s4, 8192, %s5723_s12, [#allocation9], %s5537_s6, %s5537_s6, %s5538_s2  }
  0x64   : > { %s5539_s9 = smov [#allocation7]   ;;  %s5540_s19 = smov [#allocation10]  }
  0x65   : > { %s318_s15 = sshll.u32 %s5539_s9, 4  ;;  %s342_s8 = sshll.u32 %s5540_s19, 4  ;;  %s319_s15 = int_to_ptr.vmem [resolvable:$true] %s318_s15  ;;  %s5772_s8 = int_to_ptr.vmem [resolvable:$true] %s342_s8 }
  0x66   : > { %s5285_s27 = scalar_lea.hbm %s6935_s3, 32 }
  0x67   : > { %p5286_p4 = scmp.ne.s32.totalorder %s6935_s3, %s5285_s27  ;;  %p5292_p7 = scmp.lt.u32.totalorder %s5285_s27, %s6935_s3 }
  0x69   : > { %p5288_p6 = pnand %p5286_p4, %p5733_p11 }
  0x6b   : > { %p5289_p3 = pneg %p5288_p6 }
  0x6d   : > { %p5294_p12 = pnand %p5292_p7, %p5289_p3 }
  0x6f   : > { %5297 = shalt.err (!%p5294_p12)
}
  0x70   : > { %s5298_s6 = scalar_lea.vmem %s319_s15, 32  ;;  %p5306_p0 = scmp.lt.s32.totalorder %s319_s15, %s319_s15 }
  0x71   : > { %p5299_p5 = scmp.ne.s32.totalorder %s319_s15, %s5298_s6  ;;  %p5307_p1 = scmp.lt.s32.totalorder %s5298_s6, %s5298_s6 }
  0x73   : > { %p5301_p10 = pnand %p5299_p5, %p5733_p11  ;;  %p5308_p2 = por %p5307_p1, %p5306_p0 }
  0x75   : > { %p5302_p13 = pneg %p5301_p10 }
  0x77   : > { %p5309_p8 = pnand %p5308_p2, %p5302_p13 }
  0x79   : > { %5312 = shalt.err (!%p5309_p8)
}
  0x7a   : > { %4945 = dma.hbm_to_vmem [thread:$0]  (!%p5719_p9), %s6935_s3, 32, %s319_s15, [#allocation6]  }
  0x7b   : > { %s5313_s19 = scalar_lea.hbm %s6937_s5, 64 }
  0x7c   : > { %p5314_p4 = scmp.ne.s32.totalorder %s6937_s5, %s5313_s19  ;;  %p5320_p7 = scmp.lt.u32.totalorder %s5313_s19, %s6937_s5 }
  0x7e   : > { %p5316_p6 = pnand %p5314_p4, %p5733_p11 }
  0x80   : > { %p5317_p3 = pneg %p5316_p6 }
  0x82   : > { %p5322_p12 = pnand %p5320_p7, %p5317_p3 }
  0x84   : > { %5325 = shalt.err (!%p5322_p12)
}
  0x85   : > { %s5326_s15 = scalar_lea.vmem %s5772_s8, 64  ;;  %p5334_p0 = scmp.lt.s32.totalorder %s5772_s8, %s5772_s8 }
  0x86   : > { %p5327_p5 = scmp.ne.s32.totalorder %s5772_s8, %s5326_s15  ;;  %p5335_p1 = scmp.lt.s32.totalorder %s5326_s15, %s5326_s15 }
  0x88   : > { %p5329_p10 = pnand %p5327_p5, %p5733_p11  ;;  %p5336_p2 = por %p5335_p1, %p5334_p0 }
  0x8a   : > { %p5330_p13 = pneg %p5329_p10 }
  0x8c   : > { %p5337_p8 = pnand %p5336_p2, %p5330_p13 }
  0x8e   : > { %5340 = shalt.err (!%p5337_p8)
}
  0x8f   : > { %4951 = dma.hbm_to_vmem [thread:$0]  (!%p5719_p9), %s6937_s5, 64, %s5772_s8, [#allocation9]  }
  0x90   : > { %s5541_s6 = smov [#allocation11]   ;;  %s5341_s9 = scalar_lea.hbm %s6939_s7, 32768 }
  0x91   : > { %s355_s1 = sshll.u32 %s5541_s6, 4  ;;  %p5342_p4 = scmp.ne.s32.totalorder %s6939_s7, %s5341_s9  ;;  %s356_s1 = int_to_ptr.vmem [resolvable:$true] %s355_s1 }
  0x92   : > { %p5348_p7 = scmp.lt.u32.totalorder %s5341_s9, %s6939_s7 }
  0x93   : > { %p5344_p6 = pnand %p5342_p4, %p5733_p11 }
  0x95   : > { %p5345_p3 = pneg %p5344_p6 }
  0x97   : > { %p5350_p12 = pnand %p5348_p7, %p5345_p3 }
  0x99   : > { %5353 = shalt.err (!%p5350_p12)
}
  0x9a   : > { %s5354_s8 = scalar_lea.vmem %s356_s1, 32768  ;;  %p5362_p0 = scmp.lt.s32.totalorder %s356_s1, %s356_s1 }
  0x9b   : > { %p5355_p5 = scmp.ne.s32.totalorder %s356_s1, %s5354_s8  ;;  %p5363_p1 = scmp.lt.s32.totalorder %s5354_s8, %s5354_s8 }
  0x9d   : > { %p5357_p10 = pnand %p5355_p5, %p5733_p11  ;;  %p5364_p2 = por %p5363_p1, %p5362_p0 }
  0x9f   : > { %p5358_p13 = pneg %p5357_p10 }
  0xa1   : > { %p5365_p8 = pnand %p5364_p2, %p5358_p13 }
  0xa3   : > { %5368 = shalt.err (!%p5365_p8)
}
  0xa4   : > { %s5542_s29 = smov 512   ;;  %s5543_s15 = smov 32  }
  0xa5   : > { %4954 = dma.hbm_to_vmem [thread:$0]  (!%p5719_p9), %s6939_s7, 32768, %s356_s1, [#allocation12], %s5542_s29, %s5542_s29, %s5543_s15  }
  0xa6   : > { %p4430_p4 = scmp.ge.s32.totalorder %s5531_s23, 4 }
  0xa7   : > { %p6982_p6 = scmp.ne.s32.totalorder (!%p4430_p4), %s6968_s30, 0 }
  0xa8   : > { %371 = sbr.rel (%p4430_p4) target bundleno = 213 (0xd5), region = 52 }
  0xaf   : > { %374 = sbr.rel (!%p6982_p6) target bundleno = 213 (0xd5), region = 56  ;;  %s375_s10 = sand.u32 (%p6982_p6), 1, %s5511_s18  }
  0xb0   : > { %s4432_s6 = sshll.u32 (%p6982_p6), %s5523_s21, 3  ;;  %s4431_s2 = sshll.u32 (%p6982_p6), %s375_s10, 6 }
  0xb1   : > { %s381_s20 = ssub.s32 (%p6982_p6), 12, %s4432_s6  ;;  %s5841_s19 = scalar_lea.sflag (%p6982_p6), [#allocation3], %s375_s10 }
  0xb2   : > { %p382_p11 = scmp.lt.s32.totalorder (%p6982_p6), %s381_s20, 8  ;;  %s379_s1 = scalar_lea.vmem (%p6982_p6), [#allocation2], %s4431_s2 }
  0xb6   : > { %s7023_s20 = smov (!%p382_p11, %s381_s20), 8 }
  0xb7   : > { %s5838_s9 = sshll.u32 %s7023_s20, 7 }
  0xb8   : > { %s387_s28 = ssub.s32 1024, %s5838_s9 }
  0xb9   : > { %388 = vsyncadd %s5841_s19, %s387_s28  ;;  %p4435_p9 = scmp.ne.s32.totalorder %s5838_s9, 0  ;;  %s4817_s30 = sshll.u32 %s5523_s21, 4 }
  0xba   : > { %s4915_s16 = smul.u32 24, %s5527_s22  ;;  %s396_s25 = sshll.u32 %s379_s1, 4  ;;  %s5847_s25 = int_to_ptr.vmem [resolvable:$true] %s396_s25 }
  0xbb   : > { %s5373_s2 = scalar_lea.hbm %s6932_s0, 3072 }
  0xbc   : > { %s392_s27 = sadd.s32 %s4915_s16, %s4817_s30 }
  0xbd   : > { %s4437_s8 = sshll.u32 %s392_s27, 6 }
  0xbe   : > { %s5852_s13 = scalar_lea.hbm %s6932_s0, %s4437_s8 }
  0xbf   : > { %s5369_s12 = scalar_lea.hbm %s5852_s13, %s5838_s9  ;;  %p5374_p5 = scmp.lt.u32.totalorder %s5852_s13, %s6932_s0 }
  0xc0   : > { %p5370_p3 = scmp.ne.s32.totalorder %s5852_s13, %s5369_s12  ;;  %p5375_p10 = scmp.lt.u32.totalorder %s5373_s2, %s5369_s12 }
  0xc1   : > { %p5377_p0 = scmp.lt.u32.totalorder %s5369_s12, %s5852_s13 }
  0xc2   : > { %p5371_p7 = pnand %p5370_p3, %p4435_p9  ;;  %p5376_p13 = por %p5375_p10, %p5374_p5 }
  0xc4   : > { %p5372_p12 = pneg %p5371_p7  ;;  %p5378_p1 = por %p5377_p0, %p5376_p13 }
  0xc6   : > { %p5379_p2 = pnand %p5378_p1, %p5372_p12 }
  0xc8   : > { %5382 = shalt.err (!%p5379_p2)
}
  0xc9   : > { %s5383_s1 = scalar_lea.vmem %s5847_s25, %s5838_s9  ;;  %s5544_s30 = smov [#allocation2]  }
  0xca   : > { %p5384_p8 = scmp.ne.s32.totalorder %s5847_s25, %s5383_s1  ;;  %s5387_s16 = sshll.u32 %s5544_s30, 4  ;;  %s5388_s16 = int_to_ptr.vmem [resolvable:$false] %s5387_s16 }
  0xcb   : > { %s5389_s27 = scalar_lea.vmem %s5388_s16, 2048  ;;  %p5390_p11 = scmp.lt.s32.totalorder %s5847_s25, %s5388_s16 }
  0xcc   : > { %p5385_p4 = pnand %p5384_p8, %p4435_p9  ;;  %p5391_p3 = scmp.lt.s32.totalorder %s5389_s27, %s5383_s1 }
  0xce   : > { %p5386_p6 = pneg %p5385_p4  ;;  %p5392_p7 = por %p5391_p3, %p5390_p11 }
  0xd0   : > { %p5393_p5 = pnand %p5392_p7, %p5386_p6 }
  0xd2   : > { %5396 = shalt.err (!%p5393_p5)
}
  0xd3   : > { %s5545_s8 = smov 128   ;;  %s5546_s29 = smov 8  }
  0xd4   : > { %402 = dma.hbm_to_vmem [thread:$0]  (%p4435_p9), %s5852_s13, %s5838_s9, %s5847_s25, %s5841_s19, %s5545_s8, %s5545_s8, %s5546_s29  }
  0xd5 PF: > { %p6983_p12 = scmp.ne.s32.totalorder %s6978_s24, 0 }
  0xd6   : > { %s410_s15 = sand.u32 (!%p6983_p12), 1, %s5507_s17   ;;  %p6984_p10 = scmp.ne.s32.totalorder (!%p6983_p12), %s6971_s26, 0 }
  0xd7   : > { %408 = sbr.rel (%p6983_p12) target bundleno = 1312 (0x520), region = 60  ;;  %s4441_s12 = sshll.u32 (!%p6983_p12), %s410_s15, 6 }
  0xd8   : > { %s411_s10 = scalar_lea.sflag (!%p6983_p12), [#allocation3], %s410_s15  ;;  %s5882_s6 = scalar_lea.vmem (!%p6983_p12), [#allocation2], %s4441_s12 }
  0xde   : > { %5470 = dma.done.wait (%p6984_p10), %s411_s10, 1024  }
  0xdf   : > { %5472 = vsyncadd (%p6984_p10), %s411_s10, 4294966272  ;;  %p6985_p13 = scmp.ne.s32.totalorder %s6969_s11, 0 }
  0xe1   : > { %5474 = dma.done.wait (%p6985_p13), [#allocation6], 4128  }
  0xe2   : > { %5476 = vsyncadd (%p6985_p13), [#allocation6], 4294963168 }
  0xe3   : > { %5478 = dma.done.wait (%p6985_p13), [#allocation9], 8256  }
  0xe4   : > { %5480 = vsyncadd (%p6985_p13), [#allocation9], 4294959040 }
  0xe5   : > { %5482 = dma.done.wait (%p6985_p13), [#allocation12], 32768  }
  0xe6   : > { %5484 = vsyncadd (%p6985_p13), [#allocation12], 4294934528  ;;  %s468_s26 = sand.u32 1, %s5495_s14   ;;  %v5073_v0 = vld [vmem:[#allocation5 + $0x4] ss:$8 sps:$4 sm:$0xff]   ;;  %s6986_s19 = sld [smem:[#allocation30_spill]] }
  0xe7   : > { %s5903_s24 = sshll.u32 %s468_s26, 3  ;;  %v5075_v1 = vld [vmem:[#allocation5] ss:$8 sps:$4 sm:$0xff]   ;;  %717 = vmatprep.subr.bf16.mxu0 %v5073_v0  ;;  %v5076_v2 = vld [vmem:[#allocation5 + $0x14] ss:$8 sps:$4 sm:$0xff]   ;;  %s6987_s2 = sld [smem:[#allocation31_spill]] }
  0xe8   : > { %718 = vmatpush1.bf16.msra.mxu0 %v5075_v1  ;;  %v5078_v3 = vld [vmem:[#allocation5 + $0x10] ss:$8 sps:$4 sm:$0xff]   ;;  %v5079_v4 = vld [vmem:[#allocation5 + $0x24] ss:$8 sps:$4 sm:$0xff]   ;;  %v5081_v5 = vld [vmem:[#allocation5 + $0x20] ss:$8 sps:$4 sm:$0xff]  }
  0xe9   : > { %719 = vmatprep.subr.bf16.mxu0 %v5076_v2  ;;  %v5082_v6 = vld [vmem:[#allocation5 + $0x34] ss:$8 sps:$4 sm:$0xff]   ;;  %v5084_v7 = vld [vmem:[#allocation5 + $0x30] ss:$8 sps:$4 sm:$0xff]   ;;  %v5085_v8 = vld [vmem:[#allocation5 + $0x44] ss:$8 sps:$4 sm:$0xff]  }
  0xea   : > { %v5087_v9 = vld [vmem:[#allocation5 + $0x40] ss:$8 sps:$4 sm:$0xff]   ;;  %v5088_v10 = vld [vmem:[#allocation5 + $0x54] ss:$8 sps:$4 sm:$0xff]   ;;  %v5090_v11 = vld [vmem:[#allocation5 + $0x50] ss:$8 sps:$4 sm:$0xff]  }
  0xeb   : > { %v5091_v12 = vld [vmem:[#allocation5 + $0x64] ss:$8 sps:$4 sm:$0xff]   ;;  %v5093_v14 = vld [vmem:[#allocation5 + $0x60] ss:$8 sps:$4 sm:$0xff]   ;;  %v5094_v15 = vld [vmem:[#allocation5 + $0x74] ss:$8 sps:$4 sm:$0xff]  }
  0xec   : > { %720 = vmatpush1.bf16.msra.mxu0 %v5078_v3  ;;  %v5123_v13 = vld [vmem:[%s5882_s6 + $0x4] ss:$8 sps:$4 sm:$0xff]   ;;  %v5096_v16 = vld [vmem:[#allocation5 + $0x70] ss:$8 sps:$4 sm:$0xff]   ;;  %v5099_v21 = vld [vmem:[#allocation5 + $0x80] ss:$8 sps:$4 sm:$0xff]  }
  0xed   : > { %721 = vmatprep.subr.bf16.mxu0 %v5079_v4  ;;  %749 = vmatprep.mubr.bf16.mxu0 %v5123_v13  ;;  %v5133_v17 = vld [vmem:[#allocation8 + $0x4] ss:$16 sps:$4 sm:$0xff]   ;;  %v5138_v19 = vld [vmem:[#allocation8] ss:$16 sps:$4 sm:$0xff]   ;;  %v5137_v52 = vld [vmem:[#allocation8 + $0xc] ss:$16 sps:$4 sm:$0xff]  }
  0xee   : > { %v5097_v18 = vld [vmem:[#allocation5 + $0x84] ss:$8 sps:$4 sm:$0xff]   ;;  %1254 = vmatprep.subr.bf16.mxu1 %v5133_v17  ;;  %v5100_v22 = vld [vmem:[#allocation5 + $0x94] ss:$8 sps:$4 sm:$0xff]   ;;  %v5102_v25 = vld [vmem:[#allocation5 + $0x90] ss:$8 sps:$4 sm:$0xff]  }
  0xef   : > { %v5139_v20 = vld [vmem:[#allocation8 + $0x24] ss:$16 sps:$4 sm:$0xff]   ;;  %1255 = vmatpush1.bf16.msra.mxu1 %v5138_v19  ;;  %v5144_v23 = vld [vmem:[#allocation8 + $0x20] ss:$16 sps:$4 sm:$0xff]   ;;  %v5135_v55 = vld [vmem:[#allocation8 + $0x8] ss:$16 sps:$4 sm:$0xff]  }
  0xf0   : > { %722 = vmatpush1.bf16.msra.mxu0 %v5081_v5  ;;  %1256 = vmatprep.subr.bf16.mxu1 %v5139_v20  ;;  %v5145_v24 = vld [vmem:[#allocation8 + $0x44] ss:$16 sps:$4 sm:$0xff]   ;;  %v5150_v26 = vld [vmem:[#allocation8 + $0x40] ss:$16 sps:$4 sm:$0xff]   ;;  %v5143_v56 = vld [vmem:[#allocation8 + $0x2c] ss:$16 sps:$4 sm:$0xff]  }
  0xf1   : > { %723 = vmatprep.subr.bf16.mxu0 %v5082_v6  ;;  %v5103_v27 = vld [vmem:[#allocation5 + $0xa4] ss:$8 sps:$4 sm:$0xff]   ;;  %v5105_v29 = vld [vmem:[#allocation5 + $0xa0] ss:$8 sps:$4 sm:$0xff]   ;;  %v5106_v30 = vld [vmem:[#allocation5 + $0xb4] ss:$8 sps:$4 sm:$0xff]  }
  0xf2   : > { %v5151_v28 = vld [vmem:[#allocation8 + $0x64] ss:$16 sps:$4 sm:$0xff]   ;;  %v5156_v31 = vld [vmem:[#allocation8 + $0x60] ss:$16 sps:$4 sm:$0xff]   ;;  %v5141_v59 = vld [vmem:[#allocation8 + $0x28] ss:$16 sps:$4 sm:$0xff]  }
  0xf3   : > { %1257 = vmatpush1.bf16.msra.mxu1 %v5144_v23  ;;  %v5157_v32 = vld [vmem:[#allocation8 + $0x84] ss:$16 sps:$4 sm:$0xff]   ;;  %v5162_v34 = vld [vmem:[#allocation8 + $0x80] ss:$16 sps:$4 sm:$0xff]   ;;  %v5149_v60 = vld [vmem:[#allocation8 + $0x4c] ss:$16 sps:$4 sm:$0xff]  }
  0xf4   : > { %724 = vmatpush1.bf16.msra.mxu0 %v5084_v7  ;;  %1258 = vmatprep.subr.bf16.mxu1 %v5145_v24  ;;  %v5108_v33 = vld [vmem:[#allocation5 + $0xb0] ss:$8 sps:$4 sm:$0xff]   ;;  %v5109_v35 = vld [vmem:[#allocation5 + $0xc4] ss:$8 sps:$4 sm:$0xff]   ;;  %v5111_v37 = vld [vmem:[#allocation5 + $0xc0] ss:$8 sps:$4 sm:$0xff]  }
  0xf5   : > { %725 = vmatprep.subr.bf16.mxu0 %v5085_v8  ;;  %v5163_v36 = vld [vmem:[#allocation8 + $0xa4] ss:$16 sps:$4 sm:$0xff]   ;;  %v5168_v39 = vld [vmem:[#allocation8 + $0xa0] ss:$16 sps:$4 sm:$0xff]   ;;  %v5147_v1 = vld [vmem:[#allocation8 + $0x48] ss:$16 sps:$4 sm:$0xff]  }
  0xf6   : > { %v5112_v38 = vld [vmem:[#allocation5 + $0xd4] ss:$8 sps:$4 sm:$0xff]   ;;  %v5114_v41 = vld [vmem:[#allocation5 + $0xd0] ss:$8 sps:$4 sm:$0xff]   ;;  %v5115_v43 = vld [vmem:[#allocation5 + $0xe4] ss:$8 sps:$4 sm:$0xff]  }
  0xf7   : > { %1259 = vmatpush1.bf16.msra.mxu1 %v5150_v26  ;;  %v5169_v40 = vld [vmem:[#allocation8 + $0xc4] ss:$16 sps:$4 sm:$0xff]   ;;  %v5174_v42 = vld [vmem:[#allocation8 + $0xc0] ss:$16 sps:$4 sm:$0xff]   ;;  %v5155_v2 = vld [vmem:[#allocation8 + $0x6c] ss:$16 sps:$4 sm:$0xff]  }
  0xf8   : > { %726 = vmatpush1.bf16.msra.mxu0 %v5087_v9  ;;  %1260 = vmatprep.subr.bf16.mxu1 %v5151_v28  ;;  %v5175_v44 = vld [vmem:[#allocation8 + $0xe4] ss:$16 sps:$4 sm:$0xff]   ;;  %v5180_v47 = vld [vmem:[#allocation8 + $0xe0] ss:$16 sps:$4 sm:$0xff]   ;;  %v5153_v5 = vld [vmem:[#allocation8 + $0x68] ss:$16 sps:$4 sm:$0xff]  }
  0xf9   : > { %727 = vmatprep.subr.bf16.mxu0 %v5088_v10  ;;  %v5117_v45 = vld [vmem:[#allocation5 + $0xe0] ss:$8 sps:$4 sm:$0xff]   ;;  %v5118_v46 = vld [vmem:[#allocation5 + $0xf4] ss:$8 sps:$4 sm:$0xff]   ;;  %v5120_v49 = vld [vmem:[#allocation5 + $0xf0] ss:$8 sps:$4 sm:$0xff]  }
  0xfa   : > { %v5181_v48 = vld [vmem:[#allocation8 + $0x104] ss:$16 sps:$4 sm:$0xff]   ;;  %v5186_v50 = vld [vmem:[#allocation8 + $0x100] ss:$16 sps:$4 sm:$0xff]   ;;  %v5161_v6 = vld [vmem:[#allocation8 + $0x8c] ss:$16 sps:$4 sm:$0xff]  }
  0xfb   : > { %1261 = vmatpush1.bf16.msra.mxu1 %v5156_v31  ;;  %v5121_v51 = vld [vmem:[%s5882_s6] ss:$8 sps:$4 sm:$0xff]   ;;  %v5124_v54 = vld [vmem:[%s5882_s6 + $0x14] ss:$8 sps:$4 sm:$0xff]   ;;  %v5126_v63 = vld [vmem:[%s5882_s6 + $0x10] ss:$8 sps:$4 sm:$0xff]  }
  0xfc   : > { %728 = vmatpush1.bf16.msra.mxu0 %v5090_v11  ;;  %1262 = vmatprep.subr.bf16.mxu1 %v5157_v32  ;;  %v5187_v53 = vld [vmem:[#allocation8 + $0x124] ss:$16 sps:$4 sm:$0xff]   ;;  %v5192_v57 = vld [vmem:[#allocation8 + $0x120] ss:$16 sps:$4 sm:$0xff]   ;;  %v5159_v10 = vld [vmem:[#allocation8 + $0x88] ss:$16 sps:$4 sm:$0xff]  }
  0xfd   : > { %729 = vmatprep.subr.bf16.mxu0 %v5091_v12  ;;  %v5193_v58 = vld [vmem:[#allocation8 + $0x144] ss:$16 sps:$4 sm:$0xff]   ;;  %v5198_v61 = vld [vmem:[#allocation8 + $0x140] ss:$16 sps:$4 sm:$0xff]   ;;  %v5167_v11 = vld [vmem:[#allocation8 + $0xac] ss:$16 sps:$4 sm:$0xff]  }
  0xfe   : > { %v5199_v62 = vld [vmem:[#allocation8 + $0x164] ss:$16 sps:$4 sm:$0xff]   ;;  %v5204_v3 = vld [vmem:[#allocation8 + $0x160] ss:$16 sps:$4 sm:$0xff]   ;;  %v5165_v12 = vld [vmem:[#allocation8 + $0xa8] ss:$16 sps:$4 sm:$0xff]  }
  0xff   : > { %1263 = vmatpush1.bf16.msra.mxu1 %v5162_v34  ;;  %v5127_v0 = vld [vmem:[%s5882_s6 + $0x24] ss:$8 sps:$4 sm:$0xff]   ;;  %v5129_v8 = vld [vmem:[%s5882_s6 + $0x20] ss:$8 sps:$4 sm:$0xff]   ;;  %v5130_v9 = vld [vmem:[%s5882_s6 + $0x34] ss:$8 sps:$4 sm:$0xff]  }
 0x100   : > { %730 = vmatpush1.bf16.msra.mxu0 %v5093_v14  ;;  %1264 = vmatprep.subr.bf16.mxu1 %v5163_v36  ;;  %v5205_v4 = vld [vmem:[#allocation8 + $0x184] ss:$16 sps:$4 sm:$0xff]   ;;  %v5210_v7 = vld [vmem:[#allocation8 + $0x180] ss:$16 sps:$4 sm:$0xff]   ;;  %v5173_v13 = vld [vmem:[#allocation8 + $0xcc] ss:$16 sps:$4 sm:$0xff]  }
 0x101   : > { %731 = vmatprep.subr.bf16.mxu0 %v5094_v15  ;;  %v5132_v14 = vld [vmem:[%s5882_s6 + $0x30] ss:$8 sps:$4 sm:$0xff]   ;;  %s6990_s20 = sld [smem:[#allocation21_spill]]  ;;  %s6991_s16 = sld [smem:[#allocation32_spill]] }
 0x102   : > { %v5171_v15 = vld [vmem:[#allocation8 + $0xc8] ss:$16 sps:$4 sm:$0xff]   ;;  %v5191_v20 = vld [vmem:[#allocation8 + $0x12c] ss:$16 sps:$4 sm:$0xff]   ;;  %v5211_v28 = vld [vmem:[#allocation8 + $0x1a4] ss:$16 sps:$4 sm:$0xff]  }
 0x103   : > { %1265 = vmatpush1.bf16.msra.mxu1 %v5168_v39  ;;  %v5177_v17 = vld [vmem:[#allocation8 + $0xe8] ss:$16 sps:$4 sm:$0xff]   ;;  %v5203_v24 = vld [vmem:[#allocation8 + $0x16c] ss:$16 sps:$4 sm:$0xff]   ;;  %v5216_v31 = vld [vmem:[#allocation8 + $0x1a0] ss:$16 sps:$4 sm:$0xff]  }
 0x104   : > { %732 = vmatpush1.bf16.msra.mxu0 %v5096_v16  ;;  %1266 = vmatprep.subr.bf16.mxu1 %v5169_v40  ;;  %v5179_v16 = vld [vmem:[#allocation8 + $0xec] ss:$16 sps:$4 sm:$0xff]   ;;  %v5183_v19 = vld [vmem:[#allocation8 + $0x108] ss:$16 sps:$4 sm:$0xff]   ;;  %v5217_v32 = vld [vmem:[#allocation8 + $0x1c4] ss:$16 sps:$4 sm:$0xff]  }
 0x105   : > { %733 = vmatprep.subr.bf16.mxu0 %v5097_v18  ;;  %v5185_v18 = vld [vmem:[#allocation8 + $0x10c] ss:$16 sps:$4 sm:$0xff]   ;;  %v5195_v23 = vld [vmem:[#allocation8 + $0x148] ss:$16 sps:$4 sm:$0xff]   ;;  %v5223_v36 = vld [vmem:[#allocation8 + $0x1e4] ss:$16 sps:$4 sm:$0xff]  }
 0x106   : > { %v5209_v26 = vld [vmem:[#allocation8 + $0x18c] ss:$16 sps:$4 sm:$0xff]   ;;  %v5219_v34 = vld [vmem:[#allocation8 + $0x1c8] ss:$16 sps:$4 sm:$0xff]   ;;  %v5228_v39 = vld [vmem:[#allocation8 + $0x1e0] ss:$16 sps:$4 sm:$0xff]  }
 0x107   : > { %1267 = vmatpush1.bf16.msra.mxu1 %v5174_v42  ;;  %v5913_v40 = vld [vmem:[#allocation11] sm:$0xff]  ;;  %v5917_v42 = vld [vmem:[#allocation11 + $0x8] sm:$0xff]  ;;  %s4808_s28 = sshll.u32 %s6990_s20, 6  ;;  %s6992_s29 = sld [smem:[#allocation33_spill]] }
 0x108   : > { %734 = vmatpush1.bf16.msra.mxu0 %v5099_v21  ;;  %1268 = vmatprep.subr.bf16.mxu1 %v5175_v44  ;;  %v5189_v21 = vld [vmem:[#allocation8 + $0x128] ss:$16 sps:$4 sm:$0xff]   ;;  %s6848_s15 = scalar_lea.vmem [#allocation13], %s5903_s24  ;;  %p4809_p9 = scmp.ne.s32.totalorder %s6990_s20, 0 }
 0x109   : > { %735 = vmatprep.subr.bf16.mxu0 %v5100_v22  ;;  %v5197_v22 = vld [vmem:[#allocation8 + $0x14c] ss:$16 sps:$4 sm:$0xff]  }
 0x10b   : > { %1269 = vmatpush1.bf16.msra.mxu1 %v5180_v47 }
 0x10c   : > { %736 = vmatpush1.bf16.msra.mxu0 %v5102_v25  ;;  %1270 = vmatprep.subr.bf16.mxu1 %v5181_v48  ;;  %v5201_v25 = vld [vmem:[#allocation8 + $0x168] ss:$16 sps:$4 sm:$0xff]   ;;  %v792_v48 = vlaneseq }
 0x10d   : > { %737 = vmatprep.subr.bf16.mxu0 %v5103_v27  ;;  %v5207_v27 = vld [vmem:[#allocation8 + $0x188] ss:$16 sps:$4 sm:$0xff]  }
 0x10f   : > { %1271 = vmatpush1.bf16.msra.mxu1 %v5186_v50 }
 0x110   : > { %738 = vmatpush1.bf16.msra.mxu0 %v5105_v29  ;;  %1272 = vmatprep.subr.bf16.mxu1 %v5187_v53  ;;  %v5215_v29 = vld [vmem:[#allocation8 + $0x1ac] ss:$16 sps:$4 sm:$0xff]  }
 0x111   : > { %739 = vmatprep.subr.bf16.mxu0 %v5106_v30  ;;  %v5213_v30 = vld [vmem:[#allocation8 + $0x1a8] ss:$16 sps:$4 sm:$0xff]   ;;  %v818_v53 = vld [vmem:[#allocation7] sm:$0x3] }
 0x113   : > { %1273 = vmatpush1.bf16.msra.mxu1 %v5192_v57 }
 0x114   : > { %740 = vmatpush1.bf16.msra.mxu0 %v5108_v33  ;;  %1274 = vmatprep.subr.bf16.mxu1 %v5193_v58  ;;  %v5221_v33 = vld [vmem:[#allocation8 + $0x1cc] ss:$16 sps:$4 sm:$0xff]  }
 0x115   : > { %741 = vmatprep.subr.bf16.mxu0 %v5109_v35  ;;  %v5222_v35 = vld [vmem:[#allocation8 + $0x1c0] ss:$16 sps:$4 sm:$0xff]  }
 0x117   : > { %1275 = vmatpush1.bf16.msra.mxu1 %v5198_v61 }
 0x118   : > { %742 = vmatpush1.bf16.msra.mxu0 %v5111_v37  ;;  %1276 = vmatprep.subr.bf16.mxu1 %v5199_v62  ;;  %v5227_v37 = vld [vmem:[#allocation8 + $0x1ec] ss:$16 sps:$4 sm:$0xff]  }
 0x119   : > { %743 = vmatprep.subr.bf16.mxu0 %v5112_v38  ;;  %v5225_v38 = vld [vmem:[#allocation8 + $0x1e8] ss:$16 sps:$4 sm:$0xff]  }
 0x11b   : > { %1277 = vmatpush1.bf16.msra.mxu1 %v5204_v3 }
 0x11c   : > { %744 = vmatpush1.bf16.msra.mxu0 %v5114_v41  ;;  %1278 = vmatprep.subr.bf16.mxu1 %v5205_v4  ;;  %v5915_v41 = vld [vmem:[#allocation11 + $0x20] sm:$0xff] }
 0x11d   : > { %745 = vmatprep.subr.bf16.mxu0 %v5115_v43  ;;  %v4552_v43 = vcombine.low %v5913_v40, %v5915_v41  ;;  %v4553_v44 = vcombine.high %v5913_v40, %v5915_v41 }
 0x11f   : > { %1279 = vmatpush1.bf16.msra.mxu1 %v5210_v7 }
 0x120   : > { %746 = vmatpush1.bf16.msra.mxu0 %v5117_v45  ;;  %1280 = vmatprep.subr.bf16.mxu1 %v5211_v28  ;;  %v1561_v45 = vld [vmem:[#allocation11 + $0x28] sm:$0xff] }
 0x121   : > { %747 = vmatprep.subr.bf16.mxu0 %v5118_v46  ;;  %v4554_v46 = vcombine.low %v5917_v42, %v1561_v45  ;;  %v4555_v47 = vcombine.high %v5917_v42, %v1561_v45  ;;  %v1584_v45 = vld [vmem:[#allocation11 + $0xe0] sm:$0xff] }
 0x123   : > { %1281 = vmatpush1.bf16.msra.mxu1 %v5216_v31  ;;  %v1577_v31 = vld [vmem:[#allocation11 + $0xa8] sm:$0xff] }
 0x124   : > { %748 = vmatpush1.bf16.msra.mxu0 %v5120_v49  ;;  %1282 = vmatprep.subr.bf16.mxu1 %v5217_v32  ;;  %v5925_v49 = vshrl.u32 %v792_v48, 7 }
 0x125   : > { %1327 = vmatprep.subr.bf16.mxu0 %v5137_v52 }
 0x126   : > { %v5928_v50 = vsub.s32 0, %v5925_v49  ;;  %v5934_v52 = vsub.s32 1, %v5925_v49 }
 0x127   : > { %750 = vmatmul.mubr.bf16.vlgmr.msra.gmra.mrb[0].mxu0 %v5121_v51  ;;  %1283 = vmatpush1.bf16.msra.mxu1 %v5222_v35  ;;  %v790_v51 = vld [vmem:[%s6986_s19] sm:$0x3] }
 0x128   : > { %759 = vmatprep.mubr.bf16.mxu0 %v5124_v54  ;;  %1328 = vmatpush1.bf16.msra.mxu0 %v5135_v55  ;;  %v5937_v54 = vrot.slane %v790_v51, %v5928_v50  ;;  %v5940_v55 = vrot.slane %v790_v51, %v5934_v52  ;;  %v5946_v58 = vrot.slane %v818_v53, %v5934_v52  ;;  %v1581_v51 = vld [vmem:[#allocation11 + $0xc8] sm:$0xff] }
 0x129   : > { %1329 = vmatprep.subr.bf16.mxu0 %v5143_v56  ;;  %1284 = vmatprep.subr.bf16.mxu1 %v5223_v36  ;;  %v5943_v56 = vrot.slane %v818_v53, %v5928_v50  ;;  %v1585_v53 = vld [vmem:[#allocation11 + $0xe8] sm:$0xff] }
 0x12b   : > { %1285 = vmatpush1.bf16.msra.mxu1 %v5228_v39 }
 0x12c   : > { %1330 = vmatpush1.bf16.msra.mxu0 %v5141_v59  ;;  %3092 = vmatprep.subr.bf16.mxu1 %v4553_v44  ;;  %v1580_v44 = vld [vmem:[#allocation11 + $0xc0] sm:$0xff] }
 0x12d   : > { %1331 = vmatprep.subr.bf16.mxu0 %v5149_v60 }
 0x12f   : > { %760 = vmatmul.mubr.bf16.gmra.mrb[4].mxu0 %v5126_v63 }
 0x130   : > { %769 = vmatprep.mubr.bf16.mxu0 %v5127_v0  ;;  %1332 = vmatpush1.bf16.msra.mxu0 %v5147_v1 }
 0x131   : > { %1333 = vmatprep.subr.bf16.mxu0 %v5155_v2 }
 0x134   : > { %1334 = vmatpush1.bf16.msra.mxu0 %v5153_v5 }
 0x135   : > { %1335 = vmatprep.subr.bf16.mxu0 %v5161_v6 }
 0x137   : > { %770 = vmatmul.mubr.bf16.gmra.mrb[8].mxu0 %v5129_v8  ;;  %v1564_v8 = vld [vmem:[#allocation11 + $0x40] sm:$0xff] }
 0x138   : > { %779 = vmatprep.mubr.bf16.mxu0 %v5130_v9  ;;  %1336 = vmatpush1.bf16.msra.mxu0 %v5159_v10 }
 0x139   : > { %1337 = vmatprep.subr.bf16.mxu0 %v5167_v11 }
 0x13c   : > { %1338 = vmatpush1.bf16.msra.mxu0 %v5165_v12  ;;  %v1568_v12 = vld [vmem:[#allocation11 + $0x60] sm:$0xff] }
 0x13d   : > { %1339 = vmatprep.subr.bf16.mxu0 %v5173_v13  ;;  %v1565_v13 = vld [vmem:[#allocation11 + $0x48] sm:$0xff]  ;;  %v4560_v36 = vcombine.low %v1564_v8, %v1568_v12 }
 0x13f   : > { %780 = vmatmul.mubr.bf16.gmra.mrb[12].mxu0 %v5132_v14  ;;  %v1569_v14 = vld [vmem:[#allocation11 + $0x68] sm:$0xff] }
 0x140   : > { %1340 = vmatpush1.bf16.msra.mxu0 %v5171_v15 }
 0x141   : > { %1341 = vmatprep.subr.bf16.mxu0 %v5179_v16 }
 0x144   : > { %1342 = vmatpush1.bf16.msra.mxu0 %v5177_v17 }
 0x145   : > { %1343 = vmatprep.subr.bf16.mxu0 %v5185_v18 }
 0x148   : > { %1344 = vmatpush1.bf16.msra.mxu0 %v5183_v19 }
 0x149   : > { %1345 = vmatprep.subr.bf16.mxu0 %v5191_v20 }
 0x14c   : > { %1346 = vmatpush1.bf16.msra.mxu0 %v5189_v21 }
 0x14d   : > { %1347 = vmatprep.subr.bf16.mxu0 %v5197_v22 }
 0x150   : > { %1348 = vmatpush1.bf16.msra.mxu0 %v5195_v23 }
 0x151   : > { %1349 = vmatprep.subr.bf16.mxu0 %v5203_v24  ;;  %v4561_v24 = vcombine.high %v1564_v8, %v1568_v12  ;;  %v1593_v8 = vld [vmem:[#allocation11 + $0x128] sm:$0xff] }
 0x154   : > { %1350 = vmatpush1.bf16.msra.mxu0 %v5201_v25  ;;  %v4563_v25 = vcombine.high %v1565_v13, %v1569_v14 }
 0x155   : > { %1351 = vmatprep.subr.bf16.mxu0 %v5209_v26  ;;  %v1572_v26 = vld [vmem:[#allocation11 + $0x80] sm:$0xff] }
 0x158   : > { %1352 = vmatpush1.bf16.msra.mxu0 %v5207_v27 }
 0x159   : > { %1353 = vmatprep.subr.bf16.mxu0 %v5215_v29  ;;  %v1576_v29 = vld [vmem:[#allocation11 + $0xa0] sm:$0xff] }
 0x15a   : > { %v4569_v39 = vcombine.high %v1572_v26, %v1576_v29  ;;  %v4568_v40 = vcombine.low %v1572_v26, %v1576_v29 }
 0x15c   : > { %1354 = vmatpush1.bf16.msra.mxu0 %v5213_v30  ;;  %v1573_v30 = vld [vmem:[#allocation11 + $0x88] sm:$0xff] }
 0x15d   : > { %1355 = vmatprep.subr.bf16.mxu0 %v5221_v33  ;;  %v4571_v42 = vcombine.high %v1573_v30, %v1577_v31  ;;  %v4570_v41 = vcombine.low %v1573_v30, %v1577_v31 }
 0x160   : > { %1356 = vmatpush1.bf16.msra.mxu0 %v5219_v34 }
 0x161   : > { %1357 = vmatprep.subr.bf16.mxu0 %v5227_v37  ;;  %v4562_v37 = vcombine.low %v1565_v13, %v1569_v14  ;;  %v4576_v13 = vcombine.low %v1580_v44, %v1584_v45  ;;  %v4578_v14 = vcombine.low %v1581_v51, %v1585_v53 }
 0x164   : > { %1358 = vmatpush1.bf16.msra.mxu0 %v5225_v38 }
 0x165   : > { %3238 = vmatprep.subr.bf16.mxu0 %v4555_v47 }
 0x1fa   : > { %v751_v57 = vpop.f32.mrb[0].mxu0 }
 0x1fb   : > { %v802_v59 = vmul.f32 %v5937_v54, %v751_v57  ;;  %v753_v60 = vpop.f32.mrb[1].mxu0 }
 0x1fc   : > { %v803_v61 = vmul.f32 %v5940_v55, %v753_v60  ;;  %v755_v62 = vpop.f32.mrb[2].mxu0 }
 0x1fd   : > { %v830_v63 = vadd.f32 %v5943_v56, %v802_v59  ;;  %v804_v0 = vmul.f32 %v5937_v54, %v755_v62  ;;  %v757_v1 = vpop.f32.mrb[3].mxu0  ;;  %v4577_v62 = vcombine.high %v1580_v44, %v1584_v45  ;;  %v1605_v44 = vld [vmem:[#allocation11 + $0x188] sm:$0xff] }
 0x1fe   : > { %v831_v2 = vadd.f32 %v5946_v58, %v803_v61  ;;  %v805_v3 = vmul.f32 %v5940_v55, %v757_v1  ;;  %v1609_v45 = vld [vmem:[#allocation11 + $0x1a8] sm:$0xff] }
 0x1ff   : > { %v832_v4 = vadd.f32 %v5943_v56, %v804_v0  ;;  %v846_v6 = vmax.f32 %v830_v63, 0.0 }
 0x200   : > { %v833_v5 = vadd.f32 %v5946_v58, %v805_v3  ;;  %v847_v9 = vmax.f32 %v831_v2, 0.0  ;;  %v4579_v2 = vcombine.high %v1581_v51, %v1585_v53  ;;  %v1588_v3 = vld [vmem:[#allocation11 + $0x100] sm:$0xff] }
 0x201   : > { %v848_v7 = vmax.f32 %v832_v4, 0.0 }
 0x202   : > { %v849_v10 = vmax.f32 %v833_v5, 0.0  ;;  %v761_v11 = vpop.f32.mrb[4].mxu0 }
 0x203   : > { %v806_v15 = vmul.f32 %v5937_v54, %v761_v11  ;;  %v763_v16 = vpop.f32.mrb[5].mxu0  ;;  %v862_v17 = vpack.c.bf16 %v848_v7, %v846_v6  ;;  %v1592_v6 = vld [vmem:[#allocation11 + $0x120] sm:$0xff]  ;;  %v1589_v7 = vld [vmem:[#allocation11 + $0x108] sm:$0xff] }
 0x204   : > { %v807_v18 = vmul.f32 %v5940_v55, %v763_v16  ;;  %v765_v19 = vpop.f32.mrb[6].mxu0  ;;  %v863_v20 = vpack.c.bf16 %v849_v10, %v847_v9  ;;  %v4585_v16 = vcombine.high %v1588_v3, %v1592_v6 }
 0x205   : > { %v834_v21 = vadd.f32 %v5943_v56, %v806_v15  ;;  %v808_v22 = vmul.f32 %v5937_v54, %v765_v19  ;;  %v767_v23 = vpop.f32.mrb[7].mxu0  ;;  %v1600_v19 = vld [vmem:[#allocation11 + $0x160] sm:$0xff] }
 0x206   : > { %v835_v27 = vadd.f32 %v5946_v58, %v807_v18  ;;  %v809_v28 = vmul.f32 %v5940_v55, %v767_v23  ;;  %1286 = vmatprep.mubr.bf16.mxu1 %v863_v20  ;;  %1359 = vmatprep.mubr.bf16.mxu0 %v863_v20  ;;  %v1596_v18 = vld [vmem:[#allocation11 + $0x140] sm:$0xff]  ;;  %v1601_v23 = vld [vmem:[#allocation11 + $0x168] sm:$0xff] }
 0x207   : > { %v850_v32 = vmax.f32 %v834_v21, 0.0  ;;  %v836_v33 = vadd.f32 %v5943_v56, %v808_v22  ;;  %1287 = vmatmul.mubr.bf16.vlgmr.msra.gmra.mrb[0].mxu1 %v862_v17  ;;  %1360 = vmatmul.mubr.bf16.vlgmr.msra.gmra.mrb[16].mxu0 %v862_v17  ;;  %v4587_v17 = vcombine.high %v1589_v7, %v1593_v8  ;;  %v1597_v22 = vld [vmem:[#allocation11 + $0x148] sm:$0xff]  ;;  %v4592_v53 = vcombine.low %v1596_v18, %v1600_v19 }
 0x208   : > { %v851_v34 = vmax.f32 %v835_v27, 0.0  ;;  %v837_v35 = vadd.f32 %v5946_v58, %v809_v28  ;;  %3093 = vmatpush1.bf16.msra.mxu1 %v4552_v43  ;;  %3239 = vmatpush1.bf16.msra.mxu0 %v4554_v46  ;;  %v4584_v27 = vcombine.low %v1588_v3, %v1592_v6  ;;  %v4586_v28 = vcombine.low %v1589_v7, %v1593_v8  ;;  %v1624_v3 = vld [vmem:[#allocation11 + $0x220] sm:$0xff] }
 0x209   : > { %v852_v38 = vmax.f32 %v836_v33, 0.0  ;;  %3094 = vmatprep.subr.bf16.mxu1 %v4561_v24  ;;  %3240 = vmatprep.subr.bf16.mxu0 %v4563_v25 }
 0x20a   : > { %v853_v47 = vmax.f32 %v837_v35, 0.0  ;;  %v771_v48 = vpop.f32.mrb[8].mxu0 }
 0x20b   : > { %v810_v57 = vmul.f32 %v5937_v54, %v771_v48  ;;  %v773_v59 = vpop.f32.mrb[9].mxu0  ;;  %v864_v60 = vpack.c.bf16 %v852_v38, %v850_v32  ;;  %v4593_v32 = vcombine.high %v1596_v18, %v1600_v19  ;;  %v1636_v18 = vld [vmem:[#allocation11 + $0x280] sm:$0xff] }
 0x20c   : > { %v811_v43 = vmul.f32 %v5940_v55, %v773_v59  ;;  %v775_v46 = vpop.f32.mrb[10].mxu0  ;;  %v865_v61 = vpack.c.bf16 %v853_v47, %v851_v34  ;;  %3095 = vmatpush1.bf16.msra.mxu1 %v4560_v36  ;;  %3241 = vmatpush1.bf16.msra.mxu0 %v4562_v37  ;;  %v4595_v36 = vcombine.high %v1597_v22, %v1601_v23  ;;  %v1604_v37 = vld [vmem:[#allocation11 + $0x180] sm:$0xff] }
 0x20d   : > { %v838_v63 = vadd.f32 %v5943_v56, %v810_v57  ;;  %v812_v0 = vmul.f32 %v5937_v54, %v775_v46  ;;  %v777_v1 = vpop.f32.mrb[11].mxu0  ;;  %3096 = vmatprep.subr.bf16.mxu1 %v4569_v39  ;;  %3242 = vmatprep.subr.bf16.mxu0 %v4571_v42  ;;  %v1608_v42 = vld [vmem:[#allocation11 + $0x1a0] sm:$0xff]  ;;  %v4594_v57 = vcombine.low %v1597_v22, %v1601_v23  ;;  %v1613_v46 = vld [vmem:[#allocation11 + $0x1c8] sm:$0xff] }
 0x20e   : > { %v839_v4 = vadd.f32 %v5946_v58, %v811_v43  ;;  %v813_v5 = vmul.f32 %v5940_v55, %v777_v1  ;;  %1296 = vmatprep.mubr.bf16.mxu1 %v865_v61  ;;  %1369 = vmatprep.mubr.bf16.mxu0 %v865_v61  ;;  %v1616_v43 = vld [vmem:[#allocation11 + $0x1e0] sm:$0xff]  ;;  %v1617_v61 = vld [vmem:[#allocation11 + $0x1e8] sm:$0xff] }
 0x20f   : > { %v854_v9 = vmax.f32 %v838_v63, 0.0  ;;  %v840_v10 = vadd.f32 %v5943_v56, %v812_v0  ;;  %1297 = vmatmul.mubr.bf16.gmra.mrb[4].mxu1 %v864_v60  ;;  %1370 = vmatmul.mubr.bf16.gmra.mrb[20].mxu0 %v864_v60  ;;  %v4603_v60 = vcombine.high %v1605_v44, %v1609_v45  ;;  %v4600_v63 = vcombine.low %v1604_v37, %v1608_v42  ;;  %v1640_v19 = vld [vmem:[#allocation11 + $0x2a0] sm:$0xff] }
 0x210   : > { %v855_v11 = vmax.f32 %v839_v4, 0.0  ;;  %v841_v12 = vadd.f32 %v5946_v58, %v813_v5  ;;  %3097 = vmatpush1.bf16.msra.mxu1 %v4568_v40  ;;  %3243 = vmatpush1.bf16.msra.mxu0 %v4570_v41  ;;  %v1612_v40 = vld [vmem:[#allocation11 + $0x1c0] sm:$0xff]  ;;  %v4611_v1 = vcombine.high %v1613_v46, %v1617_v61  ;;  %v1621_v4 = vld [vmem:[#allocation11 + $0x208] sm:$0xff]  ;;  %v4610_v7 = vcombine.low %v1613_v46, %v1617_v61 }
 0x211   : > { %v856_v15 = vmax.f32 %v840_v10, 0.0  ;;  %3098 = vmatprep.subr.bf16.mxu1 %v4577_v62  ;;  %3244 = vmatprep.subr.bf16.mxu0 %v4579_v2  ;;  %v4609_v0 = vcombine.high %v1612_v40, %v1616_v43  ;;  %v1620_v2 = vld [vmem:[#allocation11 + $0x200] sm:$0xff]  ;;  %v1625_v5 = vld [vmem:[#allocation11 + $0x228] sm:$0xff]  ;;  %v4608_v6 = vcombine.low %v1612_v40, %v1616_v43 }
 0x212   : > { %v857_v20 = vmax.f32 %v841_v12, 0.0  ;;  %v781_v21 = vpop.f32.mrb[12].mxu0  ;;  %v4617_v8 = vcombine.high %v1620_v2, %v1624_v3  ;;  %v1628_v10 = vld [vmem:[#allocation11 + $0x240] sm:$0xff]  ;;  %v1629_v12 = vld [vmem:[#allocation11 + $0x248] sm:$0xff] }
 0x213   : > { %v814_v24 = vmul.f32 %v5937_v54, %v781_v21  ;;  %v783_v25 = vpop.f32.mrb[13].mxu0  ;;  %v866_v26 = vpack.c.bf16 %v856_v15, %v854_v9  ;;  %v4619_v9 = vcombine.high %v1621_v4, %v1625_v5  ;;  %v4618_v15 = vcombine.low %v1621_v4, %v1625_v5  ;;  %v1641_v21 = vld [vmem:[#allocation11 + $0x2a8] sm:$0xff]  ;;  %v1668_v40 = vld [vmem:[#allocation11 + $0x380] sm:$0xff] }
 0x214   : > { %v815_v29 = vmul.f32 %v5940_v55, %v783_v25  ;;  %v785_v30 = vpop.f32.mrb[14].mxu0  ;;  %v867_v31 = vpack.c.bf16 %v857_v20, %v855_v11  ;;  %3099 = vmatpush1.bf16.msra.mxu1 %v4576_v13  ;;  %3245 = vmatpush1.bf16.msra.mxu0 %v4578_v14  ;;  %v1632_v11 = vld [vmem:[#allocation11 + $0x260] sm:$0xff]  ;;  %v1633_v13 = vld [vmem:[#allocation11 + $0x268] sm:$0xff]  ;;  %v4616_v14 = vcombine.low %v1620_v2, %v1624_v3 }
 0x215   : > { %v842_v33 = vadd.f32 %v5943_v56, %v814_v24  ;;  %v816_v34 = vmul.f32 %v5937_v54, %v785_v30  ;;  %v787_v35 = vpop.f32.mrb[15].mxu0  ;;  %3100 = vmatprep.subr.bf16.mxu1 %v4585_v16  ;;  %3246 = vmatprep.subr.bf16.mxu0 %v4587_v17  ;;  %v4625_v16 = vcombine.high %v1628_v10, %v1632_v11  ;;  %v1637_v20 = vld [vmem:[#allocation11 + $0x288] sm:$0xff] }
 0x216   : > { %v843_v38 = vadd.f32 %v5946_v58, %v815_v29  ;;  %v817_v39 = vmul.f32 %v5940_v55, %v787_v35  ;;  %1306 = vmatprep.mubr.bf16.mxu1 %v867_v31  ;;  %1379 = vmatprep.mubr.bf16.mxu0 %v867_v31  ;;  %v4601_v55 = vcombine.high %v1604_v37, %v1608_v42  ;;  %v1649_v29 = vld [vmem:[#allocation11 + $0x2e8] sm:$0xff]  ;;  %v1656_v35 = vld [vmem:[#allocation11 + $0x320] sm:$0xff] }
 0x217   : > { %v858_v47 = vmax.f32 %v842_v33, 0.0  ;;  %v844_v48 = vadd.f32 %v5943_v56, %v816_v34  ;;  %1307 = vmatmul.mubr.bf16.gmra.mrb[8].mxu1 %v866_v26  ;;  %1380 = vmatmul.mubr.bf16.gmra.mrb[24].mxu0 %v866_v26  ;;  %v4627_v17 = vcombine.high %v1629_v12, %v1633_v13  ;;  %v4624_v22 = vcombine.low %v1628_v10, %v1632_v11  ;;  %v1644_v26 = vld [vmem:[#allocation11 + $0x2c0] sm:$0xff]  ;;  %v1657_v37 = vld [vmem:[#allocation11 + $0x328] sm:$0xff] }
 0x218   : > { %v859_v54 = vmax.f32 %v843_v38, 0.0  ;;  %v845_v51 = vadd.f32 %v5946_v58, %v817_v39  ;;  %3101 = vmatpush1.bf16.msra.mxu1 %v4584_v27  ;;  %3247 = vmatpush1.bf16.msra.mxu0 %v4586_v28  ;;  %v4602_v58 = vcombine.low %v1605_v44, %v1609_v45  ;;  %v4626_v23 = vcombine.low %v1629_v12, %v1633_v13  ;;  %v1648_v27 = vld [vmem:[#allocation11 + $0x2e0] sm:$0xff]  ;;  %v1645_v28 = vld [vmem:[#allocation11 + $0x2c8] sm:$0xff] }
 0x219   : > { %v860_v59 = vmax.f32 %v844_v48, 0.0  ;;  %3102 = vmatprep.subr.bf16.mxu1 %v4593_v32  ;;  %3248 = vmatprep.subr.bf16.mxu0 %v4595_v36  ;;  %v4633_v24 = vcombine.high %v1636_v18, %v1640_v19  ;;  %v4635_v25 = vcombine.high %v1637_v20, %v1641_v21  ;;  %v4632_v30 = vcombine.low %v1636_v18, %v1640_v19  ;;  %v1652_v34 = vld [vmem:[#allocation11 + $0x300] sm:$0xff]  ;;  %v1653_v36 = vld [vmem:[#allocation11 + $0x308] sm:$0xff]  ;;  %v1454_v18 = vld [vmem:[%s6987_s2] sm:$0xf] }
 0x21a   : > { %v861_v41 = vmax.f32 %v845_v51, 0.0  ;;  %v4634_v31 = vcombine.low %v1637_v20, %v1641_v21  ;;  %v4641_v32 = vcombine.high %v1644_v26, %v1648_v27  ;;  %v4643_v33 = vcombine.high %v1645_v28, %v1649_v29  ;;  %v1660_v48 = vld [vmem:[#allocation11 + $0x340] sm:$0xff]  ;;  %v1661_v51 = vld [vmem:[#allocation11 + $0x348] sm:$0xff] }
 0x21b   : > { %v868_v56 = vpack.c.bf16 %v860_v59, %v858_v47  ;;  %v4640_v38 = vcombine.low %v1644_v26, %v1648_v27  ;;  %v4642_v39 = vcombine.low %v1645_v28, %v1649_v29  ;;  %v4649_v42 = vcombine.high %v1652_v34, %v1656_v35  ;;  %v1669_v43 = vld [vmem:[#allocation11 + $0x388] sm:$0xff]  ;;  %v6008_v19 = vld [vmem:[#allocation11 + $0x440] sm:$0xff] }
 0x21c   : > { %v869_v62 = vpack.c.bf16 %v861_v41, %v859_v54  ;;  %3103 = vmatpush1.bf16.msra.mxu1 %v4592_v53  ;;  %3249 = vmatpush1.bf16.msra.mxu0 %v4594_v57  ;;  %v4651_v44 = vcombine.high %v1653_v36, %v1657_v37  ;;  %v4648_v45 = vcombine.low %v1652_v34, %v1656_v35  ;;  %v1664_v54 = vld [vmem:[#allocation11 + $0x360] sm:$0xff]  ;;  %v1665_v57 = vld [vmem:[#allocation11 + $0x368] sm:$0xff] }
 0x21d   : > { %3104 = vmatprep.subr.bf16.mxu1 %v4601_v55  ;;  %3250 = vmatprep.subr.bf16.mxu0 %v4603_v60  ;;  %v4650_v47 = vcombine.low %v1653_v36, %v1657_v37  ;;  %v4657_v53 = vcombine.high %v1660_v48, %v1664_v54  ;;  %v4656_v59 = vcombine.low %v1660_v48, %v1664_v54  ;;  %v1672_v41 = vld [vmem:[#allocation11 + $0x3a0] sm:$0xff]  ;;  %v1673_v61 = vld [vmem:[#allocation11 + $0x3a8] sm:$0xff] }
 0x21e   : > { %1316 = vmatprep.mubr.bf16.mxu1 %v869_v62  ;;  %1389 = vmatprep.mubr.bf16.mxu0 %v869_v62  ;;  %v4658_v55 = vcombine.low %v1661_v51, %v1665_v57  ;;  %v4659_v60 = vcombine.high %v1661_v51, %v1665_v57  ;;  %v4665_v46 = vcombine.high %v1668_v40, %v1672_v41  ;;  %v1681_v3 = vld [vmem:[#allocation11 + $0x3e8] sm:$0xff]  ;;  %v6028_v27 = vld [vmem:[#allocation11 + $0x480] sm:$0xff] }
 0x21f   : > { %1317 = vmatmul.mubr.bf16.gmra.mrb[12].mxu1 %v868_v56  ;;  %1390 = vmatmul.mubr.bf16.gmra.mrb[28].mxu0 %v868_v56  ;;  %v4664_v56 = vcombine.low %v1668_v40, %v1672_v41  ;;  %v4666_v62 = vcombine.low %v1669_v43, %v1673_v61  ;;  %v5991_v11 = vld [vmem:[#allocation11 + $0x428] sm:$0xff]  ;;  %v6030_v28 = vld [vmem:[#allocation11 + $0x4a0] sm:$0xff]  ;;  %v6033_v29 = vrot.slane %v1454_v18, %v5928_v50 }
 0x220   : > { %3105 = vmatpush1.bf16.msra.mxu1 %v4600_v63  ;;  %3251 = vmatpush1.bf16.msra.mxu0 %v4602_v58  ;;  %v4667_v63 = vcombine.high %v1669_v43, %v1673_v61  ;;  %v1676_v58 = vld [vmem:[#allocation11 + $0x3c0] sm:$0xff]  ;;  %v4697_v54 = vcombine.high %v6028_v27, %v6030_v28 }
 0x221   : > { %3106 = vmatprep.subr.bf16.mxu1 %v4609_v0  ;;  %3252 = vmatprep.subr.bf16.mxu0 %v4611_v1  ;;  %v1680_v0 = vld [vmem:[#allocation11 + $0x3e0] sm:$0xff]  ;;  %v1677_v1 = vld [vmem:[#allocation11 + $0x3c8] sm:$0xff] }
 0x222   : > { %v4673_v2 = vcombine.high %v1676_v58, %v1680_v0  ;;  %v4672_v4 = vcombine.low %v1676_v58, %v1680_v0  ;;  %v4674_v5 = vcombine.low %v1677_v1, %v1681_v3  ;;  %v6066_v40 = vld [vmem:[#allocation11 + $0x4c0] sm:$0xff]  ;;  %v6074_v58 = vld [vmem:[#allocation11 + $0x4c8] sm:$0xff] }
 0x223   : > { %v6068_v41 = vld [vmem:[#allocation11 + $0x4e0] sm:$0xff]  ;;  %v6076_v0 = vld [vmem:[#allocation11 + $0x4e8] sm:$0xff] }
 0x224   : > { %3107 = vmatpush1.bf16.msra.mxu1 %v4608_v6  ;;  %3253 = vmatpush1.bf16.msra.mxu0 %v4610_v7  ;;  %v4675_v6 = vcombine.high %v1677_v1, %v1681_v3  ;;  %v5983_v7 = vld [vmem:[#allocation11 + $0x400] sm:$0xff] }
 0x225   : > { %3108 = vmatprep.subr.bf16.mxu1 %v4617_v8  ;;  %3254 = vmatprep.subr.bf16.mxu0 %v4619_v9  ;;  %v5985_v8 = vld [vmem:[#allocation11 + $0x420] sm:$0xff]  ;;  %v5987_v9 = vld [vmem:[#allocation11 + $0x408] sm:$0xff] }
 0x226   : > { %v4681_v10 = vcombine.high %v5983_v7, %v5985_v8  ;;  %v4680_v12 = vcombine.low %v5983_v7, %v5985_v8  ;;  %v4682_v13 = vcombine.low %v5987_v9, %v5991_v11 }
 0x228   : > { %3109 = vmatpush1.bf16.msra.mxu1 %v4616_v14  ;;  %3255 = vmatpush1.bf16.msra.mxu0 %v4618_v15  ;;  %v4683_v14 = vcombine.high %v5987_v9, %v5991_v11  ;;  %v6000_v15 = vsub.s32 2, %v5925_v49 }
 0x229   : > { %3110 = vmatprep.subr.bf16.mxu1 %v4625_v16  ;;  %3256 = vmatprep.subr.bf16.mxu0 %v4627_v17  ;;  %v1400_v16 = vld [vmem:[#allocation10] sm:$0xf]  ;;  %v6003_v17 = vsub.s32 3, %v5925_v49 }
 0x22a   : > { %v6011_v20 = vrot.slane %v1400_v16, %v5928_v50  ;;  %v6014_v21 = vrot.slane %v1400_v16, %v6000_v15 }
 0x22b   : > { %v6026_v26 = vrot.slane %v1400_v16, %v6003_v17  ;;  %v6046_v36 = vrot.slane %v1454_v18, %v6003_v17 }
 0x22c   : > { %3111 = vmatpush1.bf16.msra.mxu1 %v4624_v22  ;;  %3257 = vmatpush1.bf16.msra.mxu0 %v4626_v23  ;;  %v6016_v22 = vld [vmem:[#allocation11 + $0x460] sm:$0xff]  ;;  %v6018_v23 = vld [vmem:[#allocation11 + $0x448] sm:$0xff] }
 0x22d   : > { %3112 = vmatprep.subr.bf16.mxu1 %v4633_v24  ;;  %3258 = vmatprep.subr.bf16.mxu0 %v4635_v25  ;;  %v6020_v24 = vld [vmem:[#allocation11 + $0x468] sm:$0xff]  ;;  %v6023_v25 = vrot.slane %v1400_v16, %v5934_v52  ;;  %v4688_v37 = vcombine.low %v6008_v19, %v6016_v22 }
 0x22e   : > { %v4691_v48 = vcombine.high %v6018_v23, %v6020_v24 }
 0x230   : > { %3113 = vmatpush1.bf16.msra.mxu1 %v4632_v30  ;;  %3259 = vmatpush1.bf16.msra.mxu0 %v4634_v31  ;;  %v6036_v30 = vrot.slane %v1454_v18, %v6000_v15  ;;  %v6039_v31 = vrot.slane %v1454_v18, %v5934_v52 }
 0x231   : > { %3114 = vmatprep.subr.bf16.mxu1 %v4641_v32  ;;  %3260 = vmatprep.subr.bf16.mxu0 %v4643_v33  ;;  %v6041_v32 = vld [vmem:[#allocation11 + $0x488] sm:$0xff] }
 0x232   : > { %v6043_v33 = vld [vmem:[#allocation11 + $0x4a8] sm:$0xff] }
 0x234   : > { %3115 = vmatpush1.bf16.msra.mxu1 %v4640_v38  ;;  %3261 = vmatpush1.bf16.msra.mxu0 %v4642_v39  ;;  %v4689_v38 = vcombine.high %v6008_v19, %v6016_v22  ;;  %v4690_v39 = vcombine.low %v6018_v23, %v6020_v24  ;;  %v6174_v19 = vld [vmem:[#allocation11 + $0x540] sm:$0xff] }
 0x235   : > { %3116 = vmatprep.subr.bf16.mxu1 %v4649_v42  ;;  %3262 = vmatprep.subr.bf16.mxu0 %v4651_v44 }
 0x238   : > { %3117 = vmatpush1.bf16.msra.mxu1 %v4648_v45  ;;  %3263 = vmatpush1.bf16.msra.mxu0 %v4650_v47 }
 0x239   : > { %3118 = vmatprep.subr.bf16.mxu1 %v4657_v53  ;;  %3264 = vmatprep.subr.bf16.mxu0 %v4659_v60  ;;  %v4698_v60 = vcombine.low %v6041_v32, %v6043_v33 }
 0x23c   : > { %3119 = vmatpush1.bf16.msra.mxu1 %v4656_v59  ;;  %3265 = vmatpush1.bf16.msra.mxu0 %v4658_v55  ;;  %v4696_v55 = vcombine.low %v6028_v27, %v6030_v28 }
 0x23d   : > { %3120 = vmatprep.subr.bf16.mxu1 %v4665_v46  ;;  %3266 = vmatprep.subr.bf16.mxu0 %v4667_v63 }
 0x240   : > { %3121 = vmatpush1.bf16.msra.mxu1 %v4664_v56  ;;  %3267 = vmatpush1.bf16.msra.mxu0 %v4666_v62 }
 0x241   : > { %3122 = vmatprep.subr.bf16.mxu1 %v4673_v2  ;;  %3268 = vmatprep.subr.bf16.mxu0 %v4675_v6 }
 0x244   : > { %3123 = vmatpush1.bf16.msra.mxu1 %v4672_v4  ;;  %3269 = vmatpush1.bf16.msra.mxu0 %v4674_v5 }
 0x245   : > { %3165 = vmatprep.subr.bf16.mxu1 %v4681_v10  ;;  %3311 = vmatprep.subr.bf16.mxu0 %v4683_v14  ;;  %v4699_v10 = vcombine.high %v6041_v32, %v6043_v33  ;;  %v4705_v14 = vcombine.high %v6066_v40, %v6068_v41 }
 0x2da   : > { %v1288_v34 = vpop.f32.mrb[0].mxu1  ;;  %v1361_v35 = vpop.f32.mrb[16].mxu0 }
 0x2db   : > { %v1422_v42 = vmul.f32 %v6011_v20, %v1288_v34  ;;  %v1424_v44 = vmul.f32 %v6014_v21, %v1361_v35  ;;  %v1290_v45 = vpop.f32.mrb[1].mxu1  ;;  %v1363_v47 = vpop.f32.mrb[17].mxu0 }
 0x2dc   : > { %v1423_v51 = vmul.f32 %v6023_v25, %v1290_v45  ;;  %v1425_v53 = vmul.f32 %v6026_v26, %v1363_v47  ;;  %v1292_v57 = vpop.f32.mrb[2].mxu1  ;;  %v1365_v59 = vpop.f32.mrb[18].mxu0 }
 0x2dd   : > { %v1476_v43 = vadd.f32 %v6033_v29, %v1422_v42  ;;  %v1478_v46 = vadd.f32 %v6036_v30, %v1424_v44  ;;  %v1426_v61 = vmul.f32 %v6011_v20, %v1292_v57  ;;  %v1428_v56 = vmul.f32 %v6014_v21, %v1365_v59  ;;  %v1294_v62 = vpop.f32.mrb[3].mxu1  ;;  %v1367_v63 = vpop.f32.mrb[19].mxu0 }
 0x2de   : > { %v1477_v1 = vadd.f32 %v6039_v31, %v1423_v51  ;;  %v1479_v2 = vadd.f32 %v6046_v36, %v1425_v53  ;;  %v1427_v3 = vmul.f32 %v6023_v25, %v1294_v62  ;;  %v1429_v4 = vmul.f32 %v6026_v26, %v1367_v63 }
 0x2df   : > { %v1480_v5 = vadd.f32 %v6033_v29, %v1426_v61  ;;  %v1482_v6 = vadd.f32 %v6036_v30, %v1428_v56  ;;  %v1508_v42 = vmax.f32 %v1476_v43, 0.0  ;;  %v1510_v44 = vmax.f32 %v1478_v46, 0.0 }
 0x2e0   : > { %v1481_v16 = vadd.f32 %v6039_v31, %v1427_v3  ;;  %v1483_v18 = vadd.f32 %v6046_v36, %v1429_v4  ;;  %v1509_v51 = vmax.f32 %v1477_v1, 0.0  ;;  %v1511_v53 = vmax.f32 %v1479_v2, 0.0 }
 0x2e1   : > { %v1512_v45 = vmax.f32 %v1480_v5, 0.0  ;;  %v1514_v47 = vmax.f32 %v1482_v6, 0.0 }
 0x2e2   : > { %v1513_v57 = vmax.f32 %v1481_v16, 0.0  ;;  %v1515_v59 = vmax.f32 %v1483_v18, 0.0  ;;  %v1298_v61 = vpop.f32.mrb[4].mxu1  ;;  %v1371_v56 = vpop.f32.mrb[20].mxu0 }
 0x2e3   : > { %v6094_v62 = vpack.c.bf16 %v1512_v45, %v1508_v42  ;;  %v6096_v63 = vpack.c.bf16 %v1514_v47, %v1510_v44  ;;  %v1430_v3 = vmul.f32 %v6011_v20, %v1298_v61  ;;  %v1300_v4 = vpop.f32.mrb[5].mxu1  ;;  %v1432_v34 = vmul.f32 %v6014_v21, %v1371_v56  ;;  %v1373_v35 = vpop.f32.mrb[21].mxu0  ;;  %v6122_v56 = vld [vmem:[#allocation11 + $0x508] sm:$0xff] }
 0x2e4   : > { %v6100_v43 = vpack.c.bf16 %v1513_v57, %v1509_v51  ;;  %v6102_v46 = vpack.c.bf16 %v1515_v59, %v1511_v53  ;;  %v1431_v1 = vmul.f32 %v6023_v25, %v1300_v4  ;;  %v1302_v2 = vpop.f32.mrb[6].mxu1  ;;  %v1433_v5 = vmul.f32 %v6026_v26, %v1373_v35  ;;  %v1375_v6 = vpop.f32.mrb[22].mxu0  ;;  %v6114_v35 = vld [vmem:[#allocation11 + $0x500] sm:$0xff] }
 0x2e5   : > { %v1484_v16 = vadd.f32 %v6033_v29, %v1430_v3  ;;  %v1434_v18 = vmul.f32 %v6011_v20, %v1302_v2  ;;  %v1304_v42 = vpop.f32.mrb[7].mxu1  ;;  %v1486_v44 = vadd.f32 %v6036_v30, %v1432_v34  ;;  %v1436_v45 = vmul.f32 %v6014_v21, %v1375_v6  ;;  %v1377_v47 = vpop.f32.mrb[23].mxu0  ;;  %v6116_v57 = vld [vmem:[#allocation11 + $0x520] sm:$0xff]  ;;  %v6124_v3 = vld [vmem:[#allocation11 + $0x528] sm:$0xff] }
 0x2e6   : > { %v1485_v51 = vadd.f32 %v6039_v31, %v1431_v1  ;;  %v1435_v53 = vmul.f32 %v6023_v25, %v1304_v42  ;;  %3124 = vmatprep.mubr.bf16.mxu1 %v6100_v43  ;;  %3270 = vmatprep.mubr.bf16.mxu0 %v6100_v43  ;;  %v1487_v59 = vadd.f32 %v6046_v36, %v1433_v5 }
 0x2e7   : > { %v1516_v61 = vmax.f32 %v1484_v16, 0.0  ;;  %v1488_v34 = vadd.f32 %v6033_v29, %v1434_v18  ;;  %3125 = vmatmul.mubr.bf16.vlgmr.msra.gmra.mrb[16].mxu1 %v6094_v62  ;;  %3271 = vmatmul.mubr.bf16.vlgmr.msra.gmra.mrb[32].mxu0 %v6094_v62  ;;  %v1518_v4 = vmax.f32 %v1486_v44, 0.0  ;;  %v1490_v1 = vadd.f32 %v6036_v30, %v1436_v45 }
 0x2e8   : > { %v1517_v2 = vmax.f32 %v1485_v51, 0.0  ;;  %v1489_v6 = vadd.f32 %v6039_v31, %v1435_v53  ;;  %3166 = vmatpush1.bf16.msra.mxu1 %v4680_v12  ;;  %3312 = vmatpush1.bf16.msra.mxu0 %v4682_v13  ;;  %v4707_v5 = vcombine.high %v6074_v58, %v6076_v0  ;;  %v1437_v16 = vmul.f32 %v6026_v26, %v1377_v47 }
 0x2e9   : > { %v1520_v18 = vmax.f32 %v1488_v34, 0.0  ;;  %3167 = vmatprep.subr.bf16.mxu1 %v4689_v38  ;;  %3313 = vmatprep.subr.bf16.mxu0 %v4691_v48  ;;  %v4712_v7 = vcombine.low %v6114_v35, %v6116_v57  ;;  %v4713_v8 = vcombine.high %v6114_v35, %v6116_v57  ;;  %v1522_v9 = vmax.f32 %v1490_v1, 0.0 }
 0x2ea   : > { %v1521_v11 = vmax.f32 %v1489_v6, 0.0  ;;  %v1308_v12 = vpop.f32.mrb[8].mxu1  ;;  %v4714_v13 = vcombine.low %v6122_v56, %v6124_v3  ;;  %v1519_v42 = vmax.f32 %v1487_v59, 0.0  ;;  %v1491_v44 = vadd.f32 %v6046_v36, %v1437_v16  ;;  %v1381_v38 = vpop.f32.mrb[24].mxu0 }
 0x2eb   : > { %v6150_v45 = vpack.c.bf16 %v1520_v18, %v1516_v61  ;;  %v1438_v48 = vmul.f32 %v6011_v20, %v1308_v12  ;;  %v1310_v47 = vpop.f32.mrb[9].mxu1  ;;  %v6153_v51 = vpack.c.bf16 %v1522_v9, %v1518_v4  ;;  %v1440_v53 = vmul.f32 %v6014_v21, %v1381_v38  ;;  %v1383_v34 = vpop.f32.mrb[25].mxu0 }
 0x2ec   : > { %v6156_v1 = vpack.c.bf16 %v1521_v11, %v1517_v2  ;;  %v1439_v6 = vmul.f32 %v6023_v25, %v1310_v47  ;;  %3168 = vmatpush1.bf16.msra.mxu1 %v4688_v37  ;;  %3314 = vmatpush1.bf16.msra.mxu0 %v4690_v39  ;;  %v1312_v59 = vpop.f32.mrb[10].mxu1  ;;  %v1523_v61 = vmax.f32 %v1491_v44, 0.0  ;;  %v1441_v4 = vmul.f32 %v6026_v26, %v1383_v34  ;;  %v1385_v16 = vpop.f32.mrb[26].mxu0  ;;  %v6183_v39 = vld [vmem:[#allocation11 + $0x560] sm:$0xff]  ;;  %v6187_v11 = vld [vmem:[#allocation11 + $0x568] sm:$0xff] }
 0x2ed   : > { %v1492_v18 = vadd.f32 %v6033_v29, %v1438_v48  ;;  %v1442_v2 = vmul.f32 %v6011_v20, %v1312_v59  ;;  %v1314_v9 = vpop.f32.mrb[11].mxu1  ;;  %3169 = vmatprep.subr.bf16.mxu1 %v4697_v54  ;;  %3315 = vmatprep.subr.bf16.mxu0 %v4699_v10  ;;  %v6177_v22 = vadd.f32 %v6036_v30, %v1440_v53  ;;  %v1387_v23 = vpop.f32.mrb[27].mxu0  ;;  %v6185_v54 = vld [vmem:[#allocation11 + $0x548] sm:$0xff] }
 0x2ee   : > { %v1493_v24 = vadd.f32 %v6039_v31, %v1439_v6  ;;  %v1443_v37 = vmul.f32 %v6023_v25, %v1314_v9  ;;  %3134 = vmatprep.mubr.bf16.mxu1 %v6156_v1  ;;  %3280 = vmatprep.mubr.bf16.mxu0 %v6156_v1  ;;  %v6189_v10 = vpack.c.bf16 %v1523_v61, %v1519_v42 }
 0x2ef   : > { %v1524_v12 = vmax.f32 %v1492_v18, 0.0  ;;  %v1496_v44 = vadd.f32 %v6033_v29, %v1442_v2  ;;  %3135 = vmatmul.mubr.bf16.gmra.mrb[20].mxu1 %v6150_v45  ;;  %3281 = vmatmul.mubr.bf16.gmra.mrb[36].mxu0 %v6150_v45  ;;  %v4715_v38 = vcombine.high %v6122_v56, %v6124_v3  ;;  %v1495_v48 = vadd.f32 %v6046_v36, %v1441_v4 }
 0x2f0   : > { %v1525_v47 = vmax.f32 %v1493_v24, 0.0  ;;  %v1497_v53 = vadd.f32 %v6039_v31, %v1443_v37  ;;  %3170 = vmatpush1.bf16.msra.mxu1 %v4696_v55  ;;  %3316 = vmatpush1.bf16.msra.mxu0 %v4698_v60  ;;  %v1444_v42 = vmul.f32 %v6014_v21, %v1385_v16  ;;  %v1445_v34 = vmul.f32 %v6026_v26, %v1387_v23 }
 0x2f1   : > { %v1528_v6 = vmax.f32 %v1496_v44, 0.0  ;;  %3171 = vmatprep.subr.bf16.mxu1 %v4705_v14  ;;  %3317 = vmatprep.subr.bf16.mxu0 %v4707_v5  ;;  %v4720_v59 = vcombine.low %v6174_v19, %v6183_v39  ;;  %v4721_v27 = vcombine.high %v6174_v19, %v6183_v39  ;;  %v4723_v28 = vcombine.high %v6185_v54, %v6187_v11 }
 0x2f2   : > { %v1529_v32 = vmax.f32 %v1497_v53, 0.0  ;;  %v1318_v33 = vpop.f32.mrb[12].mxu1  ;;  %v1526_v55 = vmax.f32 %v6177_v22, 0.0  ;;  %v1498_v60 = vadd.f32 %v6036_v30, %v1444_v42  ;;  %v1499_v61 = vadd.f32 %v6046_v36, %v1445_v34  ;;  %v1391_v4 = vpop.f32.mrb[28].mxu0 }
 0x2f3   : > { %v6218_v14 = vpack.c.bf16 %v1528_v6, %v1524_v12  ;;  %v1446_v5 = vmul.f32 %v6011_v20, %v1318_v33  ;;  %v1320_v16 = vpop.f32.mrb[13].mxu1  ;;  %v1527_v18 = vmax.f32 %v1495_v48, 0.0  ;;  %v1448_v2 = vmul.f32 %v6014_v21, %v1391_v4  ;;  %v1393_v9 = vpop.f32.mrb[29].mxu0  ;;  %v1737_v33 = vld [vmem:[#allocation11 + $0x5a8] sm:$0xff] }
 0x2f4   : > { %v6222_v23 = vpack.c.bf16 %v1529_v32, %v1525_v47  ;;  %v1447_v24 = vmul.f32 %v6023_v25, %v1320_v16  ;;  %v6988_v22 = vcombine.low %v6066_v40, %v6068_v41  ;;  %v6989_v37 = vcombine.low %v6074_v58, %v6076_v0  ;;  %v1322_v12 = vpop.f32.mrb[14].mxu1  ;;  %v1395_v42 = vpop.f32.mrb[30].mxu0  ;;  %v1732_v40 = vld [vmem:[#allocation11 + $0x580] sm:$0xff] }
 0x2f5   : > { %v1530_v44 = vmax.f32 %v1498_v60, 0.0  ;;  %v1531_v53 = vmax.f32 %v1499_v61, 0.0  ;;  %v1500_v48 = vadd.f32 %v6033_v29, %v1446_v5  ;;  %v1450_v34 = vmul.f32 %v6011_v20, %v1322_v12  ;;  %v1324_v47 = vpop.f32.mrb[15].mxu1  ;;  %v1397_v6 = vpop.f32.mrb[31].mxu0  ;;  %v1736_v32 = vld [vmem:[#allocation11 + $0x5a0] sm:$0xff]  ;;  %v1733_v20 = vld [vmem:[#allocation11 + $0x588] sm:$0xff] }
 0x2f6   : > { %3172 = vmatpush1.bf16.msra.mxu1 %v6988_v22  ;;  %3318 = vmatpush1.bf16.msra.mxu0 %v6989_v37  ;;  %v1502_v41 = vadd.f32 %v6036_v30, %v1448_v2  ;;  %v1501_v58 = vadd.f32 %v6039_v31, %v1447_v24  ;;  %v1451_v0 = vmul.f32 %v6023_v25, %v1324_v47  ;;  %v1740_v2 = vld [vmem:[#allocation11 + $0x5c0] sm:$0xff] }
 0x2f7   : > { %3173 = vmatprep.subr.bf16.mxu1 %v4713_v8  ;;  %3319 = vmatprep.subr.bf16.mxu0 %v4715_v38  ;;  %v6241_v60 = vpack.c.bf16 %v1530_v44, %v1526_v55  ;;  %v1532_v61 = vmax.f32 %v1500_v48, 0.0  ;;  %v1504_v8 = vadd.f32 %v6033_v29, %v1450_v34  ;;  %v4722_v38 = vcombine.low %v6185_v54, %v6187_v11  ;;  %v1752_v44 = vld [vmem:[#allocation11 + $0x620] sm:$0xff] }
 0x2f8   : > { %3144 = vmatprep.mubr.bf16.mxu1 %v6222_v23  ;;  %3290 = vmatprep.mubr.bf16.mxu0 %v6222_v23  ;;  %v6248_v25 = vpack.c.bf16 %v1531_v53, %v1527_v18  ;;  %v1533_v4 = vmax.f32 %v1501_v58, 0.0  ;;  %v1505_v5 = vadd.f32 %v6039_v31, %v1451_v0  ;;  %v1449_v29 = vmul.f32 %v6026_v26, %v1393_v9  ;;  %v1749_v53 = vld [vmem:[#allocation11 + $0x608] sm:$0xff] }
 0x2f9   : > { %3145 = vmatmul.mubr.bf16.gmra.mrb[24].mxu1 %v6218_v14  ;;  %3291 = vmatmul.mubr.bf16.gmra.mrb[40].mxu0 %v6218_v14  ;;  %v1452_v55 = vmul.f32 %v6014_v21, %v1395_v42  ;;  %v1536_v16 = vmax.f32 %v1504_v8, 0.0  ;;  %v4729_v54 = vcombine.high %v1732_v40, %v1736_v32  ;;  %v4731_v11 = vcombine.high %v1733_v20, %v1737_v33  ;;  %v1745_v21 = vld [vmem:[#allocation11 + $0x5e8] sm:$0xff]  ;;  %v1768_v8 = vld [vmem:[#allocation11 + $0x6a0] sm:$0xff] }
 0x2fa   : > { %3174 = vmatpush1.bf16.msra.mxu1 %v4712_v7  ;;  %3320 = vmatpush1.bf16.msra.mxu0 %v4714_v13  ;;  %v1453_v18 = vmul.f32 %v6026_v26, %v1397_v6  ;;  %v1537_v31 = vmax.f32 %v1505_v5, 0.0  ;;  %v1534_v24 = vmax.f32 %v1502_v41, 0.0  ;;  %v1503_v35 = vadd.f32 %v6046_v36, %v1449_v29  ;;  %v1744_v7 = vld [vmem:[#allocation11 + $0x5e0] sm:$0xff]  ;;  %v1741_v13 = vld [vmem:[#allocation11 + $0x5c8] sm:$0xff] }
 0x2fb   : > { %3175 = vmatprep.subr.bf16.mxu1 %v4721_v27  ;;  %3321 = vmatprep.subr.bf16.mxu0 %v4723_v28  ;;  %v1506_v57 = vadd.f32 %v6036_v30, %v1452_v55  ;;  %v6262_v56 = vpack.c.bf16 %v1536_v16, %v1532_v61  ;;  %v4728_v3 = vcombine.low %v1732_v40, %v1736_v32  ;;  %v1748_v30 = vld [vmem:[#allocation11 + $0x600] sm:$0xff]  ;;  %v1753_v42 = vld [vmem:[#allocation11 + $0x628] sm:$0xff] }
 0x2fc   : > { %v1507_v27 = vadd.f32 %v6046_v36, %v1453_v18  ;;  %v6265_v28 = vpack.c.bf16 %v1537_v31, %v1533_v4  ;;  %v4730_v26 = vcombine.low %v1733_v20, %v1737_v33  ;;  %v1535_v9 = vmax.f32 %v1503_v35, 0.0  ;;  %v1756_v40 = vld [vmem:[#allocation11 + $0x640] sm:$0xff]  ;;  %v1757_v6 = vld [vmem:[#allocation11 + $0x648] sm:$0xff] }
 0x2fd   : > { %v1538_v22 = vmax.f32 %v1506_v57, 0.0  ;;  %v4737_v12 = vcombine.high %v1740_v2, %v1744_v7  ;;  %v4739_v36 = vcombine.high %v1741_v13, %v1745_v21  ;;  %v4736_v39 = vcombine.low %v1740_v2, %v1744_v7  ;;  %v1760_v41 = vld [vmem:[#allocation11 + $0x660] sm:$0xff]  ;;  %v1761_v58 = vld [vmem:[#allocation11 + $0x668] sm:$0xff] }
 0x2fe   : > { %3176 = vmatpush1.bf16.msra.mxu1 %v4720_v59  ;;  %3322 = vmatpush1.bf16.msra.mxu0 %v4722_v38  ;;  %v1539_v37 = vmax.f32 %v1507_v27, 0.0  ;;  %v4738_v59 = vcombine.low %v1741_v13, %v1745_v21  ;;  %v4745_v34 = vcombine.high %v1748_v30, %v1752_v44  ;;  %v4747_v47 = vcombine.high %v1749_v53, %v1753_v42  ;;  %v1764_v61 = vld [vmem:[#allocation11 + $0x680] sm:$0xff]  ;;  %v1765_v38 = vld [vmem:[#allocation11 + $0x688] sm:$0xff] }
 0x2ff   : > { %3177 = vmatprep.subr.bf16.mxu1 %v4729_v54  ;;  %3323 = vmatprep.subr.bf16.mxu0 %v4731_v11  ;;  %v6272_v48 = vpack.c.bf16 %v1538_v22, %v1534_v24  ;;  %v4744_v0 = vcombine.low %v1748_v30, %v1752_v44  ;;  %v4746_v32 = vcombine.low %v1749_v53, %v1753_v42  ;;  %v1769_v4 = vld [vmem:[#allocation11 + $0x6a8] sm:$0xff]  ;;  %v1772_v54 = vld [vmem:[#allocation11 + $0x6c0] sm:$0xff] }
 0x300   : > { %3154 = vmatprep.mubr.bf16.mxu1 %v6265_v28  ;;  %3300 = vmatprep.mubr.bf16.mxu0 %v6265_v28  ;;  %v6276_v19 = vpack.c.bf16 %v1539_v37, %v1535_v9  ;;  %v4753_v20 = vcombine.high %v1756_v40, %v1760_v41  ;;  %v4755_v33 = vcombine.high %v1757_v6, %v1761_v58  ;;  %v1776_v11 = vld [vmem:[#allocation11 + $0x6e0] sm:$0xff]  ;;  %v1773_v18 = vld [vmem:[#allocation11 + $0x6c8] sm:$0xff] }
 0x301   : > { %3155 = vmatmul.mubr.bf16.gmra.mrb[28].mxu1 %v6262_v56  ;;  %3301 = vmatmul.mubr.bf16.gmra.mrb[44].mxu0 %v6262_v56  ;;  %v4752_v5 = vcombine.low %v1756_v40, %v1760_v41  ;;  %v4754_v29 = vcombine.low %v1757_v6, %v1761_v58  ;;  %v4761_v55 = vcombine.high %v1764_v61, %v1768_v8  ;;  %v1777_v31 = vld [vmem:[#allocation11 + $0x6e8] sm:$0xff]  ;;  %v1784_v7 = vld [vmem:[#allocation11 + $0x720] sm:$0xff] }
 0x302   : > { %3178 = vmatpush1.bf16.msra.mxu1 %v4728_v3  ;;  %3324 = vmatpush1.bf16.msra.mxu0 %v4730_v26  ;;  %v4763_v16 = vcombine.high %v1765_v38, %v1769_v4  ;;  %v4760_v2 = vcombine.low %v1764_v61, %v1768_v8  ;;  %v4762_v24 = vcombine.low %v1765_v38, %v1769_v4  ;;  %v1780_v3 = vld [vmem:[#allocation11 + $0x700] sm:$0xff]  ;;  %v1781_v13 = vld [vmem:[#allocation11 + $0x708] sm:$0xff] }
 0x303   : > { %3197 = vmatprep.mubr.bf16.mxu1 %v6102_v46  ;;  %3343 = vmatprep.mubr.bf16.mxu0 %v6102_v46  ;;  %v4769_v35 = vcombine.high %v1772_v54, %v1776_v11  ;;  %v4771_v57 = vcombine.high %v1773_v18, %v1777_v31  ;;  %v1785_v21 = vld [vmem:[#allocation11 + $0x728] sm:$0xff]  ;;  %v4768_v27 = vcombine.low %v1772_v54, %v1776_v11  ;;  %v1788_v30 = vld [vmem:[#allocation11 + $0x740] sm:$0xff]  ;;  %v1563_v54 = vld [vmem:[#allocation11 + $0x38] sm:$0xff] }
 0x304   : > { %3179 = vmatprep.subr.bf16.mxu1 %v4737_v12  ;;  %3325 = vmatprep.subr.bf16.mxu0 %v4739_v36  ;;  %v4770_v26 = vcombine.low %v1773_v18, %v1777_v31  ;;  %v4777_v9 = vcombine.high %v1780_v3, %v1784_v7  ;;  %v4779_v22 = vcombine.high %v1781_v13, %v1785_v21  ;;  %v1792_v37 = vld [vmem:[#allocation11 + $0x760] sm:$0xff]  ;;  %v1789_v12 = vld [vmem:[#allocation11 + $0x748] sm:$0xff] }
 0x305   : > { %v1793_v36 = vld [vmem:[#allocation11 + $0x768] sm:$0xff]  ;;  %v4776_v44 = vcombine.low %v1780_v3, %v1784_v7  ;;  %v4778_v53 = vcombine.low %v1781_v13, %v1785_v21  ;;  %v4785_v42 = vcombine.high %v1788_v30, %v1792_v37  ;;  %v4784_v41 = vcombine.low %v1788_v30, %v1792_v37  ;;  %v1571_v3 = vld [vmem:[#allocation11 + $0x78] sm:$0xff] }
 0x306   : > { %3180 = vmatpush1.bf16.msra.mxu1 %v4736_v39  ;;  %3326 = vmatpush1.bf16.msra.mxu0 %v4738_v59  ;;  %v4787_v39 = vcombine.high %v1789_v12, %v1793_v36  ;;  %v1796_v59 = vld [vmem:[#allocation11 + $0x780] sm:$0xff]  ;;  %v1801_v40 = vld [vmem:[#allocation11 + $0x7a8] sm:$0xff]  ;;  %v4786_v6 = vcombine.low %v1789_v12, %v1793_v36  ;;  %v1579_v30 = vld [vmem:[#allocation11 + $0xb8] sm:$0xff] }
 0x307   : > { %3181 = vmatprep.subr.bf16.mxu1 %v4745_v34  ;;  %3327 = vmatprep.subr.bf16.mxu0 %v4747_v47  ;;  %v1800_v34 = vld [vmem:[#allocation11 + $0x7a0] sm:$0xff]  ;;  %v1797_v47 = vld [vmem:[#allocation11 + $0x788] sm:$0xff] }
 0x308   : > { %v4793_v58 = vcombine.high %v1796_v59, %v1800_v34  ;;  %v1809_v61 = vld [vmem:[#allocation11 + $0x7e8] sm:$0xff]  ;;  %v4792_v8 = vcombine.low %v1796_v59, %v1800_v34  ;;  %v4794_v38 = vcombine.low %v1797_v47, %v1801_v40  ;;  %v1587_v59 = vld [vmem:[#allocation11 + $0xf8] sm:$0xff] }
 0x30a   : > { %3182 = vmatpush1.bf16.msra.mxu1 %v4744_v0  ;;  %3328 = vmatpush1.bf16.msra.mxu0 %v4746_v32  ;;  %v4795_v0 = vcombine.high %v1797_v47, %v1801_v40  ;;  %v1804_v32 = vld [vmem:[#allocation11 + $0x7c0] sm:$0xff] }
 0x30b   : > { %3183 = vmatprep.subr.bf16.mxu1 %v4753_v20  ;;  %3329 = vmatprep.subr.bf16.mxu0 %v4755_v33  ;;  %v1808_v20 = vld [vmem:[#allocation11 + $0x7e0] sm:$0xff]  ;;  %v1805_v33 = vld [vmem:[#allocation11 + $0x7c8] sm:$0xff] }
 0x30c   : > { %v4801_v4 = vcombine.high %v1804_v32, %v1808_v20  ;;  %v4800_v11 = vcombine.low %v1804_v32, %v1808_v20  ;;  %v4802_v18 = vcombine.low %v1805_v33, %v1809_v61  ;;  %v1595_v32 = vld [vmem:[#allocation11 + $0x138] sm:$0xff] }
 0x30e   : > { %3184 = vmatpush1.bf16.msra.mxu1 %v4752_v5  ;;  %3330 = vmatpush1.bf16.msra.mxu0 %v4754_v29  ;;  %v4803_v5 = vcombine.high %v1805_v33, %v1809_v61  ;;  %v1558_v29 = vld [vmem:[#allocation11 + $0x10] sm:$0xff] }
 0x30f   : > { %3185 = vmatprep.subr.bf16.mxu1 %v4761_v55  ;;  %3331 = vmatprep.subr.bf16.mxu0 %v4763_v16  ;;  %v1562_v55 = vld [vmem:[#allocation11 + $0x30] sm:$0xff]  ;;  %v1559_v16 = vld [vmem:[#allocation11 + $0x18] sm:$0xff] }
 0x310   : > { %v4557_v31 = vcombine.high %v1558_v29, %v1562_v55  ;;  %v4556_v7 = vcombine.low %v1558_v29, %v1562_v55  ;;  %v4558_v13 = vcombine.low %v1559_v16, %v1563_v54  ;;  %v1603_v29 = vld [vmem:[#allocation11 + $0x178] sm:$0xff] }
 0x312   : > { %3186 = vmatpush1.bf16.msra.mxu1 %v4760_v2  ;;  %3332 = vmatpush1.bf16.msra.mxu0 %v4762_v24  ;;  %v4559_v2 = vcombine.high %v1559_v16, %v1563_v54  ;;  %v1566_v24 = vld [vmem:[#allocation11 + $0x50] sm:$0xff] }
 0x313   : > { %3187 = vmatprep.subr.bf16.mxu1 %v4769_v35  ;;  %3333 = vmatprep.subr.bf16.mxu0 %v4771_v57  ;;  %v1570_v35 = vld [vmem:[#allocation11 + $0x70] sm:$0xff]  ;;  %v1567_v57 = vld [vmem:[#allocation11 + $0x58] sm:$0xff] }
 0x314   : > { %v4565_v21 = vcombine.high %v1566_v24, %v1570_v35  ;;  %v4564_v37 = vcombine.low %v1566_v24, %v1570_v35  ;;  %v4566_v12 = vcombine.low %v1567_v57, %v1571_v3  ;;  %v1611_v24 = vld [vmem:[#allocation11 + $0x1b8] sm:$0xff] }
 0x316   : > { %3188 = vmatpush1.bf16.msra.mxu1 %v4768_v27  ;;  %3334 = vmatpush1.bf16.msra.mxu0 %v4770_v26  ;;  %v4567_v27 = vcombine.high %v1567_v57, %v1571_v3  ;;  %v1574_v26 = vld [vmem:[#allocation11 + $0x90] sm:$0xff] }
 0x317   : > { %3189 = vmatprep.subr.bf16.mxu1 %v4777_v9  ;;  %3335 = vmatprep.subr.bf16.mxu0 %v4779_v22  ;;  %v1578_v9 = vld [vmem:[#allocation11 + $0xb0] sm:$0xff]  ;;  %v1575_v22 = vld [vmem:[#allocation11 + $0x98] sm:$0xff] }
 0x318   : > { %v4573_v36 = vcombine.high %v1574_v26, %v1578_v9  ;;  %v4572_v34 = vcombine.low %v1574_v26, %v1578_v9  ;;  %v4574_v47 = vcombine.low %v1575_v22, %v1579_v30  ;;  %v1619_v26 = vld [vmem:[#allocation11 + $0x1f8] sm:$0xff] }
 0x31a   : > { %3190 = vmatpush1.bf16.msra.mxu1 %v4776_v44  ;;  %3336 = vmatpush1.bf16.msra.mxu0 %v4778_v53  ;;  %v4575_v44 = vcombine.high %v1575_v22, %v1579_v30  ;;  %v1582_v53 = vld [vmem:[#allocation11 + $0xd0] sm:$0xff] }
 0x31b   : > { %3191 = vmatprep.subr.bf16.mxu1 %v4785_v42  ;;  %3337 = vmatprep.subr.bf16.mxu0 %v4787_v39  ;;  %v1586_v42 = vld [vmem:[#allocation11 + $0xf0] sm:$0xff]  ;;  %v1583_v39 = vld [vmem:[#allocation11 + $0xd8] sm:$0xff] }
 0x31c   : > { %v4581_v40 = vcombine.high %v1582_v53, %v1586_v42  ;;  %v4580_v20 = vcombine.low %v1582_v53, %v1586_v42  ;;  %v4582_v33 = vcombine.low %v1583_v39, %v1587_v59  ;;  %v1627_v53 = vld [vmem:[#allocation11 + $0x238] sm:$0xff] }
 0x31e   : > { %3192 = vmatpush1.bf16.msra.mxu1 %v4784_v41  ;;  %3338 = vmatpush1.bf16.msra.mxu0 %v4786_v6  ;;  %v4583_v41 = vcombine.high %v1583_v39, %v1587_v59  ;;  %v1590_v6 = vld [vmem:[#allocation11 + $0x110] sm:$0xff] }
 0x31f   : > { %3193 = vmatprep.subr.bf16.mxu1 %v4793_v58  ;;  %3339 = vmatprep.subr.bf16.mxu0 %v4795_v0  ;;  %v1594_v58 = vld [vmem:[#allocation11 + $0x130] sm:$0xff]  ;;  %v1591_v0 = vld [vmem:[#allocation11 + $0x118] sm:$0xff] }
 0x320   : > { %v4589_v61 = vcombine.high %v1590_v6, %v1594_v58  ;;  %v4588_v55 = vcombine.low %v1590_v6, %v1594_v58  ;;  %v4590_v16 = vcombine.low %v1591_v0, %v1595_v32  ;;  %v1635_v6 = vld [vmem:[#allocation11 + $0x278] sm:$0xff] }
 0x322   : > { %3194 = vmatpush1.bf16.msra.mxu1 %v4792_v8  ;;  %3340 = vmatpush1.bf16.msra.mxu0 %v4794_v38  ;;  %v4591_v8 = vcombine.high %v1591_v0, %v1595_v32  ;;  %v1598_v38 = vld [vmem:[#allocation11 + $0x150] sm:$0xff] }
 0x323   : > { %3195 = vmatprep.subr.bf16.mxu1 %v4801_v4  ;;  %3341 = vmatprep.subr.bf16.mxu0 %v4803_v5  ;;  %v1602_v4 = vld [vmem:[#allocation11 + $0x170] sm:$0xff]  ;;  %v1599_v5 = vld [vmem:[#allocation11 + $0x158] sm:$0xff] }
 0x324   : > { %v4597_v54 = vcombine.high %v1598_v38, %v1602_v4  ;;  %v4596_v35 = vcombine.low %v1598_v38, %v1602_v4  ;;  %v4598_v57 = vcombine.low %v1599_v5, %v1603_v29 }
 0x326   : > { %3196 = vmatpush1.bf16.msra.mxu1 %v4800_v11  ;;  %3342 = vmatpush1.bf16.msra.mxu0 %v4802_v18  ;;  %v4599_v11 = vcombine.high %v1599_v5, %v1603_v29  ;;  %v1606_v18 = vld [vmem:[#allocation11 + $0x190] sm:$0xff] }
 0x327   : > { %3384 = vmatprep.subr.bf16.mxu1 %v4557_v31  ;;  %3530 = vmatprep.subr.bf16.mxu0 %v4559_v2  ;;  %v1610_v31 = vld [vmem:[#allocation11 + $0x1b0] sm:$0xff]  ;;  %v1607_v2 = vld [vmem:[#allocation11 + $0x198] sm:$0xff] }
 0x328   : > { %v4605_v3 = vcombine.high %v1606_v18, %v1610_v31  ;;  %v4604_v9 = vcombine.low %v1606_v18, %v1610_v31  ;;  %v4606_v22 = vcombine.low %v1607_v2, %v1611_v24 }
 0x329   : > { %3198 = vmatmul.mubr.bf16.vlgmr.msra.gmra.mrb[16].mxu1 %v6096_v63  ;;  %3344 = vmatmul.mubr.bf16.vlgmr.msra.gmra.mrb[32].mxu0 %v6096_v63 }
 0x32a   : > { %3207 = vmatprep.mubr.bf16.mxu1 %v6189_v10  ;;  %3353 = vmatprep.mubr.bf16.mxu0 %v6189_v10 }
 0x32b   : > { %3385 = vmatpush1.bf16.msra.mxu1 %v4556_v7  ;;  %3531 = vmatpush1.bf16.msra.mxu0 %v4558_v13  ;;  %v4607_v7 = vcombine.high %v1607_v2, %v1611_v24  ;;  %v1614_v13 = vld [vmem:[#allocation11 + $0x1d0] sm:$0xff] }
 0x32c   : > { %3386 = vmatprep.subr.bf16.mxu1 %v4565_v21  ;;  %3532 = vmatprep.subr.bf16.mxu0 %v4567_v27  ;;  %v1618_v21 = vld [vmem:[#allocation11 + $0x1f0] sm:$0xff]  ;;  %v1615_v27 = vld [vmem:[#allocation11 + $0x1d8] sm:$0xff] }
 0x32d   : > { %v4613_v30 = vcombine.high %v1614_v13, %v1618_v21  ;;  %v4612_v42 = vcombine.low %v1614_v13, %v1618_v21  ;;  %v4614_v39 = vcombine.low %v1615_v27, %v1619_v26 }
 0x32f   : > { %3387 = vmatpush1.bf16.msra.mxu1 %v4564_v37  ;;  %3533 = vmatpush1.bf16.msra.mxu0 %v4566_v12  ;;  %v4615_v37 = vcombine.high %v1615_v27, %v1619_v26  ;;  %v1622_v12 = vld [vmem:[#allocation11 + $0x210] sm:$0xff] }
 0x330   : > { %3388 = vmatprep.subr.bf16.mxu1 %v4573_v36  ;;  %3534 = vmatprep.subr.bf16.mxu0 %v4575_v44  ;;  %v1626_v36 = vld [vmem:[#allocation11 + $0x230] sm:$0xff]  ;;  %v1623_v44 = vld [vmem:[#allocation11 + $0x218] sm:$0xff] }
 0x331   : > { %3208 = vmatmul.mubr.bf16.gmra.mrb[20].mxu1 %v6153_v51  ;;  %3354 = vmatmul.mubr.bf16.gmra.mrb[36].mxu0 %v6153_v51  ;;  %v4621_v59 = vcombine.high %v1622_v12, %v1626_v36  ;;  %v4620_v58 = vcombine.low %v1622_v12, %v1626_v36  ;;  %v4622_v0 = vcombine.low %v1623_v44, %v1627_v53 }
 0x332   : > { %3217 = vmatprep.mubr.bf16.mxu1 %v6248_v25  ;;  %3363 = vmatprep.mubr.bf16.mxu0 %v6248_v25 }
 0x333   : > { %3389 = vmatpush1.bf16.msra.mxu1 %v4572_v34  ;;  %3535 = vmatpush1.bf16.msra.mxu0 %v4574_v47  ;;  %v4623_v34 = vcombine.high %v1623_v44, %v1627_v53  ;;  %v1630_v47 = vld [vmem:[#allocation11 + $0x250] sm:$0xff] }
 0x334   : > { %3390 = vmatprep.subr.bf16.mxu1 %v4581_v40  ;;  %3536 = vmatprep.subr.bf16.mxu0 %v4583_v41  ;;  %v1634_v40 = vld [vmem:[#allocation11 + $0x270] sm:$0xff]  ;;  %v1631_v41 = vld [vmem:[#allocation11 + $0x258] sm:$0xff] }
 0x335   : > { %v4629_v32 = vcombine.high %v1630_v47, %v1634_v40  ;;  %v4628_v38 = vcombine.low %v1630_v47, %v1634_v40  ;;  %v4630_v4 = vcombine.low %v1631_v41, %v1635_v6 }
 0x337   : > { %3391 = vmatpush1.bf16.msra.mxu1 %v4580_v20  ;;  %3537 = vmatpush1.bf16.msra.mxu0 %v4582_v33  ;;  %v1638_v20 = vld [vmem:[#allocation11 + $0x290] sm:$0xff] }
 0x338   : > { %3392 = vmatprep.subr.bf16.mxu1 %v4589_v61  ;;  %3538 = vmatprep.subr.bf16.mxu0 %v4591_v8  ;;  %v1642_v33 = vld [vmem:[#allocation11 + $0x2b0] sm:$0xff]  ;;  %v1639_v61 = vld [vmem:[#allocation11 + $0x298] sm:$0xff] }
 0x339   : > { %3218 = vmatmul.mubr.bf16.gmra.mrb[24].mxu1 %v6241_v60  ;;  %3364 = vmatmul.mubr.bf16.gmra.mrb[40].mxu0 %v6241_v60  ;;  %v1643_v8 = vld [vmem:[#allocation11 + $0x2b8] sm:$0xff]  ;;  %v4637_v5 = vcombine.high %v1638_v20, %v1642_v33  ;;  %v4636_v18 = vcombine.low %v1638_v20, %v1642_v33 }
 0x33a   : > { %3227 = vmatprep.mubr.bf16.mxu1 %v6276_v19  ;;  %3373 = vmatprep.mubr.bf16.mxu0 %v6276_v19  ;;  %v4639_v29 = vcombine.high %v1639_v61, %v1643_v8  ;;  %v4638_v31 = vcombine.low %v1639_v61, %v1643_v8 }
 0x33b   : > { %3393 = vmatpush1.bf16.msra.mxu1 %v4588_v55  ;;  %3539 = vmatpush1.bf16.msra.mxu0 %v4590_v16  ;;  %v1646_v55 = vld [vmem:[#allocation11 + $0x2d0] sm:$0xff] }
 0x33c   : > { %3394 = vmatprep.subr.bf16.mxu1 %v4597_v54  ;;  %3540 = vmatprep.subr.bf16.mxu0 %v4599_v11  ;;  %v1650_v16 = vld [vmem:[#allocation11 + $0x2f0] sm:$0xff]  ;;  %v1647_v54 = vld [vmem:[#allocation11 + $0x2d8] sm:$0xff] }
 0x33d   : > { %v1651_v11 = vld [vmem:[#allocation11 + $0x2f8] sm:$0xff]  ;;  %v4645_v2 = vcombine.high %v1646_v55, %v1650_v16  ;;  %v4644_v13 = vcombine.low %v1646_v55, %v1650_v16 }
 0x33e   : > { %v4647_v24 = vcombine.high %v1647_v54, %v1651_v11  ;;  %v4646_v21 = vcombine.low %v1647_v54, %v1651_v11 }
 0x33f   : > { %3395 = vmatpush1.bf16.msra.mxu1 %v4596_v35  ;;  %3541 = vmatpush1.bf16.msra.mxu0 %v4598_v57  ;;  %v1654_v35 = vld [vmem:[#allocation11 + $0x310] sm:$0xff] }
 0x340   : > { %3396 = vmatprep.subr.bf16.mxu1 %v4605_v3  ;;  %3542 = vmatprep.subr.bf16.mxu0 %v4607_v7  ;;  %v1658_v57 = vld [vmem:[#allocation11 + $0x330] sm:$0xff]  ;;  %v1655_v3 = vld [vmem:[#allocation11 + $0x318] sm:$0xff] }
 0x341   : > { %3228 = vmatmul.mubr.bf16.gmra.mrb[28].mxu1 %v6272_v48  ;;  %3374 = vmatmul.mubr.bf16.gmra.mrb[44].mxu0 %v6272_v48  ;;  %v1659_v7 = vld [vmem:[#allocation11 + $0x338] sm:$0xff]  ;;  %v4653_v27 = vcombine.high %v1654_v35, %v1658_v57  ;;  %v4652_v12 = vcombine.low %v1654_v35, %v1658_v57 }
 0x342   : > { %3416 = vmatprep.mubr.bf16.mxu1 %v6100_v43  ;;  %3562 = vmatprep.mubr.bf16.mxu0 %v6100_v43  ;;  %v4631_v43 = vcombine.high %v1631_v41, %v1635_v6  ;;  %v4655_v26 = vcombine.high %v1655_v3, %v1659_v7  ;;  %v4654_v36 = vcombine.low %v1655_v3, %v1659_v7 }
 0x343   : > { %3397 = vmatpush1.bf16.msra.mxu1 %v4604_v9  ;;  %3543 = vmatpush1.bf16.msra.mxu0 %v4606_v22  ;;  %v1662_v9 = vld [vmem:[#allocation11 + $0x350] sm:$0xff] }
 0x344   : > { %3398 = vmatprep.subr.bf16.mxu1 %v4613_v30  ;;  %3544 = vmatprep.subr.bf16.mxu0 %v4615_v37  ;;  %v1666_v22 = vld [vmem:[#allocation11 + $0x370] sm:$0xff]  ;;  %v1663_v30 = vld [vmem:[#allocation11 + $0x358] sm:$0xff] }
 0x345   : > { %v1667_v37 = vld [vmem:[#allocation11 + $0x378] sm:$0xff]  ;;  %v4661_v44 = vcombine.high %v1662_v9, %v1666_v22  ;;  %v4660_v47 = vcombine.low %v1662_v9, %v1666_v22 }
 0x346   : > { %v4663_v53 = vcombine.high %v1663_v30, %v1667_v37  ;;  %v4662_v40 = vcombine.low %v1663_v30, %v1667_v37 }
 0x347   : > { %3399 = vmatpush1.bf16.msra.mxu1 %v4612_v42  ;;  %3545 = vmatpush1.bf16.msra.mxu0 %v4614_v39  ;;  %v1670_v42 = vld [vmem:[#allocation11 + $0x390] sm:$0xff] }
 0x348   : > { %3400 = vmatprep.subr.bf16.mxu1 %v4621_v59  ;;  %3546 = vmatprep.subr.bf16.mxu0 %v4623_v34  ;;  %v1674_v39 = vld [vmem:[#allocation11 + $0x3b0] sm:$0xff]  ;;  %v1671_v59 = vld [vmem:[#allocation11 + $0x398] sm:$0xff] }
 0x349   : > { %v1675_v34 = vld [vmem:[#allocation11 + $0x3b8] sm:$0xff]  ;;  %v4669_v41 = vcombine.high %v1670_v42, %v1674_v39  ;;  %v4668_v20 = vcombine.low %v1670_v42, %v1674_v39 }
 0x34a   : > { %v4671_v6 = vcombine.high %v1671_v59, %v1675_v34  ;;  %v4670_v33 = vcombine.low %v1671_v59, %v1675_v34  ;;  %v1718_v59 = vld [vmem:[#allocation11 + $0x510] sm:$0xff] }
 0x34b   : > { %3401 = vmatpush1.bf16.msra.mxu1 %v4620_v58  ;;  %3547 = vmatpush1.bf16.msra.mxu0 %v4622_v0  ;;  %v1678_v58 = vld [vmem:[#allocation11 + $0x3d0] sm:$0xff] }
 0x34c   : > { %3402 = vmatprep.subr.bf16.mxu1 %v4629_v32  ;;  %3548 = vmatprep.subr.bf16.mxu0 %v4631_v43  ;;  %v1682_v0 = vld [vmem:[#allocation11 + $0x3f0] sm:$0xff]  ;;  %v1679_v32 = vld [vmem:[#allocation11 + $0x3d8] sm:$0xff] }
 0x34d   : > { %v1683_v43 = vld [vmem:[#allocation11 + $0x3f8] sm:$0xff]  ;;  %v4677_v61 = vcombine.high %v1678_v58, %v1682_v0  ;;  %v4676_v55 = vcombine.low %v1678_v58, %v1682_v0  ;;  %v1722_v34 = vld [vmem:[#allocation11 + $0x530] sm:$0xff] }
 0x34e   : > { %v4679_v8 = vcombine.high %v1679_v32, %v1683_v43  ;;  %v4678_v16 = vcombine.low %v1679_v32, %v1683_v43  ;;  %v4717_v58 = vcombine.high %v1718_v59, %v1722_v34  ;;  %v1726_v32 = vld [vmem:[#allocation11 + $0x550] sm:$0xff]  ;;  %v1727_v43 = vld [vmem:[#allocation11 + $0x558] sm:$0xff] }
 0x34f   : > { %3403 = vmatpush1.bf16.msra.mxu1 %v4628_v38  ;;  %3549 = vmatpush1.bf16.msra.mxu0 %v4630_v4  ;;  %v1686_v38 = vld [vmem:[#allocation11 + $0x410] sm:$0xff] }
 0x350   : > { %3404 = vmatprep.subr.bf16.mxu1 %v4637_v5  ;;  %3550 = vmatprep.subr.bf16.mxu0 %v4639_v29  ;;  %v1690_v4 = vld [vmem:[#allocation11 + $0x430] sm:$0xff]  ;;  %v1687_v5 = vld [vmem:[#allocation11 + $0x418] sm:$0xff] }
 0x351   : > { %v1691_v29 = vld [vmem:[#allocation11 + $0x438] sm:$0xff]  ;;  %v4685_v54 = vcombine.high %v1686_v38, %v1690_v4  ;;  %v4684_v35 = vcombine.low %v1686_v38, %v1690_v4  ;;  %v1734_v38 = vld [vmem:[#allocation11 + $0x590] sm:$0xff] }
 0x352   : > { %v6296_v11 = vcombine.high %v1687_v5, %v1691_v29  ;;  %v6298_v57 = vcombine.low %v1687_v5, %v1691_v29  ;;  %v1738_v4 = vld [vmem:[#allocation11 + $0x5b0] sm:$0xff]  ;;  %v1735_v5 = vld [vmem:[#allocation11 + $0x598] sm:$0xff] }
 0x353   : > { %3405 = vmatpush1.bf16.msra.mxu1 %v4636_v18  ;;  %3551 = vmatpush1.bf16.msra.mxu0 %v4638_v31  ;;  %v1694_v18 = vld [vmem:[#allocation11 + $0x450] sm:$0xff]  ;;  %v1739_v29 = vld [vmem:[#allocation11 + $0x5b8] sm:$0xff] }
 0x354   : > { %3406 = vmatprep.subr.bf16.mxu1 %v4645_v2  ;;  %3552 = vmatprep.subr.bf16.mxu0 %v4647_v24  ;;  %v1698_v31 = vld [vmem:[#allocation11 + $0x470] sm:$0xff]  ;;  %v1695_v2 = vld [vmem:[#allocation11 + $0x458] sm:$0xff] }
 0x355   : > { %v1699_v24 = vld [vmem:[#allocation11 + $0x478] sm:$0xff]  ;;  %v4693_v3 = vcombine.high %v1694_v18, %v1698_v31  ;;  %v4692_v9 = vcombine.low %v1694_v18, %v1698_v31  ;;  %v6343_v18 = vcombine.high %v1735_v5, %v1739_v29  ;;  %v1742_v31 = vld [vmem:[#allocation11 + $0x5d0] sm:$0xff] }
 0x356   : > { %v6301_v7 = vcombine.high %v1695_v2, %v1699_v24  ;;  %v6308_v22 = vcombine.low %v1695_v2, %v1699_v24  ;;  %v1743_v2 = vld [vmem:[#allocation11 + $0x5d8] sm:$0xff] }
 0x357   : > { %3407 = vmatpush1.bf16.msra.mxu1 %v4644_v13  ;;  %3553 = vmatpush1.bf16.msra.mxu0 %v4646_v21  ;;  %v1702_v13 = vld [vmem:[#allocation11 + $0x490] sm:$0xff]  ;;  %v1747_v24 = vld [vmem:[#allocation11 + $0x5f8] sm:$0xff] }
 0x358   : > { %3408 = vmatprep.subr.bf16.mxu1 %v4653_v27  ;;  %3554 = vmatprep.subr.bf16.mxu0 %v4655_v26  ;;  %v1706_v21 = vld [vmem:[#allocation11 + $0x4b0] sm:$0xff]  ;;  %v1703_v27 = vld [vmem:[#allocation11 + $0x498] sm:$0xff] }
 0x359   : > { %v1707_v26 = vld [vmem:[#allocation11 + $0x4b8] sm:$0xff]  ;;  %v4701_v30 = vcombine.high %v1702_v13, %v1706_v21 }
 0x35a   : > { %v6311_v37 = vcombine.high %v1703_v27, %v1707_v26 }
 0x35b   : > { %3409 = vmatpush1.bf16.msra.mxu1 %v4652_v12  ;;  %3555 = vmatpush1.bf16.msra.mxu0 %v4654_v36  ;;  %v1710_v12 = vld [vmem:[#allocation11 + $0x4d0] sm:$0xff]  ;;  %v1711_v36 = vld [vmem:[#allocation11 + $0x4d8] sm:$0xff] }
 0x35c   : > { %3410 = vmatprep.subr.bf16.mxu1 %v4661_v44  ;;  %3556 = vmatprep.subr.bf16.mxu0 %v4663_v53  ;;  %v1715_v44 = vld [vmem:[#allocation11 + $0x4f8] sm:$0xff]  ;;  %v4700_v53 = vcombine.low %v1702_v13, %v1706_v21  ;;  %v6349_v13 = vcombine.high %v1743_v2, %v1747_v24  ;;  %v1750_v21 = vld [vmem:[#allocation11 + $0x610] sm:$0xff] }
 0x35d   : > { %v6317_v39 = vcombine.high %v1711_v36, %v1715_v44 }
 0x35f   : > { %3411 = vmatpush1.bf16.msra.mxu1 %v4660_v47  ;;  %3557 = vmatpush1.bf16.msra.mxu0 %v4662_v40  ;;  %v1719_v47 = vld [vmem:[#allocation11 + $0x518] sm:$0xff] }
 0x360   : > { %3412 = vmatprep.subr.bf16.mxu1 %v4669_v41  ;;  %3558 = vmatprep.subr.bf16.mxu0 %v4671_v6  ;;  %v1723_v40 = vld [vmem:[#allocation11 + $0x538] sm:$0xff]  ;;  %v6324_v6 = vcombine.low %v1711_v36, %v1715_v44  ;;  %v1758_v44 = vld [vmem:[#allocation11 + $0x650] sm:$0xff] }
 0x361   : > { %v6327_v0 = vcombine.high %v1719_v47, %v1723_v40 }
 0x363   : > { %3413 = vmatpush1.bf16.msra.mxu1 %v4668_v20  ;;  %3559 = vmatpush1.bf16.msra.mxu0 %v4670_v33  ;;  %v1731_v20 = vld [vmem:[#allocation11 + $0x578] sm:$0xff]  ;;  %v4716_v33 = vcombine.low %v1718_v59, %v1722_v34 }
 0x364   : > { %3414 = vmatprep.subr.bf16.mxu1 %v4677_v61  ;;  %3560 = vmatprep.subr.bf16.mxu0 %v4679_v8  ;;  %v6333_v8 = vcombine.high %v1727_v43, %v1731_v20 }
 0x367   : > { %3415 = vmatpush1.bf16.msra.mxu1 %v4676_v55  ;;  %3561 = vmatpush1.bf16.msra.mxu0 %v4678_v16  ;;  %v6340_v16 = vcombine.low %v1727_v43, %v1731_v20 }
 0x368   : > { %3457 = vmatprep.subr.bf16.mxu1 %v4685_v54  ;;  %3603 = vmatprep.subr.bf16.mxu0 %v6296_v11  ;;  %v4733_v54 = vcombine.high %v1734_v38, %v1738_v4 }
 0x36a   : > { %3417 = vmatmul.mubr.bf16.vlgmr.msra.gmra.mrb[32].mxu1 %v6094_v62  ;;  %3563 = vmatmul.mubr.bf16.vlgmr.msra.gmra.mrb[48].mxu0 %v6094_v62  ;;  %v1714_v62 = vld [vmem:[#allocation11 + $0x4f0] sm:$0xff] }
 0x36b   : > { %3426 = vmatprep.mubr.bf16.mxu1 %v6156_v1  ;;  %3458 = vmatpush1.bf16.msra.mxu1 %v4684_v35  ;;  %v4709_v42 = vcombine.high %v1710_v12, %v1714_v62  ;;  %v4708_v41 = vcombine.low %v1710_v12, %v1714_v62  ;;  %v4732_v35 = vcombine.low %v1734_v38, %v1738_v4  ;;  %v1778_v38 = vld [vmem:[#allocation11 + $0x6f0] sm:$0xff]  ;;  %v1775_v4 = vld [vmem:[#allocation11 + $0x6d8] sm:$0xff] }
 0x36c   : > { %3572 = vmatprep.mubr.bf16.mxu0 %v6156_v1  ;;  %3604 = vmatpush1.bf16.msra.mxu0 %v6298_v57  ;;  %v6314_v1 = vcombine.low %v1703_v27, %v1707_v26  ;;  %v1754_v27 = vld [vmem:[#allocation11 + $0x630] sm:$0xff]  ;;  %v1751_v26 = vld [vmem:[#allocation11 + $0x618] sm:$0xff]  ;;  %v6356_v12 = vcombine.low %v1743_v2, %v1747_v24 }
 0x36d   : > { %3459 = vmatprep.subr.bf16.mxu1 %v4693_v3  ;;  %3605 = vmatprep.subr.bf16.mxu0 %v6301_v7  ;;  %v4749_v62 = vcombine.high %v1750_v21, %v1754_v27  ;;  %v4748_v59 = vcombine.low %v1750_v21, %v1754_v27  ;;  %v1786_v2 = vld [vmem:[#allocation11 + $0x730] sm:$0xff]  ;;  %v1783_v24 = vld [vmem:[#allocation11 + $0x718] sm:$0xff] }
 0x36f   : > { %3460 = vmatpush1.bf16.msra.mxu1 %v4692_v9  ;;  %v1755_v9 = vld [vmem:[#allocation11 + $0x638] sm:$0xff] }
 0x370   : > { %3606 = vmatpush1.bf16.msra.mxu0 %v6308_v22  ;;  %3461 = vmatprep.subr.bf16.mxu1 %v4701_v30  ;;  %v6359_v36 = vcombine.high %v1751_v26, %v1755_v9  ;;  %v6362_v34 = vcombine.low %v1751_v26, %v1755_v9  ;;  %v1790_v9 = vld [vmem:[#allocation11 + $0x750] sm:$0xff] }
 0x371   : > { %3607 = vmatprep.subr.bf16.mxu0 %v6311_v37 }
 0x372   : > { %3427 = vmatmul.mubr.bf16.gmra.mrb[36].mxu1 %v6150_v45  ;;  %3573 = vmatmul.mubr.bf16.gmra.mrb[52].mxu0 %v6150_v45  ;;  %v1730_v45 = vld [vmem:[#allocation11 + $0x570] sm:$0xff] }
 0x373   : > { %3436 = vmatprep.mubr.bf16.mxu1 %v6222_v23  ;;  %3462 = vmatpush1.bf16.msra.mxu1 %v4700_v53  ;;  %v4725_v61 = vcombine.high %v1726_v32, %v1730_v45  ;;  %v4724_v55 = vcombine.low %v1726_v32, %v1730_v45  ;;  %v1759_v53 = vld [vmem:[#allocation11 + $0x658] sm:$0xff] }
 0x374   : > { %3582 = vmatprep.mubr.bf16.mxu0 %v6222_v23  ;;  %3608 = vmatpush1.bf16.msra.mxu0 %v6314_v1  ;;  %v6330_v23 = vcombine.low %v1719_v47, %v1723_v40  ;;  %v1766_v40 = vld [vmem:[#allocation11 + $0x690] sm:$0xff]  ;;  %v1771_v32 = vld [vmem:[#allocation11 + $0x6b8] sm:$0xff] }
 0x375   : > { %3463 = vmatprep.subr.bf16.mxu1 %v4709_v42  ;;  %3609 = vmatprep.subr.bf16.mxu0 %v6317_v39  ;;  %v1763_v42 = vld [vmem:[#allocation11 + $0x678] sm:$0xff] }
 0x376   : > { %v6365_v47 = vcombine.high %v1759_v53, %v1763_v42  ;;  %v6368_v43 = vcombine.low %v1759_v53, %v1763_v42 }
 0x377   : > { %3464 = vmatpush1.bf16.msra.mxu1 %v4708_v41  ;;  %v1770_v41 = vld [vmem:[#allocation11 + $0x6b0] sm:$0xff] }
 0x378   : > { %3610 = vmatpush1.bf16.msra.mxu0 %v6324_v6  ;;  %3465 = vmatprep.subr.bf16.mxu1 %v4717_v58  ;;  %v1767_v58 = vld [vmem:[#allocation11 + $0x698] sm:$0xff]  ;;  %v4765_v20 = vcombine.high %v1766_v40, %v1770_v41 }
 0x379   : > { %3611 = vmatprep.subr.bf16.mxu0 %v6327_v0 }
 0x37a   : > { %3437 = vmatmul.mubr.bf16.gmra.mrb[40].mxu1 %v6218_v14  ;;  %3583 = vmatmul.mubr.bf16.gmra.mrb[56].mxu0 %v6218_v14  ;;  %v1746_v14 = vld [vmem:[#allocation11 + $0x5f0] sm:$0xff] }
 0x37b   : > { %3446 = vmatprep.mubr.bf16.mxu1 %v6265_v28  ;;  %3466 = vmatpush1.bf16.msra.mxu1 %v4716_v33  ;;  %v4741_v3 = vcombine.high %v1742_v31, %v1746_v14  ;;  %v4740_v30 = vcombine.low %v1742_v31, %v1746_v14  ;;  %v6371_v33 = vcombine.high %v1767_v58, %v1771_v32  ;;  %v1782_v14 = vld [vmem:[#allocation11 + $0x710] sm:$0xff] }
 0x37c   : > { %3592 = vmatprep.mubr.bf16.mxu0 %v6265_v28  ;;  %3612 = vmatpush1.bf16.msra.mxu0 %v6330_v23  ;;  %v6346_v28 = vcombine.low %v1735_v5, %v1739_v29  ;;  %v1779_v5 = vld [vmem:[#allocation11 + $0x6f8] sm:$0xff]  ;;  %v4764_v29 = vcombine.low %v1766_v40, %v1770_v41  ;;  %v4781_v27 = vcombine.high %v1782_v14, %v1786_v2  ;;  %v1802_v40 = vld [vmem:[#allocation11 + $0x7b0] sm:$0xff] }
 0x37d   : > { %3467 = vmatprep.subr.bf16.mxu1 %v4725_v61  ;;  %3613 = vmatprep.subr.bf16.mxu0 %v6333_v8  ;;  %v1774_v61 = vld [vmem:[#allocation11 + $0x6d0] sm:$0xff]  ;;  %v6377_v31 = vcombine.high %v1775_v4, %v1779_v5  ;;  %v6380_v21 = vcombine.low %v1775_v4, %v1779_v5  ;;  %v1799_v41 = vld [vmem:[#allocation11 + $0x798] sm:$0xff] }
 0x37e   : > { %v1810_v4 = vld [vmem:[#allocation11 + $0x7f0] sm:$0xff]  ;;  %v1807_v5 = vld [vmem:[#allocation11 + $0x7d8] sm:$0xff] }
 0x37f   : > { %3468 = vmatpush1.bf16.msra.mxu1 %v4724_v55  ;;  %v6374_v55 = vcombine.low %v1767_v58, %v1771_v32  ;;  %v1803_v58 = vld [vmem:[#allocation11 + $0x7b8] sm:$0xff] }
 0x380   : > { %3614 = vmatpush1.bf16.msra.mxu0 %v6340_v16  ;;  %3469 = vmatprep.subr.bf16.mxu1 %v4733_v54  ;;  %v4773_v54 = vcombine.high %v1774_v61, %v1778_v38 }
 0x381   : > { %3615 = vmatprep.subr.bf16.mxu0 %v6343_v18 }
 0x382   : > { %3447 = vmatmul.mubr.bf16.gmra.mrb[44].mxu1 %v6262_v56  ;;  %3593 = vmatmul.mubr.bf16.gmra.mrb[60].mxu0 %v6262_v56  ;;  %v1762_v56 = vld [vmem:[#allocation11 + $0x670] sm:$0xff] }
 0x383   : > { %3470 = vmatpush1.bf16.msra.mxu1 %v4732_v35  ;;  %3489 = vmatprep.mubr.bf16.mxu1 %v6102_v46  ;;  %v4756_v45 = vcombine.low %v1758_v44, %v1762_v56  ;;  %v1787_v35 = vld [vmem:[#allocation11 + $0x738] sm:$0xff] }
 0x384   : > { %3616 = vmatpush1.bf16.msra.mxu0 %v6346_v28  ;;  %3635 = vmatprep.mubr.bf16.mxu0 %v6102_v46  ;;  %v4757_v46 = vcombine.high %v1758_v44, %v1762_v56  ;;  %v6383_v26 = vcombine.high %v1783_v24, %v1787_v35  ;;  %v1795_v44 = vld [vmem:[#allocation11 + $0x778] sm:$0xff]  ;;  %v4780_v56 = vcombine.low %v1782_v14, %v1786_v2 }
 0x385   : > { %3471 = vmatprep.subr.bf16.mxu1 %v4741_v3  ;;  %3617 = vmatprep.subr.bf16.mxu0 %v6349_v13  ;;  %v4772_v3 = vcombine.low %v1774_v61, %v1778_v38  ;;  %v6386_v53 = vcombine.low %v1783_v24, %v1787_v35  ;;  %v4799_v61 = vcombine.high %v1799_v41, %v1803_v58  ;;  %v1806_v38 = vld [vmem:[#allocation11 + $0x7d0] sm:$0xff] }
 0x386   : > { %v4798_v14 = vcombine.low %v1799_v41, %v1803_v58  ;;  %v4805_v2 = vcombine.high %v1806_v38, %v1810_v4  ;;  %v4804_v35 = vcombine.low %v1806_v38, %v1810_v4 }
 0x387   : > { %3472 = vmatpush1.bf16.msra.mxu1 %v4740_v30  ;;  %v1794_v30 = vld [vmem:[#allocation11 + $0x770] sm:$0xff] }
 0x388   : > { %3618 = vmatpush1.bf16.msra.mxu0 %v6356_v12  ;;  %3473 = vmatprep.subr.bf16.mxu1 %v4749_v62  ;;  %v1791_v62 = vld [vmem:[#allocation11 + $0x758] sm:$0xff]  ;;  %v4789_v42 = vcombine.high %v1790_v9, %v1794_v30  ;;  %v4788_v32 = vcombine.low %v1790_v9, %v1794_v30 }
 0x389   : > { %3619 = vmatprep.subr.bf16.mxu0 %v6359_v36 }
 0x38b   : > { %3474 = vmatpush1.bf16.msra.mxu1 %v4748_v59  ;;  %v6389_v59 = vcombine.high %v1791_v62, %v1795_v44 }
 0x38c   : > { %3620 = vmatpush1.bf16.msra.mxu0 %v6362_v34  ;;  %3475 = vmatprep.subr.bf16.mxu1 %v4757_v46  ;;  %v1798_v46 = vld [vmem:[#allocation11 + $0x790] sm:$0xff] }
 0x38d   : > { %3621 = vmatprep.subr.bf16.mxu0 %v6365_v47 }
 0x38f   : > { %3476 = vmatpush1.bf16.msra.mxu1 %v4756_v45  ;;  %v4790_v45 = vcombine.low %v1791_v62, %v1795_v44 }
 0x390   : > { %3622 = vmatpush1.bf16.msra.mxu0 %v6368_v43  ;;  %3477 = vmatprep.subr.bf16.mxu1 %v4765_v20  ;;  %v4797_v20 = vcombine.high %v1798_v46, %v1802_v40 }
 0x391   : > { %3623 = vmatprep.subr.bf16.mxu0 %v6371_v33 }
 0x393   : > { %3478 = vmatpush1.bf16.msra.mxu1 %v4764_v29  ;;  %v1811_v29 = vld [vmem:[#allocation11 + $0x7f8] sm:$0xff] }
 0x394   : > { %3624 = vmatpush1.bf16.msra.mxu0 %v6374_v55  ;;  %3479 = vmatprep.subr.bf16.mxu1 %v4773_v54  ;;  %v4796_v54 = vcombine.low %v1798_v46, %v1802_v40  ;;  %v4807_v24 = vcombine.high %v1807_v5, %v1811_v29 }
 0x395   : > { %3625 = vmatprep.subr.bf16.mxu0 %v6377_v31 }
 0x397   : > { %3480 = vmatpush1.bf16.msra.mxu1 %v4772_v3  ;;  %v4806_v3 = vcombine.low %v1807_v5, %v1811_v29 }
 0x398   : > { %3626 = vmatpush1.bf16.msra.mxu0 %v6380_v21  ;;  %3481 = vmatprep.subr.bf16.mxu1 %v4781_v27 }
 0x399   : > { %3627 = vmatprep.subr.bf16.mxu0 %v6383_v26 }
 0x39b   : > { %3482 = vmatpush1.bf16.msra.mxu1 %v4780_v56 }
 0x39c   : > { %3628 = vmatpush1.bf16.msra.mxu0 %v6386_v53  ;;  %3483 = vmatprep.subr.bf16.mxu1 %v4789_v42 }
 0x39d   : > { %3629 = vmatprep.subr.bf16.mxu0 %v6389_v59 }
 0x39f   : > { %3484 = vmatpush1.bf16.msra.mxu1 %v4788_v32 }
 0x3a0   : > { %3630 = vmatpush1.bf16.msra.mxu0 %v4790_v45  ;;  %3485 = vmatprep.subr.bf16.mxu1 %v4797_v20 }
 0x3a1   : > { %3631 = vmatprep.subr.bf16.mxu0 %v4799_v61 }
 0x3a3   : > { %3486 = vmatpush1.bf16.msra.mxu1 %v4796_v54 }
 0x3a4   : > { %3632 = vmatpush1.bf16.msra.mxu0 %v4798_v14  ;;  %3487 = vmatprep.subr.bf16.mxu1 %v4805_v2 }
 0x3a5   : > { %3633 = vmatprep.subr.bf16.mxu0 %v4807_v24 }
 0x3a7   : > { %3488 = vmatpush1.bf16.msra.mxu1 %v4804_v35 }
 0x3a8   : > { %3634 = vmatpush1.bf16.msra.mxu0 %v4806_v3  ;;  %4819 = vmatprep.subr.bf16.mxu1 %v6296_v11  ;;  %v3956_v11 = vadd.s32 24, %v5925_v49 }
 0x3aa   : > { %3490 = vmatmul.mubr.bf16.vlgmr.msra.gmra.mrb[32].mxu1 %v6096_v63 }
 0x3ab   : > { %3636 = vmatmul.mubr.bf16.vlgmr.msra.gmra.mrb[48].mxu0 %v6096_v63  ;;  %3499 = vmatprep.mubr.bf16.mxu1 %v6189_v10  ;;  %v3954_v63 = vadd.s32 8, %v5925_v49 }
 0x3ac   : > { %4835 = vmatpush1.bf16.msra.mxu1 %v6298_v57  ;;  %3645 = vmatprep.mubr.bf16.mxu0 %v6189_v10  ;;  %v6439_v10 = vld [vmem:[%s6991_s16] sm:$0xff] }
 0x3ad   : > { %4820 = vmatprep.subr.bf16.mxu1 %v6301_v7  ;;  %v6455_v57 = vrot.slane %v6439_v10, %v5928_v50  ;;  %v6459_v7 = vrot.slane %v6439_v10, %v6000_v15 }
 0x3b0   : > { %4836 = vmatpush1.bf16.msra.mxu1 %v6308_v22  ;;  %v3957_v22 = vadd.s32 32, %v5925_v49 }
 0x3b1   : > { %4821 = vmatprep.subr.bf16.mxu1 %v6311_v37  ;;  %v3958_v37 = vadd.s32 40, %v5925_v49 }
 0x3b2   : > { %3500 = vmatmul.mubr.bf16.gmra.mrb[36].mxu1 %v6153_v51 }
 0x3b3   : > { %3646 = vmatmul.mubr.bf16.gmra.mrb[52].mxu0 %v6153_v51  ;;  %3509 = vmatprep.mubr.bf16.mxu1 %v6248_v25  ;;  %v3962_v51 = vstv %s4808_s28 }
 0x3b4   : > { %4837 = vmatpush1.bf16.msra.mxu1 %v6314_v1  ;;  %v6465_v1 = vrot.slane %v6439_v10, %v5934_v52 }
 0x3b5   : > { %4822 = vmatprep.subr.bf16.mxu1 %v6317_v39  ;;  %v6469_v39 = vrot.slane %v6439_v10, %v6003_v17 }
 0x3b8   : > { %4838 = vmatpush1.bf16.msra.mxu1 %v6324_v6  ;;  %v3959_v6 = vadd.s32 48, %v5925_v49 }
 0x3b9   : > { %4823 = vmatprep.subr.bf16.mxu1 %v6327_v0  ;;  %v3960_v0 = vadd.s32 56, %v5925_v49 }
 0x3ba   : > { %3510 = vmatmul.mubr.bf16.gmra.mrb[40].mxu1 %v6241_v60 }
 0x3bb   : > { %3519 = vmatprep.mubr.bf16.mxu1 %v6276_v19  ;;  %v6505_v27 = vadd.s32 %v3962_v51, %v3960_v0 }
 0x3bc   : > { %4839 = vmatpush1.bf16.msra.mxu1 %v6330_v23 }
 0x3bd   : > { %4824 = vmatprep.subr.bf16.mxu1 %v6333_v8  ;;  %vm3978_vm7 = vcmp.lt.s32.totalorder %v6505_v27, 96  ;;  %v5547_v27 = vmov (!%p4809_p9), 1966171168  }
 0x3c0   : > { %4840 = vmatpush1.bf16.msra.mxu1 %v6340_v16 }
 0x3c1   : > { %4825 = vmatprep.subr.bf16.mxu1 %v6343_v18 }
 0x3c2   : > { %3520 = vmatmul.mubr.bf16.gmra.mrb[44].mxu1 %v6272_v48 }
 0x3c3   : > { %3655 = vmatprep.mubr.bf16.mxu1 %v6248_v25  ;;  %v6444_v25 = vld [vmem:[%s6992_s29] sm:$0xff] }
 0x3c4   : > { %4841 = vmatpush1.bf16.msra.mxu1 %v6346_v28  ;;  %v6475_v23 = vrot.slane %v6444_v25, %v5928_v50  ;;  %v6479_v8 = vrot.slane %v6444_v25, %v6000_v15  ;;  %v6483_v16 = vrot.slane %v6444_v25, %v5934_v52  ;;  %v6487_v18 = vrot.slane %v6444_v25, %v6003_v17 }
 0x3c5   : > { %4826 = vmatprep.subr.bf16.mxu1 %v6349_v13  ;;  %v6499_v17 = vadd.s32 %v3962_v51, %v3958_v37 }
 0x3c7   : > { %vm3976_vm5 = vcmp.lt.s32.totalorder %v6499_v17, 96 }
 0x3c8   : > { %4842 = vmatpush1.bf16.msra.mxu1 %v6356_v12  ;;  %v6493_v12 = vadd.s32 %v3962_v51, %v3956_v11 }
 0x3c9   : > { %4827 = vmatprep.subr.bf16.mxu1 %v6359_v36 }
 0x3ca   : > { %vm3974_vm3 = vcmp.lt.s32.totalorder %v6493_v12, 96 }
 0x3cc   : > { %4843 = vmatpush1.bf16.msra.mxu1 %v6362_v34 }
 0x3cd   : > { %4828 = vmatprep.subr.bf16.mxu1 %v6365_v47  ;;  %v6497_v47 = vadd.s32 %v3962_v51, %v3957_v22 }
 0x3cf   : > { %vm3975_vm4 = vcmp.lt.s32.totalorder %v6497_v47, 96 }
 0x3d0   : > { %4844 = vmatpush1.bf16.msra.mxu1 %v6368_v43 }
 0x3d1   : > { %4829 = vmatprep.subr.bf16.mxu1 %v6371_v33 }
 0x3d4   : > { %4845 = vmatpush1.bf16.msra.mxu1 %v6374_v55 }
 0x3d5   : > { %4830 = vmatprep.subr.bf16.mxu1 %v6377_v31 }
 0x3d8   : > { %4846 = vmatpush1.bf16.msra.mxu1 %v6380_v21  ;;  %v6503_v21 = vadd.s32 %v3962_v51, %v3959_v6 }
 0x3d9   : > { %4831 = vmatprep.subr.bf16.mxu1 %v6383_v26 }
 0x3da   : > { %vm3977_vm6 = vcmp.lt.s32.totalorder %v6503_v21, 96 }
 0x3dc   : > { %4847 = vmatpush1.bf16.msra.mxu1 %v6386_v53 }
 0x3dd   : > { %4832 = vmatprep.subr.bf16.mxu1 %v6389_v59 }
 0x3e0   : > { %4848 = vmatpush1.bf16.msra.mxu1 %v4790_v45 }
 0x3e1   : > { %4833 = vmatprep.subr.bf16.mxu1 %v4799_v61 }
 0x3e4   : > { %4849 = vmatpush1.bf16.msra.mxu1 %v4798_v14 }
 0x3e5   : > { %4834 = vmatprep.subr.bf16.mxu1 %v4807_v24 }
 0x3e8   : > { %4850 = vmatpush1.bf16.msra.mxu1 %v4806_v3 }
 0x3eb   : > { %3656 = vmatmul.mubr.bf16.vlgmr.msra.gmra.mrb[48].mxu1 %v6241_v60  ;;  %v6447_v60 = vadd.s32 %v3962_v51, %v5925_v49 }
 0x3ec   : > { %3665 = vmatprep.mubr.bf16.mxu1 %v6276_v19  ;;  %v6449_v19 = vadd.s32 %v3962_v51, %v3954_v63 }
 0x3ed   : > { %vm3971_vm0 = vcmp.lt.s32.totalorder %v6447_v60, 96 }
 0x3ee   : > { %vm3972_vm1 = vcmp.lt.s32.totalorder %v6449_v19, 96 }
 0x3f3   : > { %3666 = vmatmul.mubr.bf16.gmra.mrb[52].mxu1 %v6272_v48  ;;  %v3955_v48 = vadd.s32 16, %v5925_v49 }
 0x3f5   : > { %v6491_v50 = vadd.s32 %v3962_v51, %v3955_v48 }
 0x3f7   : > { %vm3973_vm2 = vcmp.lt.s32.totalorder %v6491_v50, 96 }
 0x3fc   : > { %v3199_v28 = vpop.f32.mrb[16].mxu1  ;;  %v3345_v13 = vpop.f32.mrb[32].mxu0 }
 0x3fd   : > { %v3718_v15 = vmul.f32 %v6455_v57, %v3199_v28  ;;  %v3720_v36 = vmul.f32 %v6459_v7, %v3345_v13  ;;  %v3201_v52 = vpop.f32.mrb[17].mxu1  ;;  %v3347_v34 = vpop.f32.mrb[33].mxu0 }
 0x3fe   : > { %v3719_v43 = vmul.f32 %v6465_v1, %v3201_v52  ;;  %v3721_v33 = vmul.f32 %v6469_v39, %v3347_v34  ;;  %v3203_v55 = vpop.f32.mrb[18].mxu1  ;;  %v3349_v31 = vpop.f32.mrb[34].mxu0 }
 0x3ff   : > { %v3824_v26 = vadd.f32 %v6475_v23, %v3718_v15  ;;  %v3826_v9 = vadd.f32 %v6479_v8, %v3720_v36  ;;  %v3726_v30 = vmul.f32 %v6455_v57, %v3203_v55  ;;  %v3728_v62 = vmul.f32 %v6459_v7, %v3349_v31  ;;  %v3205_v44 = vpop.f32.mrb[19].mxu1  ;;  %v3351_v56 = vpop.f32.mrb[35].mxu0 }
 0x400   : > { %v3825_v53 = vadd.f32 %v6483_v16, %v3719_v43  ;;  %v3827_v42 = vadd.f32 %v6487_v18, %v3721_v33  ;;  %v3727_v59 = vmul.f32 %v6465_v1, %v3205_v44  ;;  %v3729_v46 = vmul.f32 %v6469_v39, %v3351_v56 }
 0x401   : > { %v3888_v40 = vmax.f32 %v3824_v26, 0.0  ;;  %v3890_v41 = vmax.f32 %v3826_v9, 0.0  ;;  %v3832_v58 = vadd.f32 %v6475_v23, %v3726_v30  ;;  %v3834_v32 = vadd.f32 %v6479_v8, %v3728_v62 }
 0x402   : > { %v3889_v45 = vmax.f32 %v3825_v53, 0.0  ;;  %v3891_v20 = vmax.f32 %v3827_v42, 0.0  ;;  %v3833_v61 = vadd.f32 %v6483_v16, %v3727_v59  ;;  %v3835_v38 = vadd.f32 %v6487_v18, %v3729_v46 }
 0x403   : > { %v3979_v4 = vsel %vm3971_vm0, %v3888_v40, 0.0  ;;  %v3981_v5 = vsel %vm3971_vm0, %v3890_v41, 0.0  ;;  %v3896_v29 = vmax.f32 %v3832_v58, 0.0  ;;  %v3898_v54 = vmax.f32 %v3834_v32, 0.0 }
 0x404   : > { %v3980_v14 = vsel %vm3971_vm0, %v3889_v45, 0.0  ;;  %v3982_v2 = vsel %vm3971_vm0, %v3891_v20, 0.0  ;;  %v3897_v24 = vmax.f32 %v3833_v61, 0.0  ;;  %v3899_v35 = vmax.f32 %v3835_v38, 0.0  ;;  %v3209_v3 = vpop.f32.mrb[20].mxu1  ;;  %v3355_v63 = vpop.f32.mrb[36].mxu0 }
 0x405   : > { %v3987_v51 = vsel %vm3972_vm1, %v3896_v29, 0.0  ;;  %v3989_v48 = vsel %vm3972_vm1, %v3898_v54, 0.0  ;;  %v3734_v11 = vmul.f32 %v6455_v57, %v3209_v3  ;;  %v3736_v22 = vmul.f32 %v6459_v7, %v3355_v63  ;;  %v3211_v37 = vpop.f32.mrb[21].mxu1  ;;  %v3357_v6 = vpop.f32.mrb[37].mxu0 }
 0x406   : > { %v4043_v0 = vmax.f32 %v3979_v4, %v3987_v51  ;;  %v4069_v28 = vmax.f32 %v3981_v5, %v3989_v48  ;;  %v3988_v13 = vsel %vm3972_vm1, %v3897_v24, 0.0  ;;  %v3990_v15 = vsel %vm3972_vm1, %v3899_v35, 0.0  ;;  %v3213_v36 = vpop.f32.mrb[22].mxu1  ;;  %v3359_v52 = vpop.f32.mrb[38].mxu0 }
 0x407   : > { %v4056_v34 = vmax.f32 %v3980_v14, %v3988_v13  ;;  %v4082_v43 = vmax.f32 %v3982_v2, %v3990_v15  ;;  %v3840_v33 = vadd.f32 %v6475_v23, %v3734_v11  ;;  %v3842_v55 = vadd.f32 %v6479_v8, %v3736_v22  ;;  %v3215_v31 = vpop.f32.mrb[23].mxu1  ;;  %v3361_v26 = vpop.f32.mrb[39].mxu0 }
 0x408   : > { %v3735_v9 = vmul.f32 %v6465_v1, %v3211_v37  ;;  %v3737_v30 = vmul.f32 %v6469_v39, %v3357_v6  ;;  %v3742_v62 = vmul.f32 %v6455_v57, %v3213_v36  ;;  %v3744_v44 = vmul.f32 %v6459_v7, %v3359_v52 }
 0x409   : > { %v3904_v56 = vmax.f32 %v3840_v33, 0.0  ;;  %v3906_v53 = vmax.f32 %v3842_v55, 0.0  ;;  %v3743_v42 = vmul.f32 %v6465_v1, %v3215_v31  ;;  %v3745_v59 = vmul.f32 %v6469_v39, %v3361_v26 }
 0x40a   : > { %v3841_v46 = vadd.f32 %v6483_v16, %v3735_v9  ;;  %v3843_v40 = vadd.f32 %v6487_v18, %v3737_v30  ;;  %v3848_v41 = vadd.f32 %v6475_v23, %v3742_v62  ;;  %v3850_v58 = vadd.f32 %v6479_v8, %v3744_v44 }
 0x40b   : > { %v3995_v32 = vsel %vm3973_vm2, %v3904_v56, 0.0  ;;  %v3997_v45 = vsel %vm3973_vm2, %v3906_v53, 0.0  ;;  %v3849_v20 = vadd.f32 %v6483_v16, %v3743_v42  ;;  %v3851_v61 = vadd.f32 %v6487_v18, %v3745_v59 }
 0x40c   : > { %v4044_v38 = vmax.f32 %v4043_v0, %v3995_v32  ;;  %v4070_v4 = vmax.f32 %v4069_v28, %v3997_v45  ;;  %v3905_v5 = vmax.f32 %v3841_v46, 0.0  ;;  %v3907_v29 = vmax.f32 %v3843_v40, 0.0  ;;  %v3219_v54 = vpop.f32.mrb[24].mxu1  ;;  %v3365_v14 = vpop.f32.mrb[40].mxu0 }
 0x40d   : > { %v3912_v2 = vmax.f32 %v3848_v41, 0.0  ;;  %v3914_v24 = vmax.f32 %v3850_v58, 0.0  ;;  %v3913_v35 = vmax.f32 %v3849_v20, 0.0  ;;  %v3915_v3 = vmax.f32 %v3851_v61, 0.0  ;;  %v3221_v63 = vpop.f32.mrb[25].mxu1  ;;  %v3367_v51 = vpop.f32.mrb[41].mxu0 }
 0x40e   : > { %v3996_v48 = vsel %vm3973_vm2, %v3905_v5, 0.0  ;;  %v3998_v11 = vsel %vm3973_vm2, %v3907_v29, 0.0  ;;  %v3750_v22 = vmul.f32 %v6455_v57, %v3219_v54  ;;  %v3752_v37 = vmul.f32 %v6459_v7, %v3365_v14  ;;  %v3223_v6 = vpop.f32.mrb[26].mxu1  ;;  %v3369_v0 = vpop.f32.mrb[42].mxu0 }
 0x40f   : > { %v4057_v28 = vmax.f32 %v4056_v34, %v3996_v48  ;;  %v4083_v13 = vmax.f32 %v4082_v43, %v3998_v11  ;;  %v4003_v15 = vsel %vm3974_vm3, %v3912_v2, 0.0  ;;  %v4005_v36 = vsel %vm3974_vm3, %v3914_v24, 0.0  ;;  %v3225_v52 = vpop.f32.mrb[27].mxu1  ;;  %v3371_v33 = vpop.f32.mrb[43].mxu0 }
 0x410   : > { %v4045_v55 = vmax.f32 %v4044_v38, %v4003_v15  ;;  %v4071_v31 = vmax.f32 %v4070_v4, %v4005_v36  ;;  %v4004_v26 = vsel %vm3974_vm3, %v3913_v35, 0.0  ;;  %v4006_v9 = vsel %vm3974_vm3, %v3915_v3, 0.0 }
 0x411   : > { %v4058_v30 = vmax.f32 %v4057_v28, %v4004_v26  ;;  %v4084_v62 = vmax.f32 %v4083_v13, %v4006_v9  ;;  %v3856_v34 = vadd.f32 %v6475_v23, %v3750_v22  ;;  %v3858_v43 = vadd.f32 %v6479_v8, %v3752_v37 }
 0x412   : > { %v3751_v44 = vmul.f32 %v6465_v1, %v3221_v63  ;;  %v3753_v56 = vmul.f32 %v6469_v39, %v3367_v51  ;;  %v3758_v53 = vmul.f32 %v6455_v57, %v3223_v6  ;;  %v3760_v42 = vmul.f32 %v6459_v7, %v3369_v0 }
 0x413   : > { %v3920_v59 = vmax.f32 %v3856_v34, 0.0  ;;  %v3922_v46 = vmax.f32 %v3858_v43, 0.0  ;;  %v3759_v40 = vmul.f32 %v6465_v1, %v3225_v52  ;;  %v3761_v41 = vmul.f32 %v6469_v39, %v3371_v33 }
 0x414   : > { %v3857_v58 = vadd.f32 %v6483_v16, %v3751_v44  ;;  %v3859_v32 = vadd.f32 %v6487_v18, %v3753_v56  ;;  %v3864_v45 = vadd.f32 %v6475_v23, %v3758_v53  ;;  %v3866_v20 = vadd.f32 %v6479_v8, %v3760_v42  ;;  %v3229_v61 = vpop.f32.mrb[28].mxu1  ;;  %v3375_v38 = vpop.f32.mrb[44].mxu0 }
 0x415   : > { %v4011_v4 = vsel %vm3975_vm4, %v3920_v59, 0.0  ;;  %v4013_v5 = vsel %vm3975_vm4, %v3922_v46, 0.0  ;;  %v3865_v29 = vadd.f32 %v6483_v16, %v3759_v40  ;;  %v3867_v54 = vadd.f32 %v6487_v18, %v3761_v41  ;;  %v3231_v14 = vpop.f32.mrb[29].mxu1  ;;  %v3377_v2 = vpop.f32.mrb[45].mxu0 }
 0x416   : > { %v4046_v24 = vmax.f32 %v4045_v55, %v4011_v4  ;;  %v4072_v35 = vmax.f32 %v4071_v31, %v4013_v5  ;;  %v3921_v3 = vmax.f32 %v3857_v58, 0.0  ;;  %v3923_v63 = vmax.f32 %v3859_v32, 0.0  ;;  %v3233_v51 = vpop.f32.mrb[30].mxu1  ;;  %v3379_v48 = vpop.f32.mrb[46].mxu0 }
 0x417   : > { %v3928_v11 = vmax.f32 %v3864_v45, 0.0  ;;  %v3930_v22 = vmax.f32 %v3866_v20, 0.0  ;;  %v3929_v37 = vmax.f32 %v3865_v29, 0.0  ;;  %v3931_v6 = vmax.f32 %v3867_v54, 0.0  ;;  %v3235_v0 = vpop.f32.mrb[31].mxu1  ;;  %v3381_v28 = vpop.f32.mrb[47].mxu0 }
 0x418   : > { %v4012_v13 = vsel %vm3975_vm4, %v3921_v3, 0.0  ;;  %v4014_v15 = vsel %vm3975_vm4, %v3923_v63, 0.0  ;;  %v3766_v36 = vmul.f32 %v6455_v57, %v3229_v61  ;;  %v3768_v52 = vmul.f32 %v6459_v7, %v3375_v38 }
 0x419   : > { %v4059_v33 = vmax.f32 %v4058_v30, %v4012_v13  ;;  %v4085_v55 = vmax.f32 %v4084_v62, %v4014_v15  ;;  %v4019_v31 = vsel %vm3976_vm5, %v3928_v11, 0.0  ;;  %v4021_v26 = vsel %vm3976_vm5, %v3930_v22, 0.0 }
 0x41a   : > { %v4047_v9 = vmax.f32 %v4046_v24, %v4019_v31  ;;  %v4073_v34 = vmax.f32 %v4072_v35, %v4021_v26  ;;  %v4020_v43 = vsel %vm3976_vm5, %v3929_v37, 0.0  ;;  %v4022_v44 = vsel %vm3976_vm5, %v3931_v6, 0.0 }
 0x41b   : > { %v4060_v56 = vmax.f32 %v4059_v33, %v4020_v43  ;;  %v4086_v53 = vmax.f32 %v4085_v55, %v4022_v44  ;;  %v3872_v42 = vadd.f32 %v6475_v23, %v3766_v36  ;;  %v3874_v30 = vadd.f32 %v6479_v8, %v3768_v52 }
 0x41c   : > { %v3767_v62 = vmul.f32 %v6465_v1, %v3231_v14  ;;  %v3769_v59 = vmul.f32 %v6469_v39, %v3377_v2  ;;  %v3774_v46 = vmul.f32 %v6455_v57, %v3233_v51  ;;  %v3776_v40 = vmul.f32 %v6459_v7, %v3379_v48 }
 0x41d   : > { %v3936_v41 = vmax.f32 %v3872_v42, 0.0  ;;  %v3938_v58 = vmax.f32 %v3874_v30, 0.0  ;;  %v3775_v32 = vmul.f32 %v6465_v1, %v3235_v0  ;;  %v3777_v45 = vmul.f32 %v6469_v39, %v3381_v28 }
 0x41e   : > { %v3873_v20 = vadd.f32 %v6483_v16, %v3767_v62  ;;  %v3875_v61 = vadd.f32 %v6487_v18, %v3769_v59  ;;  %v3880_v38 = vadd.f32 %v6475_v23, %v3774_v46  ;;  %v3882_v4 = vadd.f32 %v6479_v8, %v3776_v40 }
 0x41f   : > { %v4027_v5 = vsel %vm3977_vm6, %v3936_v41, 0.0  ;;  %v4029_v57 = vsel %vm3977_vm6, %v3938_v58, 0.0  ;;  %v3881_v7 = vadd.f32 %v6483_v16, %v3775_v32  ;;  %v3883_v1 = vadd.f32 %v6487_v18, %v3777_v45 }
 0x420   : > { %v4048_v29 = vmax.f32 %v4047_v9, %v4027_v5  ;;  %v4074_v39 = vmax.f32 %v4073_v34, %v4029_v57  ;;  %v3937_v54 = vmax.f32 %v3873_v20, 0.0  ;;  %v3939_v14 = vmax.f32 %v3875_v61, 0.0 }
 0x421   : > { %v3944_v2 = vmax.f32 %v3880_v38, 0.0  ;;  %v3946_v24 = vmax.f32 %v3882_v4, 0.0  ;;  %v3945_v35 = vmax.f32 %v3881_v7, 0.0  ;;  %v3947_v23 = vmax.f32 %v3883_v1, 0.0 }
 0x422   : > { %v4028_v8 = vsel %vm3977_vm6, %v3937_v54, 0.0  ;;  %v4030_v3 = vsel %vm3977_vm6, %v3939_v14, 0.0  ;;  %v3696_v1 = vsub.s32 4, %v5925_v49  ;;  %v3708_v54 = vsub.s32 7, %v5925_v49 }
 0x423   : > { %v4061_v63 = vmax.f32 %v4060_v56, %v4028_v8  ;;  %v4087_v51 = vmax.f32 %v4086_v53, %v4030_v3  ;;  %v4035_v16 = vsel %vm3978_vm7, %v3944_v2, 0.0  ;;  %v4037_v18 = vsel %vm3978_vm7, %v3946_v24, 0.0 }
 0x424   : > { %v4049_v48 = vmax.f32 %v4048_v29, %v4035_v16  ;;  %v4075_v11 = vmax.f32 %v4074_v39, %v4037_v18  ;;  %v4036_v22 = vsel %vm3978_vm7, %v3945_v35, 0.0  ;;  %v4038_v37 = vsel %vm3978_vm7, %v3947_v23, 0.0 }
 0x425   : > { %v4062_v6 = vmax.f32 %v4061_v63, %v4036_v22  ;;  %v4088_v0 = vmax.f32 %v4087_v51, %v4038_v37  ;;  %v3704_v29 = vsub.s32 6, %v5925_v49  ;;  %v3700_v39 = vsub.s32 5, %v5925_v49 }
 0x426   : > { %v4050_v28 = vrot.slane %v4049_v48, 4  ;;  %v4076_v13 = vrot.slane %v4075_v11, 4  ;;  %v6666_v14 = vrot.slane %v6439_v10, %v3696_v1  ;;  %v6675_v35 = vrot.slane %v6444_v25, %v3696_v1 }
 0x427   : > { %v4063_v15 = vrot.slane %v4062_v6, 4  ;;  %v4089_v36 = vrot.slane %v4088_v0, 4  ;;  %v6669_v2 = vrot.slane %v6439_v10, %v3704_v29  ;;  %v6672_v24 = vrot.slane %v6439_v10, %v3700_v39 }
 0x428   : > { %v4051_v52 = vmax.f32 %v4049_v48, %v4050_v28  ;;  %v4077_v33 = vmax.f32 %v4075_v11, %v4076_v13  ;;  %v6678_v23 = vrot.slane %v6439_v10, %v3708_v54  ;;  %v6681_v3 = vrot.slane %v6444_v25, %v3704_v29 }
 0x429   : > { %v4064_v55 = vmax.f32 %v4062_v6, %v4063_v15  ;;  %v4090_v31 = vmax.f32 %v4088_v0, %v4089_v36  ;;  %v6684_v63 = vrot.slane %v6444_v25, %v3700_v39  ;;  %v6688_v48 = vrot.slane %v6444_v25, %v3708_v54 }
 0x42a   : > { %v4052_v26 = vrot.slane %v4051_v52, 2  ;;  %v4078_v9 = vrot.slane %v4077_v33, 2 }
 0x42b   : > { %v4065_v34 = vrot.slane %v4064_v55, 2  ;;  %v4091_v43 = vrot.slane %v4090_v31, 2 }
 0x42c   : > { %v4053_v44 = vmax.f32 %v4051_v52, %v4052_v26  ;;  %v4079_v56 = vmax.f32 %v4077_v33, %v4078_v9 }
 0x42d   : > { %v4066_v53 = vmax.f32 %v4064_v55, %v4065_v34  ;;  %v4092_v42 = vmax.f32 %v4090_v31, %v4091_v43 }
 0x42e   : > { %v4054_v30 = vrot.slane %v4053_v44, 1  ;;  %v4080_v62 = vrot.slane %v4079_v56, 1 }
 0x42f   : > { %v4067_v59 = vrot.slane %v4066_v53, 1  ;;  %v4093_v46 = vrot.slane %v4092_v42, 1 }
 0x430   : > { %v6637_v40 = vmax.f32 %v4053_v44, %v4054_v30  ;;  %v6639_v41 = vmax.f32 %v4079_v56, %v4080_v62 }
 0x431   : > { %v6641_v58 = vmax.f32 %v4066_v53, %v4067_v59  ;;  %v6643_v32 = vmax.f32 %v4092_v42, %v4093_v46 }
 0x44d   : > { %v6645_v45 = vpop.f32.mrb[56].mxu0 }
 0x44e   : > { %v6647_v20 = vpop.f32.mrb[57].mxu0 }
 0x44f   : > { %v6649_v61 = vpop.f32.mrb[58].mxu0 }
 0x450   : > { %v6651_v38 = vpop.f32.mrb[59].mxu0 }
 0x455   : > { %v6653_v4 = vpop.f32.mrb[60].mxu0 }
 0x456   : > { %v6655_v5 = vpop.f32.mrb[61].mxu0 }
 0x457   : > { %v6657_v57 = vpop.f32.mrb[62].mxu0 }
 0x458   : > { %v6659_v7 = vpop.f32.mrb[63].mxu0 }
 0x47d   : > { %v3491_v8 = vpop.f32.mrb[32].mxu1 }
 0x47e   : > { %v3722_v51 = vmul.f32 %v6666_v14, %v3491_v8  ;;  %v3637_v16 = vpop.f32.mrb[48].mxu0  ;;  %v3493_v18 = vpop.f32.mrb[33].mxu1 }
 0x47f   : > { %v3724_v11 = vmul.f32 %v6669_v2, %v3637_v16  ;;  %v3723_v22 = vmul.f32 %v6672_v24, %v3493_v18  ;;  %v3639_v10 = vpop.f32.mrb[49].mxu0  ;;  %v3495_v37 = vpop.f32.mrb[34].mxu1 }
 0x480   : > { %v3828_v6 = vadd.f32 %v6675_v35, %v3722_v51  ;;  %v3725_v0 = vmul.f32 %v6678_v23, %v3639_v10  ;;  %v3730_v28 = vmul.f32 %v6666_v14, %v3495_v37  ;;  %v3641_v13 = vpop.f32.mrb[50].mxu0  ;;  %v3497_v15 = vpop.f32.mrb[35].mxu1 }
 0x481   : > { %v3830_v36 = vadd.f32 %v6681_v3, %v3724_v11  ;;  %v3829_v52 = vadd.f32 %v6684_v63, %v3723_v22  ;;  %v3732_v25 = vmul.f32 %v6669_v2, %v3641_v13  ;;  %v3731_v33 = vmul.f32 %v6672_v24, %v3497_v15  ;;  %v3643_v55 = vpop.f32.mrb[51].mxu0 }
 0x482   : > { %v3892_v31 = vmax.f32 %v3828_v6, 0.0  ;;  %v3831_v26 = vadd.f32 %v6688_v48, %v3725_v0  ;;  %v3836_v9 = vadd.f32 %v6675_v35, %v3730_v28  ;;  %v3733_v34 = vmul.f32 %v6678_v23, %v3643_v55 }
 0x483   : > { %v3894_v43 = vmax.f32 %v3830_v36, 0.0  ;;  %v3893_v44 = vmax.f32 %v3829_v52, 0.0  ;;  %v3838_v56 = vadd.f32 %v6681_v3, %v3732_v25  ;;  %v3837_v53 = vadd.f32 %v6684_v63, %v3731_v33 }
 0x484   : > { %v3983_v42 = vsel %vm3971_vm0, %v3892_v31, 0.0  ;;  %v3895_v30 = vmax.f32 %v3831_v26, 0.0  ;;  %v3900_v62 = vmax.f32 %v3836_v9, 0.0  ;;  %v3839_v59 = vadd.f32 %v6688_v48, %v3733_v34 }
 0x485   : > { %v3985_v46 = vsel %vm3971_vm0, %v3894_v43, 0.0  ;;  %v3984_v1 = vsel %vm3971_vm0, %v3893_v44, 0.0  ;;  %v3902_v29 = vmax.f32 %v3838_v56, 0.0  ;;  %v3901_v39 = vmax.f32 %v3837_v53, 0.0  ;;  %v3501_v54 = vpop.f32.mrb[36].mxu1 }
 0x486   : > { %v3986_v8 = vsel %vm3971_vm0, %v3895_v30, 0.0  ;;  %v3991_v51 = vsel %vm3972_vm1, %v3900_v62, 0.0  ;;  %v3903_v16 = vmax.f32 %v3839_v59, 0.0  ;;  %v3738_v18 = vmul.f32 %v6666_v14, %v3501_v54  ;;  %v3647_v11 = vpop.f32.mrb[52].mxu0  ;;  %v3503_v22 = vpop.f32.mrb[37].mxu1 }
 0x487   : > { %v4095_v10 = vmax.f32 %v3983_v42, %v3991_v51  ;;  %v3993_v37 = vsel %vm3972_vm1, %v3902_v29, 0.0  ;;  %v3992_v6 = vsel %vm3972_vm1, %v3901_v39, 0.0  ;;  %v3740_v0 = vmul.f32 %v6669_v2, %v3647_v11  ;;  %v3649_v28 = vpop.f32.mrb[53].mxu0  ;;  %v3505_v60 = vpop.f32.mrb[38].mxu1 }
 0x488   : > { %v4121_v13 = vmax.f32 %v3985_v46, %v3993_v37  ;;  %v4108_v15 = vmax.f32 %v3984_v1, %v3992_v6  ;;  %v3994_v36 = vsel %vm3972_vm1, %v3903_v16, 0.0  ;;  %v3844_v52 = vadd.f32 %v6675_v35, %v3738_v18  ;;  %v3651_v25 = vpop.f32.mrb[54].mxu0  ;;  %v3507_v33 = vpop.f32.mrb[39].mxu1 }
 0x489   : > { %v4134_v55 = vmax.f32 %v3986_v8, %v3994_v36  ;;  %v3846_v31 = vadd.f32 %v6681_v3, %v3740_v0  ;;  %v3739_v26 = vmul.f32 %v6672_v24, %v3503_v22  ;;  %v3741_v9 = vmul.f32 %v6678_v23, %v3649_v28  ;;  %v3653_v34 = vpop.f32.mrb[55].mxu0 }
 0x48a   : > { %v3908_v43 = vmax.f32 %v3844_v52, 0.0  ;;  %v3746_v44 = vmul.f32 %v6666_v14, %v3505_v60  ;;  %v3748_v56 = vmul.f32 %v6669_v2, %v3651_v25  ;;  %v3747_v19 = vmul.f32 %v6672_v24, %v3507_v33 }
 0x48b   : > { %v3910_v53 = vmax.f32 %v3846_v31, 0.0  ;;  %v3845_v42 = vadd.f32 %v6684_v63, %v3739_v26  ;;  %v3847_v30 = vadd.f32 %v6688_v48, %v3741_v9  ;;  %v3749_v62 = vmul.f32 %v6678_v23, %v3653_v34 }
 0x48c   : > { %v3999_v59 = vsel %vm3973_vm2, %v3908_v43, 0.0  ;;  %v3852_v46 = vadd.f32 %v6675_v35, %v3746_v44  ;;  %v3854_v1 = vadd.f32 %v6681_v3, %v3748_v56  ;;  %v3853_v29 = vadd.f32 %v6684_v63, %v3747_v19 }
 0x48d   : > { %v4096_v39 = vmax.f32 %v4095_v10, %v3999_v59  ;;  %v4001_v54 = vsel %vm3973_vm2, %v3910_v53, 0.0  ;;  %v3909_v8 = vmax.f32 %v3845_v42, 0.0  ;;  %v3911_v51 = vmax.f32 %v3847_v30, 0.0  ;;  %v3511_v16 = vpop.f32.mrb[40].mxu1 }
 0x48e   : > { %v6740_v18 = vmax.f32 %v4121_v13, %v4001_v54  ;;  %v3916_v11 = vmax.f32 %v3852_v46, 0.0  ;;  %v3918_v22 = vmax.f32 %v3854_v1, 0.0  ;;  %v3917_v37 = vmax.f32 %v3853_v29, 0.0  ;;  %v3513_v6 = vpop.f32.mrb[41].mxu1 }
 0x48f   : > { %v4000_v0 = vsel %vm3973_vm2, %v3909_v8, 0.0  ;;  %v4002_v28 = vsel %vm3973_vm2, %v3911_v51, 0.0  ;;  %v3855_v10 = vadd.f32 %v6688_v48, %v3749_v62  ;;  %v3754_v60 = vmul.f32 %v6666_v14, %v3511_v16  ;;  %v3515_v36 = vpop.f32.mrb[42].mxu1 }
 0x490   : > { %v4109_v52 = vmax.f32 %v4108_v15, %v4000_v0  ;;  %v6748_v25 = vmax.f32 %v4134_v55, %v4002_v28  ;;  %v4007_v13 = vsel %vm3974_vm3, %v3916_v11, 0.0  ;;  %v6754_v33 = vsel %vm3974_vm3, %v3918_v22, 0.0  ;;  %v3517_v31 = vpop.f32.mrb[43].mxu1 }
 0x491   : > { %v4097_v26 = vmax.f32 %v4096_v39, %v4007_v13  ;;  %v4123_v50 = vmax.f32 %v6740_v18, %v6754_v33  ;;  %v4008_v9 = vsel %vm3974_vm3, %v3917_v37, 0.0  ;;  %v3919_v34 = vmax.f32 %v3855_v10, 0.0 }
 0x492   : > { %v4110_v43 = vmax.f32 %v4109_v52, %v4008_v9  ;;  %v3860_v15 = vadd.f32 %v6675_v35, %v3754_v60  ;;  %v3755_v55 = vmul.f32 %v6672_v24, %v3513_v6  ;;  %v3762_v44 = vmul.f32 %v6666_v14, %v3515_v36 }
 0x493   : > { %v6765_v56 = vsel %vm3974_vm3, %v3919_v34, 0.0  ;;  %v3763_v19 = vmul.f32 %v6672_v24, %v3517_v31 }
 0x494   : > { %v4136_v53 = vmax.f32 %v6748_v25, %v6765_v56  ;;  %v3924_v42 = vmax.f32 %v3860_v15, 0.0  ;;  %v3861_v30 = vadd.f32 %v6684_v63, %v3755_v55  ;;  %v3868_v62 = vadd.f32 %v6675_v35, %v3762_v44 }
 0x495   : > { %v3869_v59 = vadd.f32 %v6684_v63, %v3763_v19  ;;  %v3521_v46 = vpop.f32.mrb[44].mxu1 }
 0x496   : > { %v4015_v1 = vsel %vm3975_vm4, %v3924_v42, 0.0  ;;  %v3925_v29 = vmax.f32 %v3861_v30, 0.0  ;;  %v3932_v12 = vmax.f32 %v3868_v62, 0.0  ;;  %v3770_v39 = vmul.f32 %v6666_v14, %v3521_v46  ;;  %v3523_v54 = vpop.f32.mrb[45].mxu1 }
 0x497   : > { %v4098_v8 = vmax.f32 %v4097_v26, %v4015_v1  ;;  %v3933_v51 = vmax.f32 %v3869_v59, 0.0  ;;  %v3771_v16 = vmul.f32 %v6672_v24, %v3523_v54  ;;  %v3525_v11 = vpop.f32.mrb[46].mxu1 }
 0x498   : > { %v4016_v22 = vsel %vm3975_vm4, %v3925_v29, 0.0  ;;  %v4023_v37 = vsel %vm3976_vm5, %v3932_v12, 0.0  ;;  %v3876_v6 = vadd.f32 %v6675_v35, %v3770_v39  ;;  %v3778_v0 = vmul.f32 %v6666_v14, %v3525_v11  ;;  %v3527_v28 = vpop.f32.mrb[47].mxu1 }
 0x499   : > { %v4111_v10 = vmax.f32 %v4110_v43, %v4016_v22  ;;  %v4099_v60 = vmax.f32 %v4098_v8, %v4023_v37  ;;  %v4024_v36 = vsel %vm3976_vm5, %v3933_v51, 0.0  ;;  %v3877_v52 = vadd.f32 %v6684_v63, %v3771_v16 }
 0x49a   : > { %v3940_v13 = vmax.f32 %v3876_v6, 0.0  ;;  %v3884_v31 = vadd.f32 %v6675_v35, %v3778_v0  ;;  %v3779_v26 = vmul.f32 %v6672_v24, %v3527_v28 }
 0x49b   : > { %v4112_v9 = vmax.f32 %v4111_v10, %v4024_v36  ;;  %v3941_v34 = vmax.f32 %v3877_v52, 0.0 }
 0x49c   : > { %v4031_v15 = vsel %vm3977_vm6, %v3940_v13, 0.0  ;;  %v3948_v55 = vmax.f32 %v3884_v31, 0.0  ;;  %v3885_v14 = vadd.f32 %v6684_v63, %v3779_v26 }
 0x49d   : > { %v4100_v43 = vmax.f32 %v4099_v60, %v4031_v15  ;;  %v4032_v44 = vsel %vm3977_vm6, %v3941_v34, 0.0 }
 0x49e   : > { %v4113_v19 = vmax.f32 %v4112_v9, %v4032_v44  ;;  %v4039_v42 = vsel %vm3978_vm7, %v3948_v55, 0.0  ;;  %v3949_v30 = vmax.f32 %v3885_v14, 0.0 }
 0x49f   : > { %v4101_v35 = vmax.f32 %v4100_v43, %v4039_v42 }
 0x4a0   : > { %v4040_v24 = vsel %vm3978_vm7, %v3949_v30, 0.0 }
 0x4a1   : > { %v4102_v62 = vrot.slane %v4101_v35, 4  ;;  %v4114_v59 = vmax.f32 %v4113_v19, %v4040_v24 }
 0x4a3   : > { %v4103_v46 = vmax.f32 %v4101_v35, %v4102_v62  ;;  %v4115_v1 = vrot.slane %v4114_v59, 4 }
 0x4a5   : > { %v4104_v29 = vrot.slane %v4103_v46, 2  ;;  %v4116_v12 = vmax.f32 %v4114_v59, %v4115_v1 }
 0x4a7   : > { %v4105_v63 = vmax.f32 %v4103_v46, %v4104_v29  ;;  %v4117_v39 = vrot.slane %v4116_v12, 2 }
 0x4a9   : > { %v4106_v54 = vrot.slane %v4105_v63, 1  ;;  %v4118_v8 = vmax.f32 %v4116_v12, %v4117_v39 }
 0x4ab   : > { %v6797_v51 = vmax.f32 %v4105_v63, %v4106_v54  ;;  %v4119_v16 = vrot.slane %v4118_v8, 1 }
 0x4ad   : > { %v6799_v11 = vmax.f32 %v4118_v8, %v4119_v16 }
 0x4be   : > { %v3657_v22 = vpop.f32.mrb[48].mxu1 }
 0x4bf   : > { %v3658_v37 = vadd.f32 %v3657_v22, %v6645_v45  ;;  %v3659_v6 = vpop.f32.mrb[49].mxu1 }
 0x4c0   : > { %v3660_v0 = vadd.f32 %v3659_v6, %v6647_v20  ;;  %v3661_v28 = vpop.f32.mrb[50].mxu1 }
 0x4c1   : > { %v3756_v10 = vmul.f32 %v6669_v2, %v3658_v37  ;;  %v3662_v60 = vadd.f32 %v3661_v28, %v6649_v61  ;;  %v3663_v36 = vpop.f32.mrb[51].mxu1 }
 0x4c2   : > { %v3757_v52 = vmul.f32 %v6678_v23, %v3660_v0  ;;  %v3664_v13 = vadd.f32 %v3663_v36, %v6651_v38 }
 0x4c3   : > { %v3862_v31 = vadd.f32 %v6681_v3, %v3756_v10  ;;  %v3764_v26 = vmul.f32 %v6669_v2, %v3662_v60 }
 0x4c4   : > { %v3863_v9 = vadd.f32 %v6688_v48, %v3757_v52  ;;  %v3765_v45 = vmul.f32 %v6678_v23, %v3664_v13 }
 0x4c5   : > { %v3926_v34 = vmax.f32 %v3862_v31, 0.0  ;;  %v3870_v20 = vadd.f32 %v6681_v3, %v3764_v26 }
 0x4c6   : > { %v3927_v15 = vmax.f32 %v3863_v9, 0.0  ;;  %v3871_v55 = vadd.f32 %v6688_v48, %v3765_v45  ;;  %v3667_v61 = vpop.f32.mrb[52].mxu1  ;;  %v4164_v9 = vunpack.c.l.s4 (!%p4809_p9), %v5547_v27  ;;  %v4159_v45 = vcombine.low (!%p4809_p9), %v6637_v40, %v6641_v58 }
 0x4c7   : > { %v4017_v14 = vsel %vm3975_vm4, %v3926_v34, 0.0  ;;  %v3934_v43 = vmax.f32 %v3870_v20, 0.0  ;;  %v3668_v38 = vadd.f32 %v3667_v61, %v6653_v4  ;;  %v3669_v44 = vpop.f32.mrb[53].mxu1  ;;  %v4160_v34 = vcombine.low (!%p4809_p9), %v6639_v41, %v6643_v32 }
 0x4c8   : > { %v4124_v19 = vmax.f32 %v4123_v50, %v4017_v14  ;;  %v4018_v42 = vsel %vm3975_vm4, %v3927_v15, 0.0  ;;  %v3935_v30 = vmax.f32 %v3871_v55, 0.0  ;;  %v3670_v35 = vadd.f32 %v3669_v44, %v6655_v5  ;;  %v3671_v24 = vpop.f32.mrb[54].mxu1 }
 0x4c9   : > { %v4137_v62 = vmax.f32 %v4136_v53, %v4018_v42  ;;  %v4025_v59 = vsel %vm3976_vm5, %v3934_v43, 0.0  ;;  %v3772_v4 = vmul.f32 %v6669_v2, %v3668_v38  ;;  %v3672_v46 = vadd.f32 %v3671_v24, %v6657_v57  ;;  %v3673_v18 = vpop.f32.mrb[55].mxu1 }
 0x4ca   : > { %v4125_v33 = vmax.f32 %v4124_v19, %v4025_v59  ;;  %v4026_v47 = vsel %vm3976_vm5, %v3935_v30, 0.0  ;;  %v3773_v50 = vmul.f32 %v6678_v23, %v3670_v35  ;;  %v3674_v5 = vadd.f32 %v3673_v18, %v6659_v7 }
 0x4cb   : > { %v4138_v1 = vmax.f32 %v4137_v62, %v4026_v47  ;;  %v3878_v25 = vadd.f32 %v6681_v3, %v3772_v4  ;;  %v3780_v56 = vmul.f32 %v6669_v2, %v3672_v46  ;;  %v4161_v20 = vcombine.low (!%p4809_p9), %v6797_v51, %v6799_v11 }
 0x4cc   : > { %v3879_v53 = vadd.f32 %v6688_v48, %v3773_v50  ;;  %v3781_v29 = vmul.f32 %v6678_v23, %v3674_v5  ;;  %v4165_v55 = vunpack.c.0.s8 (!%p4809_p9), %v4164_v9 }
 0x4cd   : > { %v3942_v12 = vmax.f32 %v3878_v25, 0.0  ;;  %v3886_v57 = vadd.f32 %v6681_v3, %v3780_v56 }
 0x4ce   : > { %v3943_v63 = vmax.f32 %v3879_v53, 0.0  ;;  %v3887_v17 = vadd.f32 %v6688_v48, %v3781_v29  ;;  %v4168_v61 = vsub.s32 (!%p4809_p9), %v4165_v55, %v5925_v49 }
 0x4cf   : > { %v4033_v39 = vsel %vm3977_vm6, %v3942_v12, 0.0  ;;  %v3950_v54 = vmax.f32 %v3886_v57, 0.0 }
 0x4d0   : > { %v4126_v7 = vmax.f32 %v4125_v33, %v4033_v39  ;;  %v4034_v8 = vsel %vm3977_vm6, %v3943_v63, 0.0  ;;  %v3951_v16 = vmax.f32 %v3887_v17, 0.0  ;;  %v4169_v14 = vrot.slane (!%p4809_p9), %v4159_v45, %v4168_v61 }
 0x4d1   : > { %v4139_v2 = vmax.f32 %v4138_v1, %v4034_v8  ;;  %v4041_v22 = vsel %vm3978_vm7, %v3950_v54, 0.0  ;;  %v4176_v43 = vrot.slane (!%p4809_p9), %v4160_v34, %v4168_v61  ;;  %v4183_v38 = vrot.slane (!%p4809_p9), %v4161_v20, %v4168_v61 }
 0x4d2   : > { %v4127_v23 = vmax.f32 %v4126_v7, %v4041_v22  ;;  %v4042_v3 = vsel %vm3978_vm7, %v3951_v16, 0.0 }
 0x4d3   : > { %v4140_v37 = vmax.f32 %v4139_v2, %v4042_v3  ;;  %v4191_v19 = vcombine.low (!%p4809_p9), %v4169_v14, %v4176_v43 }
 0x4d4   : > { %v4128_v48 = vrot.slane %v4127_v23, 4 }
 0x4d5   : > { %v4141_v6 = vrot.slane %v4140_v37, 4  ;;  %v4199_v30 = vrot.slane (!%p4809_p9), %v4191_v19, %v4168_v61 }
 0x4d6   : > { %v4129_v0 = vmax.f32 %v4127_v23, %v4128_v48 }
 0x4d7   : > { %v4142_v28 = vmax.f32 %v4140_v37, %v4141_v6 }
 0x4d8   : > { %v4130_v10 = vrot.slane %v4129_v0, 2 }
 0x4d9   : > { %v4143_v60 = vrot.slane %v4142_v28, 2  ;;  %4150 = sbr.rel (%p4809_p9) target bundleno = 1260 (0x4ec), region = 88 }
 0x4da   : > { %v4131_v36 = vmax.f32 %v4129_v0, %v4130_v10 }
 0x4db   : > { %v4144_v21 = vmax.f32 %v4142_v28, %v4143_v60 }
 0x4dc   : > { %v4132_v52 = vrot.slane %v4131_v36, 1 }
 0x4dd   : > { %v4145_v13 = vrot.slane %v4144_v21, 1 }
 0x4de   : > { %v4133_v31 = vmax.f32 %v4131_v36, %v4132_v52 }
 0x4df   : > { %v4146_v26 = vmax.f32 %v4144_v21, %v4145_v13 }
 0x4e1   : > { %v4162_v15 = vcombine.low %v4133_v31, %v4146_v26 }
 0x4e3   : > { %v4190_v44 = vrot.slane %v4162_v15, %v4168_v61 }
 0x4e5   : > { %v4192_v42 = vcombine.low %v4183_v38, %v4190_v44 }
 0x4e7   : > { %v4206_v35 = vrot.slane %v4192_v42, %v4168_v61 }
 0x4e9   : > { %v4207_v24 = vcombine.low %v4199_v30, %v4206_v35 }
 0x4eb   : > { %4209 = vst [vmem:[%s6848_s15] sm:$0xff] %v4207_v24 }
 0x4ec PF: > { %s6993_s12 = sld [smem:[#allocation21_spill]] }
 0x4f2   : > { %p4810_p0 = scmp.eq.s32.totalorder %s6993_s12, 0 }
 0x4f3   : > { %v5548_v62 = vmov (!%p4810_p0), 1966171168   ;;  %v4223_v4 = vcombine.low (!%p4810_p0), %v6637_v40, %v6641_v58  ;;  %v4224_v46 = vcombine.low (!%p4810_p0), %v6639_v41, %v6643_v32  ;;  %v4225_v18 = vcombine.low (!%p4810_p0), %v6797_v51, %v6799_v11  ;;  %v4214_v40 = vld [vmem:[%s6848_s15] sm:$0xff] (!%p4810_p0) }
 0x4f4   : > { %4213 = sbr.rel (%p4810_p0) target bundleno = 1285 (0x505), region = 92  ;;  %v4228_v59 = vunpack.c.l.s4 (!%p4810_p0), %v5548_v62  ;;  %v4226_v33 = vcombine.low (!%p4810_p0), %v4133_v31, %v4146_v26 }
 0x4f6   : > { %v4229_v47 = vunpack.c.0.s8 (!%p4810_p0), %v4228_v59 }
 0x4f8   : > { %v4232_v50 = vsub.s32 (!%p4810_p0), %v4229_v47, %v5925_v49 }
 0x4fa   : > { %v4233_v5 = vrot.slane (!%p4810_p0), %v4223_v4, %v4232_v50  ;;  %v4240_v1 = vrot.slane (!%p4810_p0), %v4224_v46, %v4232_v50  ;;  %v4247_v25 = vrot.slane (!%p4810_p0), %v4225_v18, %v4232_v50  ;;  %v4254_v56 = vrot.slane (!%p4810_p0), %v4226_v33, %v4232_v50 }
 0x4fc   : > { %v4255_v53 = vcombine.low %v4233_v5, %v4240_v1  ;;  %v4256_v29 = vcombine.low %v4247_v25, %v4254_v56 }
 0x4fe   : > { %v4263_v12 = vrot.slane %v4255_v53, %v4232_v50  ;;  %v4270_v57 = vrot.slane %v4256_v29, %v4232_v50 }
 0x500   : > { %v4271_v58 = vcombine.low %v4263_v12, %v4270_v57 }
 0x502   : > { %v4273_v63 = vmax.f32 %v4214_v40, %v4271_v58 }
 0x504   : > { %4274 = vst [vmem:[%s6848_s15] sm:$0xff] %v4273_v63 }
 0x505 PF: > { %s6994_s10 = sld [smem:[#allocation22_spill]]  ;;  %s6995_s6 = sld [smem:[#allocation25_spill]] }
 0x506   : > { %s6996_s19 = sld [smem:[#allocation34_spill]]  ;;  %s4290_s2 = sshll.u32 %s6848_s15, 4  ;;  %s4291_s2 = int_to_ptr.vmem [resolvable:$true] %s4290_s2 }
 0x507   : > { %s4276_s20 = scalar_lea.sflag [#allocation4], %s468_s26  ;;  %s5397_s28 = scalar_lea.vmem %s4291_s2, 128 }
 0x508   : > { %p5398_p1 = scmp.ne.s32.totalorder %s4291_s2, %s5397_s28  ;;  %s5549_s1 = smov [#allocation13]  }
 0x509   : > { %s5401_s30 = sshll.u32 %s5549_s1, 4  ;;  %s5402_s30 = int_to_ptr.vmem [resolvable:$false] %s5401_s30 }
 0x50a   : > { %s5403_s16 = scalar_lea.vmem %s5402_s30, 256  ;;  %p5404_p6 = scmp.lt.s32.totalorder %s4291_s2, %s5402_s30 }
 0x50b   : > { %s4818_s24 = sshll.u32 %s6994_s10, 7  ;;  %p6998_p2 = scmp.ne.s32.totalorder %s6995_s6, 0 }
 0x50c   : > { %s6997_s25 = smov %s6996_s19  ;;  %s6873_s13 = scalar_lea.hbm %s6996_s19, %s4818_s24 }
 0x50d   : > { %p5399_p8 = pnand %p5398_p1, %p6998_p2  ;;  %p5405_p11 = scmp.lt.s32.totalorder %s5403_s16, %s5397_s28 }
 0x50f   : > { %p5400_p4 = pneg %p5399_p8  ;;  %p5406_p3 = por %p5405_p11, %p5404_p6 }
 0x511   : > { %p5407_p7 = pnand %p5406_p3, %p5400_p4 }
 0x513   : > { %5410 = shalt.err (!%p5407_p7)
}
 0x514   : > { %s5411_s26 = scalar_lea.hbm %s6873_s13, 128  ;;  %s5415_s29 = scalar_lea.hbm %s6997_s25, 256 }
 0x515   : > { %p5412_p5 = scmp.ne.s32.totalorder %s6873_s13, %s5411_s26  ;;  %p5416_p13 = scmp.lt.u32.totalorder %s6873_s13, %s6997_s25 }
 0x516   : > { %p5417_p9 = scmp.lt.u32.totalorder %s5415_s29, %s5411_s26  ;;  %p5419_p1 = scmp.lt.u32.totalorder %s5411_s26, %s6873_s13 }
 0x517   : > { %p5413_p12 = pnand %p5412_p5, %p6998_p2 }
 0x518   : > { %p5418_p0 = por %p5417_p9, %p5416_p13 }
 0x519   : > { %p5414_p10 = pneg %p5413_p12 }
 0x51a   : > { %p5420_p8 = por %p5419_p1, %p5418_p0 }
 0x51c   : > { %p5421_p4 = pnand %p5420_p8, %p5414_p10 }
 0x51e   : > { %5424 = shalt.err (!%p5421_p4)
}
 0x51f   : > { %4937 = dma.vmem_to_hbm [thread:$0]  (%p6998_p2), %s4291_s2, 128, %s6873_s13, %s4276_s20  }
 0x520 PF: > { %s6999_s10 = sld [smem:[#allocation19_spill]]  ;;  %s7000_s24 = sld [smem:[#allocation28_spill]] }
 0x521   : > { %p4969_p6 = scmp.ge.s32.totalorder %s5531_s23, 2 }
 0x526   : > { %s4302_s11 = sand.u32 1, %s6999_s10   ;;  %p7001_p11 = scmp.ne.s32.totalorder %s7000_s24, 0 }
 0x527   : > { %s4303_s9 = scalar_lea.sflag [#allocation4], %s4302_s11 }
 0x528   : > { %p4956_p3 = pnand %p4969_p6, %p7001_p11 }
 0x52a   : > { %5486 = dma.done.wait (!%p4956_p3), %s4303_s9, 128  }
 0x52b   : > { %5488 = vsyncadd (!%p4956_p3), %s4303_s9, 4294967168  ;;  %s29_s23 = sadd.s32 1, %s5531_s23   ;;  %s7002_s19 = sld [smem:[#allocation20_spill]] }
 0x52c   : > { %p26_p7 = scmp.ge.s32.totalorder %s29_s23, 6   ;;  %s7003_s15 = sld [smem:[#allocation26_spill]] }
 0x52d   : > { %s7004_s6 = sld [smem:[#allocation27_spill]]  ;;  %s7005_s2 = sld [smem:[#allocation23_spill]] }
 0x52e   : > { %s7006_s28 = sld [smem:[#allocation24_spill]]  ;;  %s7007_s13 = smov %s5495_s14 }
 0x52f   : > { %s7009_s16 = smov %s5507_s17  ;;  %s7010_s17 = smov %s5511_s18 }
 0x530   : > { %s7013_s20 = smov %s5527_s22  ;;  %28 = sbr.rel (!%p26_p7) target bundleno = 19 (0x13), region = 133 }
 0x531   : > { %s7008_s14 = smov %s7002_s19  ;;  %s7012_s19 = smov %s5523_s21 }
 0x533   : > { %s7011_s18 = smov %s7004_s6  ;;  %s7014_s21 = smov %s7005_s2 }
 0x534   : > { %s7015_s22 = smov %s7006_s28 }
 0x537   :  { %4308 = vsyncpa [#allocation3], 1 }
 0x538   :  { %4310 = vsyncpa [#allocation3 + $0x1], 1 }
 0x539   :  { %4311 = vsyncpa [#allocation6], 1 }
 0x53a   :  { %4312 = vsyncpa [#allocation9], 1 }
 0x53b   :  { %4313 = vsyncpa [#allocation12], 1 }
 0x53c   :  { %4314 = vsyncpa [#allocation4], 1 }
 0x53d   :  { %4316 = vsyncpa [#allocation4 + $0x1], 1 }

</bundles_post_ra>
